<compile_context>
chip_gen: v6e
topology: v6e:2x2x1
jax: 0.10.0
libtpu: 0.0.40
codegen_flags: <defaults>
</compile_context>

<pallas_src>
import jax
import jax.numpy as jnp
from jax import lax
from jax.experimental import pallas as pl
from jax.experimental.pallas import tpu as pltpu

# ----------------------------- model hyper-params (small) -----------------------------
B = 2              # batch
C_IN = 3           # rgb
T = 8              # modelinfo['timesteps']
IMG = 16           # modelinfo['dim']
PATCH = (2, 4, 4)  # (kt, kh, kw), stride == kernel
D = 32             # embed dim of the synthetic backbone
NH = 2             # attention heads
DH = D // NH       # head dim
MLP_HID = 4 * D    # transformer MLP hidden
N_BLOCKS = 2       # transformer depth (stand-in for mvit_v1_b depth)
LAST_N_NEURONS = 384
N_OUT = T          # segmentation output layer width (timesteps)

NP = (T // PATCH[0]) * (IMG // PATCH[1]) * (IMG // PATCH[2])   # 64 patches
SEQ = NP + 1                                                   # + cls token = 65
SEQ_P = 72                                                     # padded seq (mult of 8)
CLS_IDX = NP                                                   # cls token row (aligned)
PATCH_DIM = C_IN * PATCH[0] * PATCH[1] * PATCH[2]              # 96

LN_EPS = 1e-6
ATTN_SCALE = 1.0 / (DH ** 0.5)
NEG_INF = -1e30


# ----------------------------- in-kernel helpers -----------------------------
def _ln(x, g, b):
    """LayerNorm over last axis (f32 math). x:(M,D), g/b:(1,D)."""
    mean = jnp.mean(x, axis=-1, keepdims=True)
    var = jnp.mean(jnp.square(x - mean), axis=-1, keepdims=True)
    return (x - mean) * lax.rsqrt(var + LN_EPS) * g + b


# ----------------------------- single fused kernel -----------------------------
def _fused_kernel(xp_ref, patch_w, patch_b, cls_tok, pos_emb,
                  ln1_g, ln1_b, qkv_w, qkv_b, proj_w, proj_b,
                  ln2_g, ln2_b, fc1_w, fc1_b, fc2_w, fc2_b,
                  lnf_g, lnf_b, feat_w, feat_b, out_w, out_b,
                  o_ref, xbuf, attn_buf):
    # ---- patch embedding: Conv3d (stride == kernel) expressed as a matmul ----
    xp = xp_ref[0].astype(jnp.bfloat16)                               # (NP, PATCH_DIM)
    tok = jnp.dot(xp, patch_w[...],
                  preferred_element_type=jnp.float32) + patch_b[...]  # (NP, D) f32

    # ---- assemble sequence in VMEM scratch (all writes sublane-aligned) ----
    # rows 0..NP-1 : patch tokens, row NP : cls token, rows NP+1..SEQ_P-1 : zero pad
    pe = pos_emb[...]                                                 # (SEQ_P, D), pad rows are 0
    xbuf[0:NP, :] = tok + pe[0:NP, :]
    xbuf[NP:SEQ_P, :] = jnp.zeros((SEQ_P - NP, D), jnp.float32)
    xbuf[CLS_IDX:CLS_IDX + 1, :] = cls_tok[...] + pe[CLS_IDX:CLS_IDX + 1, :]
    x = xbuf[...]                                                     # (SEQ_P, D) f32

    key_valid = lax.broadcasted_iota(jnp.int32, (1, SEQ_P), 1) < SEQ  # mask padded keys

    for l in range(N_BLOCKS):      # static unroll; all block weights VMEM-resident
        # ---- attention sub-block ----
        h = _ln(x, ln1_g[l], ln1_b[l])
        qkv = jnp.dot(h.astype(jnp.bfloat16), qkv_w[l],
                      preferred_element_type=jnp.float32) + qkv_b[l]  # (S, 3D)
        for hh in range(NH):
            q = qkv[:, hh * DH:(hh + 1) * DH].astype(jnp.bfloat16)
            k = qkv[:, D + hh * DH:D + (hh + 1) * DH].astype(jnp.bfloat16)
            v = qkv[:, 2 * D + hh * DH:2 * D + (hh + 1) * DH].astype(jnp.bfloat16)
            # q @ k^T via contraction dims (no explicit transpose)
            s = lax.dot_general(q, k, (((1,), (1,)), ((), ())),
                                preferred_element_type=jnp.float32) * ATTN_SCALE
            s = jnp.where(key_valid, s, NEG_INF)
            m = jnp.max(s, axis=-1, keepdims=True)
            p = jnp.exp(s - m)
            p = p / jnp.sum(p, axis=-1, keepdims=True)                # exact softmax
            ho = jnp.dot(p.astype(jnp.bfloat16), v,
                         preferred_element_type=jnp.float32)          # (S, DH)
            # write head output into its column slot of the bf16 scratch
            attn_buf[:, hh * DH:(hh + 1) * DH] = ho.astype(jnp.bfloat16)
        attn = jnp.dot(attn_buf[...], proj_w[l],
                       preferred_element_type=jnp.float32) + proj_b[l]
        x = x + attn

        # ---- MLP sub-block ----
        h = _ln(x, ln2_g[l], ln2_b[l])
        h = jnp.dot(h.astype(jnp.bfloat16), fc1_w[l],
                    preferred_element_type=jnp.float32) + fc1_b[l]
        # TODO(synk): PyTorch nn.GELU() defaults to exact erf; erf is not reliably
        #             lowered by Mosaic, so the tanh approximation is used here.
        h = jax.nn.gelu(h, approximate=True)
        h = jnp.dot(h.astype(jnp.bfloat16), fc2_w[l],
                    preferred_element_type=jnp.float32) + fc2_b[l]
        x = x + h

    # ---- head, fused: final LN on cls row only -> Flatten -> Linear -> ReLU -> out ----
    cls_row = x[CLS_IDX:CLS_IDX + 1, :]                               # (1, D)
    hc = _ln(cls_row, lnf_g[...], lnf_b[...])
    f = jnp.dot(hc.astype(jnp.bfloat16), feat_w[...],
                preferred_element_type=jnp.float32) + feat_b[...]
    f = jnp.maximum(f, 0.0)                                           # F.relu(self.features(x))
    o = jnp.dot(f.astype(jnp.bfloat16), out_w[...],
                preferred_element_type=jnp.float32) + out_b[...]
    o_ref[0] = o                                                      # (1, N_OUT)


def fused_forward(xp, p):
    """xp: (B, NP, PATCH_DIM) f32 -> (B, N_OUT) f32.  One pallas_call total."""
    b = xp.shape[0]
    blk = p["blocks"]
    weights = [
        p["patch_w"], p["patch_b"], p["cls_token"], p["pos_embed"],
        blk["ln1_g"], blk["ln1_b"], blk["qkv_w"], blk["qkv_b"],
        blk["proj_w"], blk["proj_b"], blk["ln2_g"], blk["ln2_b"],
        blk["fc1_w"], blk["fc1_b"], blk["fc2_w"], blk["fc2_b"],
        p["lnf_g"], p["lnf_b"], p["features_w"], p["features_b"],
        p["out_w"], p["out_b"],
    ]

    def wspec(a):
        # Constant block index across the batch grid -> weights DMA'd once.
        # (pl.Buffered(1) would also drop the second buffer, but at ~60 KB of
        #  weights it is not worth the extra constraint at this size.)
        nd = a.ndim
        return pl.BlockSpec(a.shape, lambda i, _nd=nd: (0,) * _nd)

    out = pl.pallas_call(
        _fused_kernel,
        out_shape=jax.ShapeDtypeStruct((b, 1, N_OUT), jnp.float32),
        grid=(b,),
        in_specs=[pl.BlockSpec((1, NP, PATCH_DIM), lambda i: (i, 0, 0))]
                 + [wspec(a) for a in weights],
        out_specs=pl.BlockSpec((1, 1, N_OUT), lambda i: (i, 0, 0)),
        scratch_shapes=[pltpu.VMEM((SEQ_P, D), jnp.float32),    # residual-stream assembly
                        pltpu.VMEM((SEQ_P, D), jnp.bfloat16)],  # per-head attention output
        compiler_params=pltpu.CompilerParams(dimension_semantics=("parallel",)),
    )(xp, *weights)
    return out[:, 0, :]


# ----------------------------- parameter init -----------------------------
def init_params(key):
    def nrm(k, shape, std=0.02, dtype=jnp.float32):
        return (std * jax.random.normal(k, shape)).astype(dtype)

    keys = iter(jax.random.split(key, 32))
    bf = jnp.bfloat16

    # pos_embed stored already padded to SEQ_P (zeros on padded rows).
    pos = nrm(next(keys), (SEQ, D))
    pos = jnp.pad(pos, ((0, SEQ_P - SEQ), (0, 0)))

    p = {
        # matmul weights stored bf16 (MXU-native, half the DMA bytes);
        # biases / LN params / embeddings stay f32.
        "patch_w": nrm(next(keys), (PATCH_DIM, D), dtype=bf),
        "patch_b": jnp.zeros((1, D), jnp.float32),
        "cls_token": nrm(next(keys), (1, D)),
        "pos_embed": pos,
        "lnf_g": jnp.ones((1, D), jnp.float32),
        "lnf_b": jnp.zeros((1, D), jnp.float32),
        "features_w": nrm(next(keys), (D, LAST_N_NEURONS), dtype=bf),
        "features_b": jnp.zeros((1, LAST_N_NEURONS), jnp.float32),
        "out_w": nrm(next(keys), (LAST_N_NEURONS, N_OUT), dtype=bf),
        "out_b": jnp.zeros((1, N_OUT), jnp.float32),
        "blocks": {
            "ln1_g": jnp.ones((N_BLOCKS, 1, D), jnp.float32),
            "ln1_b": jnp.zeros((N_BLOCKS, 1, D), jnp.float32),
            "qkv_w": nrm(next(keys), (N_BLOCKS, D, 3 * D), dtype=bf),
            "qkv_b": jnp.zeros((N_BLOCKS, 1, 3 * D), jnp.float32),
            "proj_w": nrm(next(keys), (N_BLOCKS, D, D), dtype=bf),
            "proj_b": jnp.zeros((N_BLOCKS, 1, D), jnp.float32),
            "ln2_g": jnp.ones((N_BLOCKS, 1, D), jnp.float32),
            "ln2_b": jnp.zeros((N_BLOCKS, 1, D), jnp.float32),
            "fc1_w": nrm(next(keys), (N_BLOCKS, D, MLP_HID), dtype=bf),
            "fc1_b": jnp.zeros((N_BLOCKS, 1, MLP_HID), jnp.float32),
            "fc2_w": nrm(next(keys), (N_BLOCKS, MLP_HID, D), dtype=bf),
            "fc2_b": jnp.zeros((N_BLOCKS, 1, D), jnp.float32),
        },
    }
    return p


# ----------------------------- forward -----------------------------
def mvit_forward(x, params):
    """x: (B, 3, T, IMG, IMG) float32 -> (B, N_OUT) float32."""
    b, c, t, h, w = x.shape
    kt, kh, kw = PATCH

    # 3D patch extraction: the only XLA glue left (8-D transpose does not lower
    # well in Mosaic).  Everything else runs in the single fused Pallas kernel.
    xp = x.reshape(b, c, t // kt, kt, h // kh, kh, w // kw, kw)
    xp = xp.transpose(0, 2, 4, 6, 1, 3, 5, 7)        # (B, T', H', W', C, kt, kh, kw)
    xp = xp.reshape(b, NP, PATCH_DIM)

    return fused_forward(xp, params)


# ----------------------------- main -----------------------------
if __name__ == "__main__":
    key = jax.random.PRNGKey(0)
    k_x, k_p = jax.random.split(key)
    x = jax.random.normal(k_x, (B, C_IN, T, IMG, IMG), dtype=jnp.float32)
    params = init_params(k_p)

    fwd = jax.jit(mvit_forward)
    out = fwd(x, params)
    jax.block_until_ready(out)

    assert out.shape == (B, N_OUT), out.shape
    assert bool(jnp.all(jnp.isfinite(out)))
    print("KERNEL_OK")
</pallas_src>

<mosaic_0001>
module attributes {stable_mosaic.version = 11 : i64} {
  func.func @_fused_kernel(%arg0: i32, %arg1: memref<1x64x96xf32, #tpu.memory_space<vmem>>, %arg2: memref<96x32xbf16, #tpu.memory_space<vmem>>, %arg3: memref<1x32xf32, #tpu.memory_space<vmem>>, %arg4: memref<1x32xf32, #tpu.memory_space<vmem>>, %arg5: memref<72x32xf32, #tpu.memory_space<vmem>>, %arg6: memref<2x1x32xf32, #tpu.memory_space<vmem>>, %arg7: memref<2x1x32xf32, #tpu.memory_space<vmem>>, %arg8: memref<2x32x96xbf16, #tpu.memory_space<vmem>>, %arg9: memref<2x1x96xf32, #tpu.memory_space<vmem>>, %arg10: memref<2x32x32xbf16, #tpu.memory_space<vmem>>, %arg11: memref<2x1x32xf32, #tpu.memory_space<vmem>>, %arg12: memref<2x1x32xf32, #tpu.memory_space<vmem>>, %arg13: memref<2x1x32xf32, #tpu.memory_space<vmem>>, %arg14: memref<2x32x128xbf16, #tpu.memory_space<vmem>>, %arg15: memref<2x1x128xf32, #tpu.memory_space<vmem>>, %arg16: memref<2x128x32xbf16, #tpu.memory_space<vmem>>, %arg17: memref<2x1x32xf32, #tpu.memory_space<vmem>>, %arg18: memref<1x32xf32, #tpu.memory_space<vmem>>, %arg19: memref<1x32xf32, #tpu.memory_space<vmem>>, %arg20: memref<32x384xbf16, #tpu.memory_space<vmem>>, %arg21: memref<1x384xf32, #tpu.memory_space<vmem>>, %arg22: memref<384x8xbf16, #tpu.memory_space<vmem>>, %arg23: memref<1x8xf32, #tpu.memory_space<vmem>>, %arg24: memref<1x1x8xf32, #tpu.memory_space<vmem>>, %arg25: memref<72x32xf32, #tpu.memory_space<vmem>>, %arg26: memref<72x32xbf16, #tpu.memory_space<vmem>>) attributes {dimension_semantics = [#tpu.dimension_semantics<parallel>], iteration_bounds = array<i64: 2>, scalar_prefetch = 0 : i64, scratch_operands = 2 : i64, tpu.core_type = #tpu.core_type<tc>, window_params = [{transform_indices = @transform_0, window_bounds = array<i64: 1, 64, 96>}, {pipeline_mode = #tpu.pipeline_mode<synchronous>, transform_indices = @transform_1, window_bounds = array<i64: 96, 32>}, {pipeline_mode = #tpu.pipeline_mode<synchronous>, transform_indices = @transform_2, window_bounds = array<i64: 1, 32>}, {pipeline_mode = #tpu.pipeline_mode<synchronous>, transform_indices = @transform_3, window_bounds = array<i64: 1, 32>}, {pipeline_mode = #tpu.pipeline_mode<synchronous>, transform_indices = @transform_4, window_bounds = array<i64: 72, 32>}, {pipeline_mode = #tpu.pipeline_mode<synchronous>, transform_indices = @transform_5, window_bounds = array<i64: 2, 1, 32>}, {pipeline_mode = #tpu.pipeline_mode<synchronous>, transform_indices = @transform_6, window_bounds = array<i64: 2, 1, 32>}, {pipeline_mode = #tpu.pipeline_mode<synchronous>, transform_indices = @transform_7, window_bounds = array<i64: 2, 32, 96>}, {pipeline_mode = #tpu.pipeline_mode<synchronous>, transform_indices = @transform_8, window_bounds = array<i64: 2, 1, 96>}, {pipeline_mode = #tpu.pipeline_mode<synchronous>, transform_indices = @transform_9, window_bounds = array<i64: 2, 32, 32>}, {pipeline_mode = #tpu.pipeline_mode<synchronous>, transform_indices = @transform_10, window_bounds = array<i64: 2, 1, 32>}, {pipeline_mode = #tpu.pipeline_mode<synchronous>, transform_indices = @transform_11, window_bounds = array<i64: 2, 1, 32>}, {pipeline_mode = #tpu.pipeline_mode<synchronous>, transform_indices = @transform_12, window_bounds = array<i64: 2, 1, 32>}, {pipeline_mode = #tpu.pipeline_mode<synchronous>, transform_indices = @transform_13, window_bounds = array<i64: 2, 32, 128>}, {pipeline_mode = #tpu.pipeline_mode<synchronous>, transform_indices = @transform_14, window_bounds = array<i64: 2, 1, 128>}, {pipeline_mode = #tpu.pipeline_mode<synchronous>, transform_indices = @transform_15, window_bounds = array<i64: 2, 128, 32>}, {pipeline_mode = #tpu.pipeline_mode<synchronous>, transform_indices = @transform_16, window_bounds = array<i64: 2, 1, 32>}, {pipeline_mode = #tpu.pipeline_mode<synchronous>, transform_indices = @transform_17, window_bounds = array<i64: 1, 32>}, {pipeline_mode = #tpu.pipeline_mode<synchronous>, transform_indices = @transform_18, window_bounds = array<i64: 1, 32>}, {pipeline_mode = #tpu.pipeline_mode<synchronous>, transform_indices = @transform_19, window_bounds = array<i64: 32, 384>}, {pipeline_mode = #tpu.pipeline_mode<synchronous>, transform_indices = @transform_20, window_bounds = array<i64: 1, 384>}, {pipeline_mode = #tpu.pipeline_mode<synchronous>, transform_indices = @transform_21, window_bounds = array<i64: 384, 8>}, {pipeline_mode = #tpu.pipeline_mode<synchronous>, transform_indices = @transform_22, window_bounds = array<i64: 1, 8>}, {transform_indices = @transform_23, window_bounds = array<i64: 1, 1, 8>}]} {
    %c0 = arith.constant 0 : index
    %c0_0 = arith.constant 0 : index
    %c0_1 = arith.constant 0 : index
    %0 = vector.load %arg1[%c0, %c0_0, %c0_1] : memref<1x64x96xf32, #tpu.memory_space<vmem>>, vector<1x64x96xf32>
    %1 = vector.shape_cast %0 : vector<1x64x96xf32> to vector<64x96xf32>
    %2 = arith.truncf %1 : vector<64x96xf32> to vector<64x96xbf16>
    %c0_2 = arith.constant 0 : index
    %c0_3 = arith.constant 0 : index
    %3 = vector.load %arg2[%c0_2, %c0_3] : memref<96x32xbf16, #tpu.memory_space<vmem>>, vector<96x32xbf16>
    %cst = arith.constant dense<0.000000e+00> : vector<64x32xf32>
    %4 = tpu.matmul %2, %3, %cst {dimension_numbers = #tpu.dot_dimension_numbers<[1], [0], [0], [1], [0, 0, 1, 1], [], []>} : vector<64x96xbf16>, vector<96x32xbf16>, vector<64x32xf32> -> vector<64x32xf32>
    %c0_4 = arith.constant 0 : index
    %c0_5 = arith.constant 0 : index
    %5 = vector.load %arg3[%c0_4, %c0_5] : memref<1x32xf32, #tpu.memory_space<vmem>>, vector<1x32xf32>
    %6 = vector.broadcast %5 : vector<1x32xf32> to vector<64x32xf32>
    %7 = arith.addf %4, %6 : vector<64x32xf32>
    %c0_6 = arith.constant 0 : index
    %c0_7 = arith.constant 0 : index
    %8 = vector.load %arg5[%c0_6, %c0_7] : memref<72x32xf32, #tpu.memory_space<vmem>>, vector<72x32xf32>
    %9 = vector.extract_strided_slice %8 {offsets = [0, 0], sizes = [64, 32], strides = [1, 1]} : vector<72x32xf32> to vector<64x32xf32>
    %10 = arith.addf %7, %9 : vector<64x32xf32>
    %c0_8 = arith.constant 0 : index
    %c0_9 = arith.constant 0 : index
    %11 = vector.load %arg25[%c0_8, %c0_9] : memref<72x32xf32, #tpu.memory_space<vmem>>, vector<64x32xf32>
    tpu.vector_store %arg25[%c0_8, %c0_9], %10 {strides = array<i32>} : memref<72x32xf32, #tpu.memory_space<vmem>>, vector<64x32xf32>,
    %cst_10 = arith.constant 0.000000e+00 : f32
    %12 = vector.broadcast %cst_10 : f32 to vector<8x32xf32>
    %c64 = arith.constant 64 : index
    %c0_11 = arith.constant 0 : index
    %13 = vector.load %arg25[%c64, %c0_11] : memref<72x32xf32, #tpu.memory_space<vmem>>, vector<8x32xf32>
    tpu.vector_store %arg25[%c64, %c0_11], %12 {strides = array<i32>} : memref<72x32xf32, #tpu.memory_space<vmem>>, vector<8x32xf32>,
    %c0_12 = arith.constant 0 : index
    %c0_13 = arith.constant 0 : index
    %14 = vector.load %arg4[%c0_12, %c0_13] : memref<1x32xf32, #tpu.memory_space<vmem>>, vector<1x32xf32>
    %15 = vector.extract_strided_slice %8 {offsets = [64, 0], sizes = [1, 32], strides = [1, 1]} : vector<72x32xf32> to vector<1x32xf32>
    %16 = arith.addf %14, %15 : vector<1x32xf32>
    %c64_14 = arith.constant 64 : index
    %c0_15 = arith.constant 0 : index
    %17 = vector.load %arg25[%c64_14, %c0_15] : memref<72x32xf32, #tpu.memory_space<vmem>>, vector<1x32xf32>
    tpu.vector_store %arg25[%c64_14, %c0_15], %16 {strides = array<i32>} : memref<72x32xf32, #tpu.memory_space<vmem>>, vector<1x32xf32>,
    %c0_16 = arith.constant 0 : index
    %c0_17 = arith.constant 0 : index
    %18 = vector.load %arg25[%c0_16, %c0_17] : memref<72x32xf32, #tpu.memory_space<vmem>>, vector<72x32xf32>
    %19 = tpu.iota {dimensions = array<i32: 1>} : vector<1x72xi32>
    %c65_i32 = arith.constant 65 : i32
    %20 = vector.broadcast %c65_i32 : i32 to vector<1x72xi32>
    %21 = arith.cmpi slt, %19, %20 : vector<1x72xi32>
    %c0_18 = arith.constant 0 : index
    %c0_19 = arith.constant 0 : index
    %c0_20 = arith.constant 0 : index
    %22 = vector.load %arg6[%c0_18, %c0_19, %c0_20] : memref<2x1x32xf32, #tpu.memory_space<vmem>>, vector<1x1x32xf32>
    %23 = vector.shape_cast %22 : vector<1x1x32xf32> to vector<1x32xf32>
    %c0_21 = arith.constant 0 : index
    %c0_22 = arith.constant 0 : index
    %c0_23 = arith.constant 0 : index
    %24 = vector.load %arg7[%c0_21, %c0_22, %c0_23] : memref<2x1x32xf32, #tpu.memory_space<vmem>>, vector<1x1x32xf32>
    %25 = vector.shape_cast %24 : vector<1x1x32xf32> to vector<1x32xf32>
    %cst_24 = arith.constant dense<0.000000e+00> : vector<72xf32>
    %26 = vector.multi_reduction <add>, %18, %cst_24 [1] : vector<72x32xf32> to vector<72xf32>
    %27 = vector.shape_cast %26 : vector<72xf32> to vector<72x1xf32>
    %cst_25 = arith.constant 3.200000e+01 : f32
    %28 = vector.broadcast %cst_25 : f32 to vector<72x1xf32>
    %29 = arith.divf %27, %28 : vector<72x1xf32>
    %30 = vector.broadcast %29 : vector<72x1xf32> to vector<72x32xf32>
    %31 = arith.subf %18, %30 : vector<72x32xf32>
    %32 = arith.mulf %31, %31 : vector<72x32xf32>
    %cst_26 = arith.constant dense<0.000000e+00> : vector<72xf32>
    %33 = vector.multi_reduction <add>, %32, %cst_26 [1] : vector<72x32xf32> to vector<72xf32>
    %34 = vector.shape_cast %33 : vector<72xf32> to vector<72x1xf32>
    %cst_27 = arith.constant 3.200000e+01 : f32
    %35 = vector.broadcast %cst_27 : f32 to vector<72x1xf32>
    %36 = arith.divf %34, %35 : vector<72x1xf32>
    %37 = vector.broadcast %29 : vector<72x1xf32> to vector<72x32xf32>
    %38 = arith.subf %18, %37 : vector<72x32xf32>
    %cst_28 = arith.constant 9.99999997E-7 : f32
    %39 = vector.broadcast %cst_28 : f32 to vector<72x1xf32>
    %40 = arith.addf %36, %39 : vector<72x1xf32>
    %41 = math.rsqrt %40 : vector<72x1xf32>
    %42 = vector.broadcast %41 : vector<72x1xf32> to vector<72x32xf32>
    %43 = arith.mulf %38, %42 : vector<72x32xf32>
    %44 = vector.broadcast %23 : vector<1x32xf32> to vector<72x32xf32>
    %45 = arith.mulf %43, %44 : vector<72x32xf32>
    %46 = vector.broadcast %25 : vector<1x32xf32> to vector<72x32xf32>
    %47 = arith.addf %45, %46 : vector<72x32xf32>
    %48 = arith.truncf %47 : vector<72x32xf32> to vector<72x32xbf16>
    %c0_29 = arith.constant 0 : index
    %c0_30 = arith.constant 0 : index
    %c0_31 = arith.constant 0 : index
    %49 = vector.load %arg8[%c0_29, %c0_30, %c0_31] : memref<2x32x96xbf16, #tpu.memory_space<vmem>>, vector<1x32x96xbf16>
    %50 = vector.shape_cast %49 : vector<1x32x96xbf16> to vector<32x96xbf16>
    %cst_32 = arith.constant dense<0.000000e+00> : vector<72x96xf32>
    %51 = tpu.matmul %48, %50, %cst_32 {dimension_numbers = #tpu.dot_dimension_numbers<[1], [0], [0], [1], [0, 0, 1, 1], [], []>} : vector<72x32xbf16>, vector<32x96xbf16>, vector<72x96xf32> -> vector<72x96xf32>
    %c0_33 = arith.constant 0 : index
    %c0_34 = arith.constant 0 : index
    %c0_35 = arith.constant 0 : index
    %52 = vector.load %arg9[%c0_33, %c0_34, %c0_35] : memref<2x1x96xf32, #tpu.memory_space<vmem>>, vector<1x1x96xf32>
    %53 = vector.shape_cast %52 : vector<1x1x96xf32> to vector<1x96xf32>
    %54 = vector.broadcast %53 : vector<1x96xf32> to vector<72x96xf32>
    %55 = arith.addf %51, %54 : vector<72x96xf32>
    %56 = vector.extract_strided_slice %55 {offsets = [0, 0], sizes = [72, 16], strides = [1, 1]} : vector<72x96xf32> to vector<72x16xf32>
    %57 = arith.truncf %56 : vector<72x16xf32> to vector<72x16xbf16>
    %58 = vector.extract_strided_slice %55 {offsets = [0, 32], sizes = [72, 16], strides = [1, 1]} : vector<72x96xf32> to vector<72x16xf32>
    %59 = arith.truncf %58 : vector<72x16xf32> to vector<72x16xbf16>
    %60 = vector.extract_strided_slice %55 {offsets = [0, 64], sizes = [72, 16], strides = [1, 1]} : vector<72x96xf32> to vector<72x16xf32>
    %61 = arith.truncf %60 : vector<72x16xf32> to vector<72x16xbf16>
    %cst_36 = arith.constant dense<0.000000e+00> : vector<72x72xf32>
    %62 = tpu.matmul %57, %59, %cst_36 {dimension_numbers = #tpu.dot_dimension_numbers<[1], [1], [0], [0], [0, 0, 1, 0], [], []>} : vector<72x16xbf16>, vector<72x16xbf16>, vector<72x72xf32> -> vector<72x72xf32>
    %cst_37 = arith.constant 2.500000e-01 : f32
    %63 = vector.broadcast %cst_37 : f32 to vector<72x72xf32>
    %64 = arith.mulf %62, %63 : vector<72x72xf32>
    %cst_38 = arith.constant -1.000000e+30 : f32
    %65 = vector.shape_cast %21 : vector<1x72xi1> to vector<1x72xi1>
    %66 = vector.broadcast %65 : vector<1x72xi1> to vector<72x72xi1>
    %67 = vector.broadcast %cst_38 : f32 to vector<72x72xf32>
    %68 = arith.select %66, %64, %67 : vector<72x72xi1>, vector<72x72xf32>
    %cst_39 = arith.constant dense<0xFF800000> : vector<72xf32>
    %69 = vector.multi_reduction <maximumf>, %68, %cst_39 [1] : vector<72x72xf32> to vector<72xf32>
    %70 = vector.shape_cast %69 : vector<72xf32> to vector<72x1xf32>
    %71 = vector.broadcast %70 : vector<72x1xf32> to vector<72x72xf32>
    %72 = arith.subf %68, %71 : vector<72x72xf32>
    %73 = math.exp %72 : vector<72x72xf32>
    %cst_40 = arith.constant dense<0.000000e+00> : vector<72xf32>
    %74 = vector.multi_reduction <add>, %73, %cst_40 [1] : vector<72x72xf32> to vector<72xf32>
    %75 = vector.shape_cast %74 : vector<72xf32> to vector<72x1xf32>
    %76 = vector.broadcast %75 : vector<72x1xf32> to vector<72x72xf32>
    %77 = arith.divf %73, %76 : vector<72x72xf32>
    %78 = arith.truncf %77 : vector<72x72xf32> to vector<72x72xbf16>
    %cst_41 = arith.constant dense<0.000000e+00> : vector<72x16xf32>
    %79 = tpu.matmul %78, %61, %cst_41 {dimension_numbers = #tpu.dot_dimension_numbers<[1], [0], [0], [1], [0, 0, 1, 1], [], []>} : vector<72x72xbf16>, vector<72x16xbf16>, vector<72x16xf32> -> vector<72x16xf32>
    %80 = arith.truncf %79 : vector<72x16xf32> to vector<72x16xbf16>
    %c0_42 = arith.constant 0 : index
    %c0_43 = arith.constant 0 : index
    %81 = vector.load %arg26[%c0_42, %c0_43] : memref<72x32xbf16, #tpu.memory_space<vmem>>, vector<72x16xbf16>
    tpu.vector_store %arg26[%c0_42, %c0_43], %80 {strides = array<i32>} : memref<72x32xbf16, #tpu.memory_space<vmem>>, vector<72x16xbf16>,
    %82 = vector.extract_strided_slice %55 {offsets = [0, 16], sizes = [72, 16], strides = [1, 1]} : vector<72x96xf32> to vector<72x16xf32>
    %83 = arith.truncf %82 : vector<72x16xf32> to vector<72x16xbf16>
    %84 = vector.extract_strided_slice %55 {offsets = [0, 48], sizes = [72, 16], strides = [1, 1]} : vector<72x96xf32> to vector<72x16xf32>
    %85 = arith.truncf %84 : vector<72x16xf32> to vector<72x16xbf16>
    %86 = vector.extract_strided_slice %55 {offsets = [0, 80], sizes = [72, 16], strides = [1, 1]} : vector<72x96xf32> to vector<72x16xf32>
    %87 = arith.truncf %86 : vector<72x16xf32> to vector<72x16xbf16>
    %cst_44 = arith.constant dense<0.000000e+00> : vector<72x72xf32>
    %88 = tpu.matmul %83, %85, %cst_44 {dimension_numbers = #tpu.dot_dimension_numbers<[1], [1], [0], [0], [0, 0, 1, 0], [], []>} : vector<72x16xbf16>, vector<72x16xbf16>, vector<72x72xf32> -> vector<72x72xf32>
    %cst_45 = arith.constant 2.500000e-01 : f32
    %89 = vector.broadcast %cst_45 : f32 to vector<72x72xf32>
    %90 = arith.mulf %88, %89 : vector<72x72xf32>
    %cst_46 = arith.constant -1.000000e+30 : f32
    %91 = vector.shape_cast %21 : vector<1x72xi1> to vector<1x72xi1>
    %92 = vector.broadcast %91 : vector<1x72xi1> to vector<72x72xi1>
    %93 = vector.broadcast %cst_46 : f32 to vector<72x72xf32>
    %94 = arith.select %92, %90, %93 : vector<72x72xi1>, vector<72x72xf32>
    %cst_47 = arith.constant dense<0xFF800000> : vector<72xf32>
    %95 = vector.multi_reduction <maximumf>, %94, %cst_47 [1] : vector<72x72xf32> to vector<72xf32>
    %96 = vector.shape_cast %95 : vector<72xf32> to vector<72x1xf32>
    %97 = vector.broadcast %96 : vector<72x1xf32> to vector<72x72xf32>
    %98 = arith.subf %94, %97 : vector<72x72xf32>
    %99 = math.exp %98 : vector<72x72xf32>
    %cst_48 = arith.constant dense<0.000000e+00> : vector<72xf32>
    %100 = vector.multi_reduction <add>, %99, %cst_48 [1] : vector<72x72xf32> to vector<72xf32>
    %101 = vector.shape_cast %100 : vector<72xf32> to vector<72x1xf32>
    %102 = vector.broadcast %101 : vector<72x1xf32> to vector<72x72xf32>
    %103 = arith.divf %99, %102 : vector<72x72xf32>
    %104 = arith.truncf %103 : vector<72x72xf32> to vector<72x72xbf16>
    %cst_49 = arith.constant dense<0.000000e+00> : vector<72x16xf32>
    %105 = tpu.matmul %104, %87, %cst_49 {dimension_numbers = #tpu.dot_dimension_numbers<[1], [0], [0], [1], [0, 0, 1, 1], [], []>} : vector<72x72xbf16>, vector<72x16xbf16>, vector<72x16xf32> -> vector<72x16xf32>
    %106 = arith.truncf %105 : vector<72x16xf32> to vector<72x16xbf16>
    %c0_50 = arith.constant 0 : index
    %c16 = arith.constant 16 : index
    %107 = vector.load %arg26[%c0_50, %c16] : memref<72x32xbf16, #tpu.memory_space<vmem>>, vector<72x16xbf16>
    tpu.vector_store %arg26[%c0_50, %c16], %106 {strides = array<i32>} : memref<72x32xbf16, #tpu.memory_space<vmem>>, vector<72x16xbf16>,
    %c0_51 = arith.constant 0 : index
    %c0_52 = arith.constant 0 : index
    %108 = vector.load %arg26[%c0_51, %c0_52] : memref<72x32xbf16, #tpu.memory_space<vmem>>, vector<72x32xbf16>
    %c0_53 = arith.constant 0 : index
    %c0_54 = arith.constant 0 : index
    %c0_55 = arith.constant 0 : index
    %109 = vector.load %arg10[%c0_53, %c0_54, %c0_55] : memref<2x32x32xbf16, #tpu.memory_space<vmem>>, vector<1x32x32xbf16>
    %110 = vector.shape_cast %109 : vector<1x32x32xbf16> to vector<32x32xbf16>
    %cst_56 = arith.constant dense<0.000000e+00> : vector<72x32xf32>
    %111 = tpu.matmul %108, %110, %cst_56 {dimension_numbers = #tpu.dot_dimension_numbers<[1], [0], [0], [1], [0, 0, 1, 1], [], []>} : vector<72x32xbf16>, vector<32x32xbf16>, vector<72x32xf32> -> vector<72x32xf32>
    %c0_57 = arith.constant 0 : index
    %c0_58 = arith.constant 0 : index
    %c0_59 = arith.constant 0 : index
    %112 = vector.load %arg11[%c0_57, %c0_58, %c0_59] : memref<2x1x32xf32, #tpu.memory_space<vmem>>, vector<1x1x32xf32>
    %113 = vector.shape_cast %112 : vector<1x1x32xf32> to vector<1x32xf32>
    %114 = vector.broadcast %113 : vector<1x32xf32> to vector<72x32xf32>
    %115 = arith.addf %111, %114 : vector<72x32xf32>
    %116 = arith.addf %18, %115 : vector<72x32xf32>
    %c0_60 = arith.constant 0 : index
    %c0_61 = arith.constant 0 : index
    %c0_62 = arith.constant 0 : index
    %117 = vector.load %arg12[%c0_60, %c0_61, %c0_62] : memref<2x1x32xf32, #tpu.memory_space<vmem>>, vector<1x1x32xf32>
    %118 = vector.shape_cast %117 : vector<1x1x32xf32> to vector<1x32xf32>
    %c0_63 = arith.constant 0 : index
    %c0_64 = arith.constant 0 : index
    %c0_65 = arith.constant 0 : index
    %119 = vector.load %arg13[%c0_63, %c0_64, %c0_65] : memref<2x1x32xf32, #tpu.memory_space<vmem>>, vector<1x1x32xf32>
    %120 = vector.shape_cast %119 : vector<1x1x32xf32> to vector<1x32xf32>
    %cst_66 = arith.constant dense<0.000000e+00> : vector<72xf32>
    %121 = vector.multi_reduction <add>, %116, %cst_66 [1] : vector<72x32xf32> to vector<72xf32>
    %122 = vector.shape_cast %121 : vector<72xf32> to vector<72x1xf32>
    %cst_67 = arith.constant 3.200000e+01 : f32
    %123 = vector.broadcast %cst_67 : f32 to vector<72x1xf32>
    %124 = arith.divf %122, %123 : vector<72x1xf32>
    %125 = vector.broadcast %124 : vector<72x1xf32> to vector<72x32xf32>
    %126 = arith.subf %116, %125 : vector<72x32xf32>
    %127 = arith.mulf %126, %126 : vector<72x32xf32>
    %cst_68 = arith.constant dense<0.000000e+00> : vector<72xf32>
    %128 = vector.multi_reduction <add>, %127, %cst_68 [1] : vector<72x32xf32> to vector<72xf32>
    %129 = vector.shape_cast %128 : vector<72xf32> to vector<72x1xf32>
    %cst_69 = arith.constant 3.200000e+01 : f32
    %130 = vector.broadcast %cst_69 : f32 to vector<72x1xf32>
    %131 = arith.divf %129, %130 : vector<72x1xf32>
    %132 = vector.broadcast %124 : vector<72x1xf32> to vector<72x32xf32>
    %133 = arith.subf %116, %132 : vector<72x32xf32>
    %cst_70 = arith.constant 9.99999997E-7 : f32
    %134 = vector.broadcast %cst_70 : f32 to vector<72x1xf32>
    %135 = arith.addf %131, %134 : vector<72x1xf32>
    %136 = math.rsqrt %135 : vector<72x1xf32>
    %137 = vector.broadcast %136 : vector<72x1xf32> to vector<72x32xf32>
    %138 = arith.mulf %133, %137 : vector<72x32xf32>
    %139 = vector.broadcast %118 : vector<1x32xf32> to vector<72x32xf32>
    %140 = arith.mulf %138, %139 : vector<72x32xf32>
    %141 = vector.broadcast %120 : vector<1x32xf32> to vector<72x32xf32>
    %142 = arith.addf %140, %141 : vector<72x32xf32>
    %143 = arith.truncf %142 : vector<72x32xf32> to vector<72x32xbf16>
    %c0_71 = arith.constant 0 : index
    %c0_72 = arith.constant 0 : index
    %c0_73 = arith.constant 0 : index
    %144 = vector.load %arg14[%c0_71, %c0_72, %c0_73] : memref<2x32x128xbf16, #tpu.memory_space<vmem>>, vector<1x32x128xbf16>
    %145 = vector.shape_cast %144 : vector<1x32x128xbf16> to vector<32x128xbf16>
    %cst_74 = arith.constant dense<0.000000e+00> : vector<72x128xf32>
    %146 = tpu.matmul %143, %145, %cst_74 {dimension_numbers = #tpu.dot_dimension_numbers<[1], [0], [0], [1], [0, 0, 1, 1], [], []>} : vector<72x32xbf16>, vector<32x128xbf16>, vector<72x128xf32> -> vector<72x128xf32>
    %c0_75 = arith.constant 0 : index
    %c0_76 = arith.constant 0 : index
    %c0_77 = arith.constant 0 : index
    %147 = vector.load %arg15[%c0_75, %c0_76, %c0_77] : memref<2x1x128xf32, #tpu.memory_space<vmem>>, vector<1x1x128xf32>
    %148 = vector.shape_cast %147 : vector<1x1x128xf32> to vector<1x128xf32>
    %149 = vector.broadcast %148 : vector<1x128xf32> to vector<72x128xf32>
    %150 = arith.addf %146, %149 : vector<72x128xf32>
    %151 = arith.mulf %150, %150 : vector<72x128xf32>
    %152 = arith.mulf %150, %151 : vector<72x128xf32>
    %cst_78 = arith.constant 4.471500e-02 : f32
    %153 = vector.broadcast %cst_78 : f32 to vector<72x128xf32>
    %154 = arith.mulf %153, %152 : vector<72x128xf32>
    %155 = arith.addf %150, %154 : vector<72x128xf32>
    %cst_79 = arith.constant 0.797884583 : f32
    %156 = vector.broadcast %cst_79 : f32 to vector<72x128xf32>
    %157 = arith.mulf %156, %155 : vector<72x128xf32>
    %158 = math.tanh %157 : vector<72x128xf32>
    %cst_80 = arith.constant 1.000000e+00 : f32
    %159 = vector.broadcast %cst_80 : f32 to vector<72x128xf32>
    %160 = arith.addf %159, %158 : vector<72x128xf32>
    %cst_81 = arith.constant 5.000000e-01 : f32
    %161 = vector.broadcast %cst_81 : f32 to vector<72x128xf32>
    %162 = arith.mulf %161, %160 : vector<72x128xf32>
    %163 = arith.mulf %150, %162 : vector<72x128xf32>
    %164 = arith.truncf %163 : vector<72x128xf32> to vector<72x128xbf16>
    %c0_82 = arith.constant 0 : index
    %c0_83 = arith.constant 0 : index
    %c0_84 = arith.constant 0 : index
    %165 = vector.load %arg16[%c0_82, %c0_83, %c0_84] : memref<2x128x32xbf16, #tpu.memory_space<vmem>>, vector<1x128x32xbf16>
    %166 = vector.shape_cast %165 : vector<1x128x32xbf16> to vector<128x32xbf16>
    %cst_85 = arith.constant dense<0.000000e+00> : vector<72x32xf32>
    %167 = tpu.matmul %164, %166, %cst_85 {dimension_numbers = #tpu.dot_dimension_numbers<[1], [0], [0], [1], [0, 0, 1, 1], [], []>} : vector<72x128xbf16>, vector<128x32xbf16>, vector<72x32xf32> -> vector<72x32xf32>
    %c0_86 = arith.constant 0 : index
    %c0_87 = arith.constant 0 : index
    %c0_88 = arith.constant 0 : index
    %168 = vector.load %arg17[%c0_86, %c0_87, %c0_88] : memref<2x1x32xf32, #tpu.memory_space<vmem>>, vector<1x1x32xf32>
    %169 = vector.shape_cast %168 : vector<1x1x32xf32> to vector<1x32xf32>
    %170 = vector.broadcast %169 : vector<1x32xf32> to vector<72x32xf32>
    %171 = arith.addf %167, %170 : vector<72x32xf32>
    %172 = arith.addf %116, %171 : vector<72x32xf32>
    %c1 = arith.constant 1 : index
    %c0_89 = arith.constant 0 : index
    %c0_90 = arith.constant 0 : index
    %173 = vector.load %arg6[%c1, %c0_89, %c0_90] : memref<2x1x32xf32, #tpu.memory_space<vmem>>, vector<1x1x32xf32>
    %174 = vector.shape_cast %173 : vector<1x1x32xf32> to vector<1x32xf32>
    %c1_91 = arith.constant 1 : index
    %c0_92 = arith.constant 0 : index
    %c0_93 = arith.constant 0 : index
    %175 = vector.load %arg7[%c1_91, %c0_92, %c0_93] : memref<2x1x32xf32, #tpu.memory_space<vmem>>, vector<1x1x32xf32>
    %176 = vector.shape_cast %175 : vector<1x1x32xf32> to vector<1x32xf32>
    %cst_94 = arith.constant dense<0.000000e+00> : vector<72xf32>
    %177 = vector.multi_reduction <add>, %172, %cst_94 [1] : vector<72x32xf32> to vector<72xf32>
    %178 = vector.shape_cast %177 : vector<72xf32> to vector<72x1xf32>
    %cst_95 = arith.constant 3.200000e+01 : f32
    %179 = vector.broadcast %cst_95 : f32 to vector<72x1xf32>
    %180 = arith.divf %178, %179 : vector<72x1xf32>
    %181 = vector.broadcast %180 : vector<72x1xf32> to vector<72x32xf32>
    %182 = arith.subf %172, %181 : vector<72x32xf32>
    %183 = arith.mulf %182, %182 : vector<72x32xf32>
    %cst_96 = arith.constant dense<0.000000e+00> : vector<72xf32>
    %184 = vector.multi_reduction <add>, %183, %cst_96 [1] : vector<72x32xf32> to vector<72xf32>
    %185 = vector.shape_cast %184 : vector<72xf32> to vector<72x1xf32>
    %cst_97 = arith.constant 3.200000e+01 : f32
    %186 = vector.broadcast %cst_97 : f32 to vector<72x1xf32>
    %187 = arith.divf %185, %186 : vector<72x1xf32>
    %188 = vector.broadcast %180 : vector<72x1xf32> to vector<72x32xf32>
    %189 = arith.subf %172, %188 : vector<72x32xf32>
    %cst_98 = arith.constant 9.99999997E-7 : f32
    %190 = vector.broadcast %cst_98 : f32 to vector<72x1xf32>
    %191 = arith.addf %187, %190 : vector<72x1xf32>
    %192 = math.rsqrt %191 : vector<72x1xf32>
    %193 = vector.broadcast %192 : vector<72x1xf32> to vector<72x32xf32>
    %194 = arith.mulf %189, %193 : vector<72x32xf32>
    %195 = vector.broadcast %174 : vector<1x32xf32> to vector<72x32xf32>
    %196 = arith.mulf %194, %195 : vector<72x32xf32>
    %197 = vector.broadcast %176 : vector<1x32xf32> to vector<72x32xf32>
    %198 = arith.addf %196, %197 : vector<72x32xf32>
    %199 = arith.truncf %198 : vector<72x32xf32> to vector<72x32xbf16>
    %c1_99 = arith.constant 1 : index
    %c0_100 = arith.constant 0 : index
    %c0_101 = arith.constant 0 : index
    %200 = vector.load %arg8[%c1_99, %c0_100, %c0_101] : memref<2x32x96xbf16, #tpu.memory_space<vmem>>, vector<1x32x96xbf16>
    %201 = vector.shape_cast %200 : vector<1x32x96xbf16> to vector<32x96xbf16>
    %cst_102 = arith.constant dense<0.000000e+00> : vector<72x96xf32>
    %202 = tpu.matmul %199, %201, %cst_102 {dimension_numbers = #tpu.dot_dimension_numbers<[1], [0], [0], [1], [0, 0, 1, 1], [], []>} : vector<72x32xbf16>, vector<32x96xbf16>, vector<72x96xf32> -> vector<72x96xf32>
    %c1_103 = arith.constant 1 : index
    %c0_104 = arith.constant 0 : index
    %c0_105 = arith.constant 0 : index
    %203 = vector.load %arg9[%c1_103, %c0_104, %c0_105] : memref<2x1x96xf32, #tpu.memory_space<vmem>>, vector<1x1x96xf32>
    %204 = vector.shape_cast %203 : vector<1x1x96xf32> to vector<1x96xf32>
    %205 = vector.broadcast %204 : vector<1x96xf32> to vector<72x96xf32>
    %206 = arith.addf %202, %205 : vector<72x96xf32>
    %207 = vector.extract_strided_slice %206 {offsets = [0, 0], sizes = [72, 16], strides = [1, 1]} : vector<72x96xf32> to vector<72x16xf32>
    %208 = arith.truncf %207 : vector<72x16xf32> to vector<72x16xbf16>
    %209 = vector.extract_strided_slice %206 {offsets = [0, 32], sizes = [72, 16], strides = [1, 1]} : vector<72x96xf32> to vector<72x16xf32>
    %210 = arith.truncf %209 : vector<72x16xf32> to vector<72x16xbf16>
    %211 = vector.extract_strided_slice %206 {offsets = [0, 64], sizes = [72, 16], strides = [1, 1]} : vector<72x96xf32> to vector<72x16xf32>
    %212 = arith.truncf %211 : vector<72x16xf32> to vector<72x16xbf16>
    %cst_106 = arith.constant dense<0.000000e+00> : vector<72x72xf32>
    %213 = tpu.matmul %208, %210, %cst_106 {dimension_numbers = #tpu.dot_dimension_numbers<[1], [1], [0], [0], [0, 0, 1, 0], [], []>} : vector<72x16xbf16>, vector<72x16xbf16>, vector<72x72xf32> -> vector<72x72xf32>
    %cst_107 = arith.constant 2.500000e-01 : f32
    %214 = vector.broadcast %cst_107 : f32 to vector<72x72xf32>
    %215 = arith.mulf %213, %214 : vector<72x72xf32>
    %cst_108 = arith.constant -1.000000e+30 : f32
    %216 = vector.shape_cast %21 : vector<1x72xi1> to vector<1x72xi1>
    %217 = vector.broadcast %216 : vector<1x72xi1> to vector<72x72xi1>
    %218 = vector.broadcast %cst_108 : f32 to vector<72x72xf32>
    %219 = arith.select %217, %215, %218 : vector<72x72xi1>, vector<72x72xf32>
    %cst_109 = arith.constant dense<0xFF800000> : vector<72xf32>
    %220 = vector.multi_reduction <maximumf>, %219, %cst_109 [1] : vector<72x72xf32> to vector<72xf32>
    %221 = vector.shape_cast %220 : vector<72xf32> to vector<72x1xf32>
    %222 = vector.broadcast %221 : vector<72x1xf32> to vector<72x72xf32>
    %223 = arith.subf %219, %222 : vector<72x72xf32>
    %224 = math.exp %223 : vector<72x72xf32>
    %cst_110 = arith.constant dense<0.000000e+00> : vector<72xf32>
    %225 = vector.multi_reduction <add>, %224, %cst_110 [1] : vector<72x72xf32> to vector<72xf32>
    %226 = vector.shape_cast %225 : vector<72xf32> to vector<72x1xf32>
    %227 = vector.broadcast %226 : vector<72x1xf32> to vector<72x72xf32>
    %228 = arith.divf %224, %227 : vector<72x72xf32>
    %229 = arith.truncf %228 : vector<72x72xf32> to vector<72x72xbf16>
    %cst_111 = arith.constant dense<0.000000e+00> : vector<72x16xf32>
    %230 = tpu.matmul %229, %212, %cst_111 {dimension_numbers = #tpu.dot_dimension_numbers<[1], [0], [0], [1], [0, 0, 1, 1], [], []>} : vector<72x72xbf16>, vector<72x16xbf16>, vector<72x16xf32> -> vector<72x16xf32>
    %231 = arith.truncf %230 : vector<72x16xf32> to vector<72x16xbf16>
    %c0_112 = arith.constant 0 : index
    %c0_113 = arith.constant 0 : index
    %232 = vector.load %arg26[%c0_112, %c0_113] : memref<72x32xbf16, #tpu.memory_space<vmem>>, vector<72x16xbf16>
    tpu.vector_store %arg26[%c0_112, %c0_113], %231 {strides = array<i32>} : memref<72x32xbf16, #tpu.memory_space<vmem>>, vector<72x16xbf16>,
    %233 = vector.extract_strided_slice %206 {offsets = [0, 16], sizes = [72, 16], strides = [1, 1]} : vector<72x96xf32> to vector<72x16xf32>
    %234 = arith.truncf %233 : vector<72x16xf32> to vector<72x16xbf16>
    %235 = vector.extract_strided_slice %206 {offsets = [0, 48], sizes = [72, 16], strides = [1, 1]} : vector<72x96xf32> to vector<72x16xf32>
    %236 = arith.truncf %235 : vector<72x16xf32> to vector<72x16xbf16>
    %237 = vector.extract_strided_slice %206 {offsets = [0, 80], sizes = [72, 16], strides = [1, 1]} : vector<72x96xf32> to vector<72x16xf32>
    %238 = arith.truncf %237 : vector<72x16xf32> to vector<72x16xbf16>
    %cst_114 = arith.constant dense<0.000000e+00> : vector<72x72xf32>
    %239 = tpu.matmul %234, %236, %cst_114 {dimension_numbers = #tpu.dot_dimension_numbers<[1], [1], [0], [0], [0, 0, 1, 0], [], []>} : vector<72x16xbf16>, vector<72x16xbf16>, vector<72x72xf32> -> vector<72x72xf32>
    %cst_115 = arith.constant 2.500000e-01 : f32
    %240 = vector.broadcast %cst_115 : f32 to vector<72x72xf32>
    %241 = arith.mulf %239, %240 : vector<72x72xf32>
    %cst_116 = arith.constant -1.000000e+30 : f32
    %242 = vector.shape_cast %21 : vector<1x72xi1> to vector<1x72xi1>
    %243 = vector.broadcast %242 : vector<1x72xi1> to vector<72x72xi1>
    %244 = vector.broadcast %cst_116 : f32 to vector<72x72xf32>
    %245 = arith.select %243, %241, %244 : vector<72x72xi1>, vector<72x72xf32>
    %cst_117 = arith.constant dense<0xFF800000> : vector<72xf32>
    %246 = vector.multi_reduction <maximumf>, %245, %cst_117 [1] : vector<72x72xf32> to vector<72xf32>
    %247 = vector.shape_cast %246 : vector<72xf32> to vector<72x1xf32>
    %248 = vector.broadcast %247 : vector<72x1xf32> to vector<72x72xf32>
    %249 = arith.subf %245, %248 : vector<72x72xf32>
    %250 = math.exp %249 : vector<72x72xf32>
    %cst_118 = arith.constant dense<0.000000e+00> : vector<72xf32>
    %251 = vector.multi_reduction <add>, %250, %cst_118 [1] : vector<72x72xf32> to vector<72xf32>
    %252 = vector.shape_cast %251 : vector<72xf32> to vector<72x1xf32>
    %253 = vector.broadcast %252 : vector<72x1xf32> to vector<72x72xf32>
    %254 = arith.divf %250, %253 : vector<72x72xf32>
    %255 = arith.truncf %254 : vector<72x72xf32> to vector<72x72xbf16>
    %cst_119 = arith.constant dense<0.000000e+00> : vector<72x16xf32>
    %256 = tpu.matmul %255, %238, %cst_119 {dimension_numbers = #tpu.dot_dimension_numbers<[1], [0], [0], [1], [0, 0, 1, 1], [], []>} : vector<72x72xbf16>, vector<72x16xbf16>, vector<72x16xf32> -> vector<72x16xf32>
    %257 = arith.truncf %256 : vector<72x16xf32> to vector<72x16xbf16>
    %c0_120 = arith.constant 0 : index
    %c16_121 = arith.constant 16 : index
    %258 = vector.load %arg26[%c0_120, %c16_121] : memref<72x32xbf16, #tpu.memory_space<vmem>>, vector<72x16xbf16>
    tpu.vector_store %arg26[%c0_120, %c16_121], %257 {strides = array<i32>} : memref<72x32xbf16, #tpu.memory_space<vmem>>, vector<72x16xbf16>,
    %c0_122 = arith.constant 0 : index
    %c0_123 = arith.constant 0 : index
    %259 = vector.load %arg26[%c0_122, %c0_123] : memref<72x32xbf16, #tpu.memory_space<vmem>>, vector<72x32xbf16>
    %c1_124 = arith.constant 1 : index
    %c0_125 = arith.constant 0 : index
    %c0_126 = arith.constant 0 : index
    %260 = vector.load %arg10[%c1_124, %c0_125, %c0_126] : memref<2x32x32xbf16, #tpu.memory_space<vmem>>, vector<1x32x32xbf16>
    %261 = vector.shape_cast %260 : vector<1x32x32xbf16> to vector<32x32xbf16>
    %cst_127 = arith.constant dense<0.000000e+00> : vector<72x32xf32>
    %262 = tpu.matmul %259, %261, %cst_127 {dimension_numbers = #tpu.dot_dimension_numbers<[1], [0], [0], [1], [0, 0, 1, 1], [], []>} : vector<72x32xbf16>, vector<32x32xbf16>, vector<72x32xf32> -> vector<72x32xf32>
    %c1_128 = arith.constant 1 : index
    %c0_129 = arith.constant 0 : index
    %c0_130 = arith.constant 0 : index
    %263 = vector.load %arg11[%c1_128, %c0_129, %c0_130] : memref<2x1x32xf32, #tpu.memory_space<vmem>>, vector<1x1x32xf32>
    %264 = vector.shape_cast %263 : vector<1x1x32xf32> to vector<1x32xf32>
    %265 = vector.broadcast %264 : vector<1x32xf32> to vector<72x32xf32>
    %266 = arith.addf %262, %265 : vector<72x32xf32>
    %267 = arith.addf %172, %266 : vector<72x32xf32>
    %c1_131 = arith.constant 1 : index
    %c0_132 = arith.constant 0 : index
    %c0_133 = arith.constant 0 : index
    %268 = vector.load %arg12[%c1_131, %c0_132, %c0_133] : memref<2x1x32xf32, #tpu.memory_space<vmem>>, vector<1x1x32xf32>
    %269 = vector.shape_cast %268 : vector<1x1x32xf32> to vector<1x32xf32>
    %c1_134 = arith.constant 1 : index
    %c0_135 = arith.constant 0 : index
    %c0_136 = arith.constant 0 : index
    %270 = vector.load %arg13[%c1_134, %c0_135, %c0_136] : memref<2x1x32xf32, #tpu.memory_space<vmem>>, vector<1x1x32xf32>
    %271 = vector.shape_cast %270 : vector<1x1x32xf32> to vector<1x32xf32>
    %cst_137 = arith.constant dense<0.000000e+00> : vector<72xf32>
    %272 = vector.multi_reduction <add>, %267, %cst_137 [1] : vector<72x32xf32> to vector<72xf32>
    %273 = vector.shape_cast %272 : vector<72xf32> to vector<72x1xf32>
    %cst_138 = arith.constant 3.200000e+01 : f32
    %274 = vector.broadcast %cst_138 : f32 to vector<72x1xf32>
    %275 = arith.divf %273, %274 : vector<72x1xf32>
    %276 = vector.broadcast %275 : vector<72x1xf32> to vector<72x32xf32>
    %277 = arith.subf %267, %276 : vector<72x32xf32>
    %278 = arith.mulf %277, %277 : vector<72x32xf32>
    %cst_139 = arith.constant dense<0.000000e+00> : vector<72xf32>
    %279 = vector.multi_reduction <add>, %278, %cst_139 [1] : vector<72x32xf32> to vector<72xf32>
    %280 = vector.shape_cast %279 : vector<72xf32> to vector<72x1xf32>
    %cst_140 = arith.constant 3.200000e+01 : f32
    %281 = vector.broadcast %cst_140 : f32 to vector<72x1xf32>
    %282 = arith.divf %280, %281 : vector<72x1xf32>
    %283 = vector.broadcast %275 : vector<72x1xf32> to vector<72x32xf32>
    %284 = arith.subf %267, %283 : vector<72x32xf32>
    %cst_141 = arith.constant 9.99999997E-7 : f32
    %285 = vector.broadcast %cst_141 : f32 to vector<72x1xf32>
    %286 = arith.addf %282, %285 : vector<72x1xf32>
    %287 = math.rsqrt %286 : vector<72x1xf32>
    %288 = vector.broadcast %287 : vector<72x1xf32> to vector<72x32xf32>
    %289 = arith.mulf %284, %288 : vector<72x32xf32>
    %290 = vector.broadcast %269 : vector<1x32xf32> to vector<72x32xf32>
    %291 = arith.mulf %289, %290 : vector<72x32xf32>
    %292 = vector.broadcast %271 : vector<1x32xf32> to vector<72x32xf32>
    %293 = arith.addf %291, %292 : vector<72x32xf32>
    %294 = arith.truncf %293 : vector<72x32xf32> to vector<72x32xbf16>
    %c1_142 = arith.constant 1 : index
    %c0_143 = arith.constant 0 : index
    %c0_144 = arith.constant 0 : index
    %295 = vector.load %arg14[%c1_142, %c0_143, %c0_144] : memref<2x32x128xbf16, #tpu.memory_space<vmem>>, vector<1x32x128xbf16>
    %296 = vector.shape_cast %295 : vector<1x32x128xbf16> to vector<32x128xbf16>
    %cst_145 = arith.constant dense<0.000000e+00> : vector<72x128xf32>
    %297 = tpu.matmul %294, %296, %cst_145 {dimension_numbers = #tpu.dot_dimension_numbers<[1], [0], [0], [1], [0, 0, 1, 1], [], []>} : vector<72x32xbf16>, vector<32x128xbf16>, vector<72x128xf32> -> vector<72x128xf32>
    %c1_146 = arith.constant 1 : index
    %c0_147 = arith.constant 0 : index
    %c0_148 = arith.constant 0 : index
    %298 = vector.load %arg15[%c1_146, %c0_147, %c0_148] : memref<2x1x128xf32, #tpu.memory_space<vmem>>, vector<1x1x128xf32>
    %299 = vector.shape_cast %298 : vector<1x1x128xf32> to vector<1x128xf32>
    %300 = vector.broadcast %299 : vector<1x128xf32> to vector<72x128xf32>
    %301 = arith.addf %297, %300 : vector<72x128xf32>
    %302 = arith.mulf %301, %301 : vector<72x128xf32>
    %303 = arith.mulf %301, %302 : vector<72x128xf32>
    %cst_149 = arith.constant 4.471500e-02 : f32
    %304 = vector.broadcast %cst_149 : f32 to vector<72x128xf32>
    %305 = arith.mulf %304, %303 : vector<72x128xf32>
    %306 = arith.addf %301, %305 : vector<72x128xf32>
    %cst_150 = arith.constant 0.797884583 : f32
    %307 = vector.broadcast %cst_150 : f32 to vector<72x128xf32>
    %308 = arith.mulf %307, %306 : vector<72x128xf32>
    %309 = math.tanh %308 : vector<72x128xf32>
    %cst_151 = arith.constant 1.000000e+00 : f32
    %310 = vector.broadcast %cst_151 : f32 to vector<72x128xf32>
    %311 = arith.addf %310, %309 : vector<72x128xf32>
    %cst_152 = arith.constant 5.000000e-01 : f32
    %312 = vector.broadcast %cst_152 : f32 to vector<72x128xf32>
    %313 = arith.mulf %312, %311 : vector<72x128xf32>
    %314 = arith.mulf %301, %313 : vector<72x128xf32>
    %315 = arith.truncf %314 : vector<72x128xf32> to vector<72x128xbf16>
    %c1_153 = arith.constant 1 : index
    %c0_154 = arith.constant 0 : index
    %c0_155 = arith.constant 0 : index
    %316 = vector.load %arg16[%c1_153, %c0_154, %c0_155] : memref<2x128x32xbf16, #tpu.memory_space<vmem>>, vector<1x128x32xbf16>
    %317 = vector.shape_cast %316 : vector<1x128x32xbf16> to vector<128x32xbf16>
    %cst_156 = arith.constant dense<0.000000e+00> : vector<72x32xf32>
    %318 = tpu.matmul %315, %317, %cst_156 {dimension_numbers = #tpu.dot_dimension_numbers<[1], [0], [0], [1], [0, 0, 1, 1], [], []>} : vector<72x128xbf16>, vector<128x32xbf16>, vector<72x32xf32> -> vector<72x32xf32>
    %c1_157 = arith.constant 1 : index
    %c0_158 = arith.constant 0 : index
    %c0_159 = arith.constant 0 : index
    %319 = vector.load %arg17[%c1_157, %c0_158, %c0_159] : memref<2x1x32xf32, #tpu.memory_space<vmem>>, vector<1x1x32xf32>
    %320 = vector.shape_cast %319 : vector<1x1x32xf32> to vector<1x32xf32>
    %321 = vector.broadcast %320 : vector<1x32xf32> to vector<72x32xf32>
    %322 = arith.addf %318, %321 : vector<72x32xf32>
    %323 = arith.addf %267, %322 : vector<72x32xf32>
    %324 = vector.extract_strided_slice %323 {offsets = [64, 0], sizes = [1, 32], strides = [1, 1]} : vector<72x32xf32> to vector<1x32xf32>
    %c0_160 = arith.constant 0 : index
    %c0_161 = arith.constant 0 : index
    %325 = vector.load %arg18[%c0_160, %c0_161] : memref<1x32xf32, #tpu.memory_space<vmem>>, vector<1x32xf32>
    %c0_162 = arith.constant 0 : index
    %c0_163 = arith.constant 0 : index
    %326 = vector.load %arg19[%c0_162, %c0_163] : memref<1x32xf32, #tpu.memory_space<vmem>>, vector<1x32xf32>
    %cst_164 = arith.constant dense<0.000000e+00> : vector<1xf32>
    %327 = vector.multi_reduction <add>, %324, %cst_164 [1] : vector<1x32xf32> to vector<1xf32>
    %328 = vector.shape_cast %327 : vector<1xf32> to vector<1x1xf32>
    %cst_165 = arith.constant 3.200000e+01 : f32
    %329 = vector.broadcast %cst_165 : f32 to vector<1x1xf32>
    %330 = arith.divf %328, %329 : vector<1x1xf32>
    %331 = vector.broadcast %330 : vector<1x1xf32> to vector<1x32xf32>
    %332 = arith.subf %324, %331 : vector<1x32xf32>
    %333 = arith.mulf %332, %332 : vector<1x32xf32>
    %cst_166 = arith.constant dense<0.000000e+00> : vector<1xf32>
    %334 = vector.multi_reduction <add>, %333, %cst_166 [1] : vector<1x32xf32> to vector<1xf32>
    %335 = vector.shape_cast %334 : vector<1xf32> to vector<1x1xf32>
    %cst_167 = arith.constant 3.200000e+01 : f32
    %336 = vector.broadcast %cst_167 : f32 to vector<1x1xf32>
    %337 = arith.divf %335, %336 : vector<1x1xf32>
    %338 = vector.broadcast %330 : vector<1x1xf32> to vector<1x32xf32>
    %339 = arith.subf %324, %338 : vector<1x32xf32>
    %cst_168 = arith.constant 9.99999997E-7 : f32
    %340 = vector.broadcast %cst_168 : f32 to vector<1x1xf32>
    %341 = arith.addf %337, %340 : vector<1x1xf32>
    %342 = math.rsqrt %341 : vector<1x1xf32>
    %343 = vector.broadcast %342 : vector<1x1xf32> to vector<1x32xf32>
    %344 = arith.mulf %339, %343 : vector<1x32xf32>
    %345 = arith.mulf %344, %325 : vector<1x32xf32>
    %346 = arith.addf %345, %326 : vector<1x32xf32>
    %347 = arith.truncf %346 : vector<1x32xf32> to vector<1x32xbf16>
    %c0_169 = arith.constant 0 : index
    %c0_170 = arith.constant 0 : index
    %348 = vector.load %arg20[%c0_169, %c0_170] : memref<32x384xbf16, #tpu.memory_space<vmem>>, vector<32x384xbf16>
    %cst_171 = arith.constant dense<0.000000e+00> : vector<1x384xf32>
    %349 = tpu.matmul %347, %348, %cst_171 {dimension_numbers = #tpu.dot_dimension_numbers<[1], [0], [0], [1], [0, 0, 1, 1], [], []>} : vector<1x32xbf16>, vector<32x384xbf16>, vector<1x384xf32> -> vector<1x384xf32>
    %c0_172 = arith.constant 0 : index
    %c0_173 = arith.constant 0 : index
    %350 = vector.load %arg21[%c0_172, %c0_173] : memref<1x384xf32, #tpu.memory_space<vmem>>, vector<1x384xf32>
    %351 = arith.addf %349, %350 : vector<1x384xf32>
    %cst_174 = arith.constant 0.000000e+00 : f32
    %352 = vector.broadcast %cst_174 : f32 to vector<1x384xf32>
    %353 = arith.maximumf %351, %352 : vector<1x384xf32>
    %354 = arith.truncf %353 : vector<1x384xf32> to vector<1x384xbf16>
    %c0_175 = arith.constant 0 : index
    %c0_176 = arith.constant 0 : index
    %355 = vector.load %arg22[%c0_175, %c0_176] : memref<384x8xbf16, #tpu.memory_space<vmem>>, vector<384x8xbf16>
    %cst_177 = arith.constant dense<0.000000e+00> : vector<1x8xf32>
    %356 = tpu.matmul %354, %355, %cst_177 {dimension_numbers = #tpu.dot_dimension_numbers<[1], [0], [0], [1], [0, 0, 1, 1], [], []>} : vector<1x384xbf16>, vector<384x8xbf16>, vector<1x8xf32> -> vector<1x8xf32>
    %c0_178 = arith.constant 0 : index
    %c0_179 = arith.constant 0 : index
    %357 = vector.load %arg23[%c0_178, %c0_179] : memref<1x8xf32, #tpu.memory_space<vmem>>, vector<1x8xf32>
    %358 = arith.addf %356, %357 : vector<1x8xf32>
    %c0_180 = arith.constant 0 : index
    %c0_181 = arith.constant 0 : index
    %c0_182 = arith.constant 0 : index
    %359 = vector.load %arg24[%c0_180, %c0_181, %c0_182] : memref<1x1x8xf32, #tpu.memory_space<vmem>>, vector<1x1x8xf32>
    %360 = vector.shape_cast %359 : vector<1x1x8xf32> to vector<1x8xf32>
    %361 = vector.shape_cast %358 : vector<1x8xf32> to vector<1x1x8xf32>
    tpu.vector_store %arg24[%c0_180, %c0_181, %c0_182], %361 {strides = array<i32>} : memref<1x1x8xf32, #tpu.memory_space<vmem>>, vector<1x1x8xf32>,
    return
  }
  func.func @transform_0(%arg0: i32) -> (i32, i32, i32) {
    %c0_i32 = arith.constant 0 : i32
    %c0_i32_0 = arith.constant 0 : i32
    %c0_i32_1 = arith.constant 0 : i32
    return %arg0, %c0_i32, %c0_i32_0 : i32, i32, i32
  }
  func.func @transform_1(%arg0: i32) -> (i32, i32) {
    %c0_i32 = arith.constant 0 : i32
    %c0_i32_0 = arith.constant 0 : i32
    %c0_i32_1 = arith.constant 0 : i32
    return %c0_i32, %c0_i32_0 : i32, i32
  }
  func.func @transform_2(%arg0: i32) -> (i32, i32) {
    %c0_i32 = arith.constant 0 : i32
    %c0_i32_0 = arith.constant 0 : i32
    %c0_i32_1 = arith.constant 0 : i32
    return %c0_i32, %c0_i32_0 : i32, i32
  }
  func.func @transform_3(%arg0: i32) -> (i32, i32) {
    %c0_i32 = arith.constant 0 : i32
    %c0_i32_0 = arith.constant 0 : i32
    %c0_i32_1 = arith.constant 0 : i32
    return %c0_i32, %c0_i32_0 : i32, i32
  }
  func.func @transform_4(%arg0: i32) -> (i32, i32) {
    %c0_i32 = arith.constant 0 : i32
    %c0_i32_0 = arith.constant 0 : i32
    %c0_i32_1 = arith.constant 0 : i32
    return %c0_i32, %c0_i32_0 : i32, i32
  }
  func.func @transform_5(%arg0: i32) -> (i32, i32, i32) {
    %c0_i32 = arith.constant 0 : i32
    %c0_i32_0 = arith.constant 0 : i32
    %c0_i32_1 = arith.constant 0 : i32
    %c0_i32_2 = arith.constant 0 : i32
    return %c0_i32, %c0_i32_0, %c0_i32_1 : i32, i32, i32
  }
  func.func @transform_6(%arg0: i32) -> (i32, i32, i32) {
    %c0_i32 = arith.constant 0 : i32
    %c0_i32_0 = arith.constant 0 : i32
    %c0_i32_1 = arith.constant 0 : i32
    %c0_i32_2 = arith.constant 0 : i32
    return %c0_i32, %c0_i32_0, %c0_i32_1 : i32, i32, i32
  }
  func.func @transform_7(%arg0: i32) -> (i32, i32, i32) {
    %c0_i32 = arith.constant 0 : i32
    %c0_i32_0 = arith.constant 0 : i32
    %c0_i32_1 = arith.constant 0 : i32
    %c0_i32_2 = arith.constant 0 : i32
    return %c0_i32, %c0_i32_0, %c0_i32_1 : i32, i32, i32
  }
  func.func @transform_8(%arg0: i32) -> (i32, i32, i32) {
    %c0_i32 = arith.constant 0 : i32
    %c0_i32_0 = arith.constant 0 : i32
    %c0_i32_1 = arith.constant 0 : i32
    %c0_i32_2 = arith.constant 0 : i32
    return %c0_i32, %c0_i32_0, %c0_i32_1 : i32, i32, i32
  }
  func.func @transform_9(%arg0: i32) -> (i32, i32, i32) {
    %c0_i32 = arith.constant 0 : i32
    %c0_i32_0 = arith.constant 0 : i32
    %c0_i32_1 = arith.constant 0 : i32
    %c0_i32_2 = arith.constant 0 : i32
    return %c0_i32, %c0_i32_0, %c0_i32_1 : i32, i32, i32
  }
  func.func @transform_10(%arg0: i32) -> (i32, i32, i32) {
    %c0_i32 = arith.constant 0 : i32
    %c0_i32_0 = arith.constant 0 : i32
    %c0_i32_1 = arith.constant 0 : i32
    %c0_i32_2 = arith.constant 0 : i32
    return %c0_i32, %c0_i32_0, %c0_i32_1 : i32, i32, i32
  }
  func.func @transform_11(%arg0: i32) -> (i32, i32, i32) {
    %c0_i32 = arith.constant 0 : i32
    %c0_i32_0 = arith.constant 0 : i32
    %c0_i32_1 = arith.constant 0 : i32
    %c0_i32_2 = arith.constant 0 : i32
    return %c0_i32, %c0_i32_0, %c0_i32_1 : i32, i32, i32
  }
  func.func @transform_12(%arg0: i32) -> (i32, i32, i32) {
    %c0_i32 = arith.constant 0 : i32
    %c0_i32_0 = arith.constant 0 : i32
    %c0_i32_1 = arith.constant 0 : i32
    %c0_i32_2 = arith.constant 0 : i32
    return %c0_i32, %c0_i32_0, %c0_i32_1 : i32, i32, i32
  }
  func.func @transform_13(%arg0: i32) -> (i32, i32, i32) {
    %c0_i32 = arith.constant 0 : i32
    %c0_i32_0 = arith.constant 0 : i32
    %c0_i32_1 = arith.constant 0 : i32
    %c0_i32_2 = arith.constant 0 : i32
    return %c0_i32, %c0_i32_0, %c0_i32_1 : i32, i32, i32
  }
  func.func @transform_14(%arg0: i32) -> (i32, i32, i32) {
    %c0_i32 = arith.constant 0 : i32
    %c0_i32_0 = arith.constant 0 : i32
    %c0_i32_1 = arith.constant 0 : i32
    %c0_i32_2 = arith.constant 0 : i32
    return %c0_i32, %c0_i32_0, %c0_i32_1 : i32, i32, i32
  }
  func.func @transform_15(%arg0: i32) -> (i32, i32, i32) {
    %c0_i32 = arith.constant 0 : i32
    %c0_i32_0 = arith.constant 0 : i32
    %c0_i32_1 = arith.constant 0 : i32
    %c0_i32_2 = arith.constant 0 : i32
    return %c0_i32, %c0_i32_0, %c0_i32_1 : i32, i32, i32
  }
  func.func @transform_16(%arg0: i32) -> (i32, i32, i32) {
    %c0_i32 = arith.constant 0 : i32
    %c0_i32_0 = arith.constant 0 : i32
    %c0_i32_1 = arith.constant 0 : i32
    %c0_i32_2 = arith.constant 0 : i32
    return %c0_i32, %c0_i32_0, %c0_i32_1 : i32, i32, i32
  }
  func.func @transform_17(%arg0: i32) -> (i32, i32) {
    %c0_i32 = arith.constant 0 : i32
    %c0_i32_0 = arith.constant 0 : i32
    %c0_i32_1 = arith.constant 0 : i32
    return %c0_i32, %c0_i32_0 : i32, i32
  }
  func.func @transform_18(%arg0: i32) -> (i32, i32) {
    %c0_i32 = arith.constant 0 : i32
    %c0_i32_0 = arith.constant 0 : i32
    %c0_i32_1 = arith.constant 0 : i32
    return %c0_i32, %c0_i32_0 : i32, i32
  }
  func.func @transform_19(%arg0: i32) -> (i32, i32) {
    %c0_i32 = arith.constant 0 : i32
    %c0_i32_0 = arith.constant 0 : i32
    %c0_i32_1 = arith.constant 0 : i32
    return %c0_i32, %c0_i32_0 : i32, i32
  }
  func.func @transform_20(%arg0: i32) -> (i32, i32) {
    %c0_i32 = arith.constant 0 : i32
    %c0_i32_0 = arith.constant 0 : i32
    %c0_i32_1 = arith.constant 0 : i32
    return %c0_i32, %c0_i32_0 : i32, i32
  }
  func.func @transform_21(%arg0: i32) -> (i32, i32) {
    %c0_i32 = arith.constant 0 : i32
    %c0_i32_0 = arith.constant 0 : i32
    %c0_i32_1 = arith.constant 0 : i32
    return %c0_i32, %c0_i32_0 : i32, i32
  }
  func.func @transform_22(%arg0: i32) -> (i32, i32) {
    %c0_i32 = arith.constant 0 : i32
    %c0_i32_0 = arith.constant 0 : i32
    %c0_i32_1 = arith.constant 0 : i32
    return %c0_i32, %c0_i32_0 : i32, i32
  }
  func.func @transform_23(%arg0: i32) -> (i32, i32, i32) {
    %c0_i32 = arith.constant 0 : i32
    %c0_i32_0 = arith.constant 0 : i32
    %c0_i32_1 = arith.constant 0 : i32
    return %arg0, %c0_i32, %c0_i32_0 : i32, i32, i32
  }
}

</mosaic_0001>

<bundles_post_ra>
// kernel: mvit_forward.1
= control target key start
LH: loop header
LB: loop body
LE: loop exit
PB: predicated region body
PF: predicated region fallthrough
CT: control target
= control target key end

     0   :  { %s8060_s0 = inlined_call_operand.vmem [shape: f32[2,64,96], index: 0, kind: input, shape index: {}]   ;;  %s8061_s1 = inlined_call_operand.vmem [shape: bf16[96,32], index: 1, kind: input, shape index: {}]   ;;  %s8062_s2 = inlined_call_operand.vmem [shape: f32[1,32], index: 2, kind: input, shape index: {}]   ;;  %s8063_s3 = inlined_call_operand.vmem [shape: f32[1,32], index: 3, kind: input, shape index: {}]   ;;  %s8064_s4 = inlined_call_operand.vmem [shape: f32[72,32], index: 4, kind: input, shape index: {}]   ;;  %s8065_s5 = inlined_call_operand.vmem [shape: f32[2,1,32], index: 5, kind: input, shape index: {}]   ;;  %s8066_s6 = inlined_call_operand.vmem [shape: f32[2,1,32], index: 6, kind: input, shape index: {}]   ;;  %s8067_s7 = inlined_call_operand.vmem [shape: bf16[2,32,96], index: 7, kind: input, shape index: {}]   ;;  %s8068_s8 = inlined_call_operand.vmem [shape: f32[2,1,96], index: 8, kind: input, shape index: {}]   ;;  %s8069_s9 = inlined_call_operand.vmem [shape: bf16[2,32,32], index: 9, kind: input, shape index: {}]   ;;  %s8070_s10 = inlined_call_operand.vmem [shape: f32[2,1,32], index: 10, kind: input, shape index: {}]   ;;  %s8071_s11 = inlined_call_operand.vmem [shape: f32[2,1,32], index: 11, kind: input, shape index: {}]   ;;  %s8072_s12 = inlined_call_operand.vmem [shape: f32[2,1,32], index: 12, kind: input, shape index: {}]   ;;  %s8073_s13 = inlined_call_operand.vmem [shape: bf16[2,32,128], index: 13, kind: input, shape index: {}]   ;;  %s8074_s14 = inlined_call_operand.vmem [shape: f32[2,1,128], index: 14, kind: input, shape index: {}]   ;;  %s8075_s15 = inlined_call_operand.vmem [shape: bf16[2,128,32], index: 15, kind: input, shape index: {}]   ;;  %s8076_s16 = inlined_call_operand.vmem [shape: f32[2,1,32], index: 16, kind: input, shape index: {}]   ;;  %s8077_s17 = inlined_call_operand.vmem [shape: f32[1,32], index: 17, kind: input, shape index: {}]   ;;  %s8078_s18 = inlined_call_operand.vmem [shape: f32[1,32], index: 18, kind: input, shape index: {}]   ;;  %s8079_s19 = inlined_call_operand.vmem [shape: bf16[32,384], index: 19, kind: input, shape index: {}]   ;;  %s8080_s20 = inlined_call_operand.vmem [shape: f32[1,384], index: 20, kind: input, shape index: {}]   ;;  %s8081_s21 = inlined_call_operand.vmem [shape: bf16[384,8], index: 21, kind: input, shape index: {}]   ;;  %s8082_s22 = inlined_call_operand.vmem [shape: f32[1,8], index: 22, kind: input, shape index: {}]   ;;  %s8083_s23 = inlined_call_operand.hbm [shape: f32[2,1,8], index: 23, kind: output, shape index: {}]  }
   0x1   :  { %8110 = sst [smem:[#allocation13_spill]] %s8060_s0 }
   0x2   :  { %8111 = sst [smem:[#allocation14_spill]] %s8061_s1 }
   0x3   :  { %8112 = sst [smem:[#allocation15_spill]] %s8062_s2 }
   0x4   :  { %8113 = sst [smem:[#allocation16_spill]] %s8063_s3 }
   0x5   :  { %8114 = sst [smem:[#allocation17_spill]] %s8064_s4 }
   0x6   :  { %8115 = sst [smem:[#allocation18_spill]] %s8065_s5 }
   0x7   :  { %8116 = sst [smem:[#allocation19_spill]] %s8066_s6 }
   0x8   :  { %8117 = sst [smem:[#allocation20_spill]] %s8067_s7 }
   0x9   :  { %8118 = sst [smem:[#allocation21_spill]] %s8068_s8 }
   0xa   :  { %28 = vsyncpa [#allocation5], 0 }
   0xb   :  { %30 = vsyncpa [#allocation5 + $0x1], 0  ;;  %s6415_s4 = smov 0   ;;  %s6417_s30 = smov 0  }
   0xc   :  { %s6419_s24 = smov 0   ;;  %s6421_s25 = smov 0  }
   0xd LB: > { %8119 = sst [smem:[#allocation7_spill]] %s6271_s4  ;;  %s6436_s5 = sadd.s32 4294967295, %s6283_s25   ;;  %s6283_s25 = sphi %s6421_s25, %s8145_s25   ;;  %s6279_s24 = sphi %s6419_s24, %s8147_s24   ;;  %s6275_s30 = sphi %s6417_s30, %s8149_s30   ;;  %s6271_s4 = sphi %s6415_s4, %s8148_s4  }
   0xe   : > { %8120 = sst [smem:[#allocation8_spill]] %s6279_s24  ;;  %s4855_s1 = sadd.s32 4294967294, %s6283_s25  }
   0xf   : > { %8121 = sst [smem:[#allocation9_spill]] %s6283_s25  ;;  %s6440_s26 = sadd.s32 1, %s6283_s25  }
  0x10   : > { %8122 = sst [smem:[#allocation10_spill]] %s6440_s26  ;;  %s531_s2 = sadd.s32 1, %s6279_s24 }
  0x11   : > { %s528_s6 = ssub.s32 %s6283_s25, %s6440_s26  ;;  %p541_p0 = scmp.ne.s32.totalorder %s6279_s24, %s6275_s30 }
  0x12   : > { %p529_p1 = scmp.eq.s32.totalorder %s528_s6, 0  ;;  %p542_p2 = scmp.eq.s32.totalorder %s6436_s5, 1 }
  0x13   : > { %p547_p3 = scmp.ne.s32.totalorder %s6275_s30, %s6271_s4  ;;  %p548_p4 = scmp.eq.s32.totalorder %s4855_s1, 1 }
  0x14   : > { %s6451_s27 = scalar_select %p529_p1, %s6279_s24, %s531_s2  }
  0x15   : > { %p6453_p5 = por %p542_p2, %p541_p0  ;;  %p6457_p6 = por %p548_p4, %p547_p3 }
  0x16   : > { %8123 = sst [smem:[#allocation11_spill]] %s6451_s27  ;;  %p4858_p7 = scmp.ge.s32.totalorder %s6283_s25, 1 }
  0x17   : > { %s8125_s28 = scalar_select %p6457_p6, 1, 0 }
  0x18   : > { %p640_p8 = scmp.lt.s32.totalorder %s6283_s25, 3 }
  0x19   : > { %8126 = sst [smem:[#allocation12_spill]] %s8125_s28 }
  0x1a   : > { %p641_p9 = pnand %p4858_p7, %p640_p8 }
  0x1b   : > { %s8127_s0 = sld [smem:[#allocation14_spill]] (!%p641_p9)  ;;  %p703_p10 = scmp.lt.s32.totalorder (!%p641_p9), %s6436_s5, 1 }
  0x1c   : > { %644 = sbr.rel (%p641_p9) target bundleno = 6731 (0x1a4b), region = 112  ;;  %s8128_s29 = sld [smem:[#allocation13_spill]] (!%p641_p9) }
  0x1d   : > { %s8129_s28 = sld [smem:[#allocation17_spill]] (!%p641_p9)  ;;  %s8105_s4 = smov (!%p641_p9), 96  }
  0x1e   : > { %s8130_s1 = sld [smem:[#allocation16_spill]] (!%p641_p9)  ;;  %s8103_s25 = smov (!%p641_p9), 80  }
  0x1f   : > { %s8131_s24 = sld [smem:[#allocation15_spill]] (!%p641_p9) }
  0x20   : > { %s8132_s2 = sld [smem:[#allocation20_spill]] (!%p641_p9) }
  0x21   : > { %v5884_v0 = vld [vmem:[%s8127_s0 + $0x28] sm:$0xff]   ;;  %v5885_v1 = vld [vmem:[%s8127_s0 + $0x20] sm:$0xff]   ;;  %s704_s6 = scalar_select %p703_p10, %s6436_s5, 1  ;;  %v5886_v2 = vld [vmem:[%s8127_s0 + $0x18] sm:$0xff]   ;;  %vm776_vm0 = vcmask 785408   ;;  %vm871_vm1 = vcmask 261120  }
  0x22   : > { %5332 = vmatprep.subr.bf16.mxu0 %v5884_v0  ;;  %v5887_v6 = vld [vmem:[%s8127_s0 + $0x10] sm:$0xff]   ;;  %v5888_v7 = vld [vmem:[%s8127_s0 + $0x8] sm:$0xff]   ;;  %v5889_v8 = vld [vmem:[%s8127_s0] sm:$0xff]   ;;  %v6285_v21 = vmov 0.0   ;;  %vm883_vm2 = vcmask 253952   ;;  %vm6286_vm3 = vmmov 0  }
  0x23   : > { %5333 = vmatpush3.bf16.msra.mxu0 %v5884_v0  ;;  %s5103_s26 = sshll.u32 %s704_s6, 6  ;;  %v862_v18 = vld [vmem:[%s8129_s28 + $0x40] sm:$0xff]  ;;  %880 = vst.msk [vmem:[#allocation2 + $0x40] sm:$0xff] %vm871_vm1, %v6285_v21  ;;  %5352 = vmatprep.subr.bf16.mxu1 %v6285_v21  ;;  %v856_v24 = vld [vmem:[%s8129_s28 + $0x10] sm:$0xff]  ;;  %v857_v31 = vld [vmem:[%s8129_s28 + $0x18] sm:$0xff]  ;;  %s8133_s27 = sld [smem:[#allocation18_spill]] }
  0x24   : > { %5334 = vmatprep.subr.bf16.mxu0 %v5885_v1  ;;  %s707_s3 = scalar_lea.vmem %s8128_s29, %s5103_s26  ;;  %v881_v19 = vld [vmem:[%s8130_s1] sm:$0x1]  ;;  %v855_v35 = vld [vmem:[%s8129_s28 + $0x8] sm:$0xff]  ;;  %v860_v39 = vld [vmem:[%s8129_s28 + $0x30] sm:$0xff]  ;;  %5356 = vmatprep.mubr.msk.bf16.mxu1 %vm6286_vm3, %v6285_v21  ;;  %s8134_s1 = sld [smem:[#allocation19_spill]]  ;;  %vm1182_vm4 = vcmask 130048  }
  0x25   : > { %v709_v3 = vld [vmem:[%s707_s3] sm:$0xff]  ;;  %v710_v4 = vld [vmem:[%s707_s3 + $0x8] sm:$0xff]  ;;  %v711_v9 = vld [vmem:[%s707_s3 + $0x10] sm:$0xff]  ;;  %v882_v20 = vadd.f32 %v881_v19, %v862_v18  ;;  %s8135_s8 = sld [smem:[#allocation21_spill]]  ;;  %vm1305_vm6 = vcmask 588800   ;;  %s8097_s26 = smov 64  }
  0x26   : > { %v717_v5 = vpack.c.bf16 %v710_v4, %v709_v3  ;;  %v712_v10 = vld [vmem:[%s707_s3 + $0x18] sm:$0xff]  ;;  %v713_v11 = vld [vmem:[%s707_s3 + $0x20] sm:$0xff]  ;;  %v714_v12 = vld [vmem:[%s707_s3 + $0x28] sm:$0xff]  ;;  %vm1439_vm7 = vcmask 1043456   ;;  %s8099_s6 = smov 112   ;;  %s8095_s29 = smov 48  }
  0x27   : > { %5335 = vmatpush3.bf16.msra.mxu0 %v5885_v1  ;;  %v718_v13 = vpack.c.bf16 %v712_v10, %v711_v9  ;;  %v719_v14 = vpack.c.bf16 %v714_v12, %v713_v11  ;;  %v715_v15 = vld [vmem:[%s707_s3 + $0x30] sm:$0xff]  ;;  %v716_v16 = vld [vmem:[%s707_s3 + $0x38] sm:$0xff]  ;;  %884 = vst.msk [vmem:[#allocation2 + $0x40] sm:$0x1] %vm883_vm2, %v882_v20  ;;  %v4861_v22 = vld [vmem:[%s8131_s24] ss:$0 sm:$0xff] }
  0x28   : > { %5336 = vmatprep.subr.bf16.mxu0 %v5886_v2  ;;  %5344 = vmatprep.mubr.msk.bf16.mxu0 %vm776_vm0, %v717_v5  ;;  %v720_v17 = vpack.c.bf16 %v716_v16, %v715_v15  ;;  %v854_v27 = vld [vmem:[%s8129_s28] sm:$0xff]  ;;  %v861_v47 = vld [vmem:[%s8129_s28 + $0x38] sm:$0xff]  ;;  %v859_v53 = vld [vmem:[%s8129_s28 + $0x28] sm:$0xff]  ;;  %vm1552_vm8 = vcmask 125952   ;;  %vm1965_vm9 = vcmask 257152   ;;  %vm4785_vm10 = vcmask 57344  }
  0x29   : > { %v858_v43 = vld [vmem:[%s8129_s28 + $0x20] sm:$0xff] }
  0x2b   : > { %5337 = vmatpush3.bf16.msra.mxu0 %v5886_v2 }
  0x2c   : > { %5338 = vmatprep.subr.bf16.mxu0 %v5887_v6 }
  0x2e   : > { %v893_v4 = vld [vmem:[#allocation2 + $0x40] sm:$0xff] }
  0x2f   : > { %5339 = vmatpush3.bf16.msra.mxu0 %v5887_v6 }
  0x30   : > { %5340 = vmatprep.subr.bf16.mxu0 %v5888_v7 }
  0x33   : > { %5341 = vmatpush3.bf16.msra.mxu0 %v5888_v7  ;;  %v923_v7 = vsel %vm871_vm1, %v893_v4, 0.0 }
  0x34   : > { %5342 = vmatprep.subr.bf16.mxu0 %v5889_v8 }
  0x37   : > { %5343 = vmatpush3.bf16.msra.mxu0 %v5889_v8 }
  0x38   : > { %5406 = vmatprep.subr.bf16.mxu0 %v6285_v21 }
  0x3a   : > { %5345 = vmatmul.mubr.msk.bf16.vlgmr.msra.gmra.mxu0 %vm776_vm0, %v718_v13 }
  0x3b   : > { %5348 = vmatprep.mubr.msk.bf16.mxu0 %vm776_vm0, %v719_v14 }
  0x42   : > { %5349 = vmatmul.mubr.msk.bf16.gmra.mxu0 %vm776_vm0, %v720_v17 }
  0x43   : > { %5416 = vmatprep.mubr.msk.bf16.mxu0 %vm6286_vm3, %v6285_v21 }
  0xfa   : > { %v5346_v23 = vpop.f32.mrf.mxu0 }
  0xfb   : > { %v832_v25 = vadd.f32 %v5346_v23, %v4861_v22 }
  0xfc   : > { %v823_v26 = vpop.f32.mrf.mxu0 }
  0xfd   : > { %v865_v28 = vadd.f32 %v856_v24, %v832_v25  ;;  %v824_v29 = vadd.f32 %v4861_v22, %v823_v26 }
  0xfe   : > { %v5347_v30 = vpop.f32.mrf.mxu0 }
  0xff   : > { %874 = vst.msk [vmem:[#allocation2 + $0x10] sm:$0xff] %vm871_vm1, %v865_v28  ;;  %v863_v32 = vadd.f32 %v854_v27, %v824_v29  ;;  %v835_v33 = vadd.f32 %v5347_v30, %v4861_v22 }
 0x100   : > { %v826_v34 = vpop.f32.mrf.mxu0 }
 0x101   : > { %872 = vst.msk [vmem:[#allocation2] sm:$0xff] %vm871_vm1, %v863_v32  ;;  %v866_v36 = vadd.f32 %v857_v31, %v835_v33  ;;  %v827_v37 = vadd.f32 %v4861_v22, %v826_v34 }
 0x102   : > { %v5350_v38 = vpop.f32.mrf.mxu0 }
 0x103   : > { %875 = vst.msk [vmem:[#allocation2 + $0x18] sm:$0xff] %vm871_vm1, %v866_v36  ;;  %v864_v40 = vadd.f32 %v855_v35, %v827_v37  ;;  %v848_v41 = vadd.f32 %v5350_v38, %v4861_v22 }
 0x104   : > { %v839_v42 = vpop.f32.mrf.mxu0 }
 0x105   : > { %873 = vst.msk [vmem:[#allocation2 + $0x8] sm:$0xff] %vm871_vm1, %v864_v40  ;;  %v869_v44 = vadd.f32 %v860_v39, %v848_v41  ;;  %v840_v45 = vadd.f32 %v4861_v22, %v839_v42 }
 0x106   : > { %v5351_v46 = vpop.f32.mrf.mxu0  ;;  %v887_v48 = vld [vmem:[#allocation2 + $0x10] sm:$0xff] }
 0x107   : > { %878 = vst.msk [vmem:[#allocation2 + $0x30] sm:$0xff] %vm871_vm1, %v869_v44  ;;  %v867_v49 = vadd.f32 %v858_v43, %v840_v45  ;;  %v851_v50 = vadd.f32 %v5351_v46, %v4861_v22  ;;  %v905_v51 = vsel %vm871_vm1, %v887_v48, 0.0 }
 0x108   : > { %906 = vadd.xlane.f32.xlu1 %v905_v51  ;;  %v842_v52 = vpop.f32.mrf.mxu0  ;;  %v885_v54 = vld [vmem:[#allocation2] sm:$0xff] }
 0x109   : > { %876 = vst.msk [vmem:[#allocation2 + $0x20] sm:$0xff] %vm871_vm1, %v867_v49  ;;  %v870_v55 = vadd.f32 %v861_v47, %v851_v50  ;;  %v843_v56 = vadd.f32 %v4861_v22, %v842_v52  ;;  %v899_v57 = vsel %vm871_vm1, %v885_v54, 0.0 }
 0x10a   : > { %900 = vadd.xlane.f32.xlu0 %v899_v57  ;;  %v888_v58 = vld [vmem:[#allocation2 + $0x18] sm:$0xff] }
 0x10b   : > { %879 = vst.msk [vmem:[#allocation2 + $0x38] sm:$0xff] %vm871_vm1, %v870_v55  ;;  %v868_v59 = vadd.f32 %v859_v53, %v843_v56  ;;  %v908_v60 = vsel %vm871_vm1, %v888_v58, 0.0  ;;  %v5890_v55 = vld [vmem:[%s8132_s2 + $0x8] sm:$0xff]   ;;  %v5891_v56 = vld [vmem:[%s8132_s2] sm:$0xff]  }
 0x10c   : > { %909 = vadd.xlane.f32.xlu1 %v908_v60  ;;  %v886_v61 = vld [vmem:[#allocation2 + $0x8] sm:$0xff]  ;;  %5353 = vmatpush3.bf16.msra.mxu1 %v5890_v55 }
 0x10d   : > { %877 = vst.msk [vmem:[#allocation2 + $0x28] sm:$0xff] %vm871_vm1, %v868_v59  ;;  %v902_v62 = vsel %vm871_vm1, %v886_v61, 0.0  ;;  %5354 = vmatprep.subr.bf16.mxu1 %v6285_v21 }
 0x10e   : > { %903 = vadd.xlane.f32.xlu0 %v902_v62  ;;  %v891_v0 = vld [vmem:[#allocation2 + $0x30] sm:$0xff] }
 0x10f   : > { %v917_v2 = vsel %vm871_vm1, %v891_v0, 0.0 }
 0x110   : > { %v889_v63 = vld [vmem:[#allocation2 + $0x20] sm:$0xff]  ;;  %5355 = vmatpush3.bf16.msra.mxu1 %v5891_v56 }
 0x111   : > { %v911_v1 = vsel %vm871_vm1, %v889_v63, 0.0  ;;  %5376 = vmatprep.subr.bf16.mxu1 %v6285_v21 }
 0x112   : > { %912 = vadd.xlane.f32.xlu0 %v911_v1  ;;  %v892_v6 = vld [vmem:[#allocation2 + $0x38] sm:$0xff] }
 0x113   : > { %v920_v8 = vsel %vm871_vm1, %v892_v6, 0.0 }
 0x114   : > { %v890_v3 = vld [vmem:[#allocation2 + $0x28] sm:$0xff] }
 0x115   : > { %v914_v5 = vsel %vm871_vm1, %v890_v3, 0.0 }
 0x116   : > { %915 = vadd.xlane.f32.xlu1 %v914_v5  ;;  %918 = vadd.xlane.f32.xlu0 %v917_v2 }
 0x11a   : > { %921 = vadd.xlane.f32.xlu1 %v920_v8  ;;  %924 = vadd.xlane.f32.xlu0 %v923_v7 }
 0x191   : > { %v907_v9 = vpop.xlane.xlu1 %906 }
 0x192   : > { %v929_v10 = vmul.f32 0.03125, %v907_v9 }
 0x193   : > { %v901_v11 = vpop.xlane.xlu0 %900 }
 0x194   : > { %v927_v12 = vmul.f32 0.03125, %v901_v11  ;;  %v6545_v14 = vsub.f32 %v887_v48, %v929_v10 }
 0x195   : > { %v910_v13 = vpop.xlane.xlu1 %909 }
 0x196   : > { %v6547_v15 = vsub.f32 %v885_v54, %v927_v12  ;;  %v930_v16 = vmul.f32 0.03125, %v910_v13  ;;  %v947_v24 = vmul.f32 %v6545_v14, %v6545_v14 }
 0x197   : > { %v904_v17 = vpop.xlane.xlu0 %903 }
 0x198   : > { %v928_v18 = vmul.f32 0.03125, %v904_v17  ;;  %v945_v19 = vmul.f32 %v6547_v15, %v6547_v15  ;;  %v6551_v20 = vsub.f32 %v888_v58, %v930_v16  ;;  %v960_v29 = vsel %vm871_vm1, %v947_v24, 0.0 }
 0x19a   : > { %v6553_v22 = vsub.f32 %v886_v61, %v928_v18  ;;  %v954_v23 = vsel %vm871_vm1, %v945_v19, 0.0  ;;  %v948_v31 = vmul.f32 %v6551_v20, %v6551_v20  ;;  %v4872_v19 = vld [vmem:[%s8133_s27] ss:$0 sm:$0xff] }
 0x19b   : > { %955 = vadd.xlane.f32.xlu1 %v954_v23  ;;  %v913_v25 = vpop.xlane.xlu0 %912 }
 0x19c   : > { %v931_v26 = vmul.f32 0.03125, %v913_v25  ;;  %v946_v27 = vmul.f32 %v6553_v22, %v6553_v22  ;;  %v963_v39 = vsel %vm871_vm1, %v948_v31, 0.0  ;;  %v4873_v31 = vld [vmem:[%s8134_s1] ss:$0 sm:$0xff] }
 0x19e   : > { %v6560_v28 = vsub.f32 %v889_v63, %v931_v26  ;;  %v957_v30 = vsel %vm871_vm1, %v946_v27, 0.0 }
 0x19f   : > { %v916_v32 = vpop.xlane.xlu1 %915  ;;  %961 = vadd.xlane.f32.xlu1 %v960_v29  ;;  %958 = vadd.xlane.f32.xlu0 %v957_v30  ;;  %v919_v33 = vpop.xlane.xlu0 %918 }
 0x1a0   : > { %v932_v34 = vmul.f32 0.03125, %v916_v32  ;;  %v933_v35 = vmul.f32 0.03125, %v919_v33  ;;  %v949_v36 = vmul.f32 %v6560_v28, %v6560_v28 }
 0x1a2   : > { %v6568_v37 = vsub.f32 %v890_v3, %v932_v34  ;;  %v6570_v38 = vsub.f32 %v891_v0, %v933_v35  ;;  %v966_v40 = vsel %vm871_vm1, %v949_v36, 0.0 }
 0x1a3   : > { %v922_v41 = vpop.xlane.xlu1 %921  ;;  %964 = vadd.xlane.f32.xlu0 %v963_v39  ;;  %967 = vadd.xlane.f32.xlu1 %v966_v40  ;;  %v925_v42 = vpop.xlane.xlu0 %924 }
 0x1a4   : > { %v934_v43 = vmul.f32 0.03125, %v922_v41  ;;  %v935_v44 = vmul.f32 0.03125, %v925_v42  ;;  %v950_v45 = vmul.f32 %v6568_v37, %v6568_v37  ;;  %v951_v46 = vmul.f32 %v6570_v38, %v6570_v38 }
 0x1a6   : > { %v6578_v47 = vsub.f32 %v892_v6, %v934_v43  ;;  %v6580_v48 = vsub.f32 %v893_v4, %v935_v44  ;;  %v969_v49 = vsel %vm871_vm1, %v950_v45, 0.0  ;;  %v972_v50 = vsel %vm871_vm1, %v951_v46, 0.0 }
 0x1a7   : > { %970 = vadd.xlane.f32.xlu0 %v969_v49  ;;  %973 = vadd.xlane.f32.xlu1 %v972_v50 }
 0x1a8   : > { %v952_v51 = vmul.f32 %v6578_v47, %v6578_v47  ;;  %v953_v52 = vmul.f32 %v6580_v48, %v6580_v48 }
 0x1aa   : > { %v975_v53 = vsel %vm871_vm1, %v952_v51, 0.0  ;;  %v978_v54 = vsel %vm871_vm1, %v953_v52, 0.0 }
 0x1ab   : > { %976 = vadd.xlane.f32.xlu0 %v975_v53  ;;  %979 = vadd.xlane.f32.xlu1 %v978_v54 }
 0x224   : > { %v956_v57 = vpop.xlane.xlu1 %955 }
 0x225   : > { %v981_v58 = vmul.f32 0.03125, %v956_v57 }
 0x227   : > { %v990_v59 = vadd.f32 1e-06, %v981_v58 }
 0x228   : > { %v962_v60 = vpop.xlane.xlu1 %961  ;;  %v959_v61 = vpop.xlane.xlu0 %958 }
 0x229   : > { %5960 = vrsqrt.f32 %v990_v59  ;;  %v983_v62 = vmul.f32 0.03125, %v962_v60  ;;  %v982_v63 = vmul.f32 0.03125, %v959_v61 }
 0x22b   : > { %v991_v0 = vadd.f32 1e-06, %v982_v63  ;;  %v992_v1 = vadd.f32 1e-06, %v983_v62 }
 0x22c   : > { %v965_v2 = vpop.xlane.xlu0 %964  ;;  %v968_v3 = vpop.xlane.xlu1 %967 }
 0x22d   : > { %v984_v4 = vmul.f32 0.03125, %v965_v2  ;;  %5962 = vrsqrt.f32 %v991_v0  ;;  %v985_v6 = vmul.f32 0.03125, %v968_v3 }
 0x22e   : > { %5964 = vrsqrt.f32 %v992_v1 }
 0x22f   : > { %v993_v5 = vadd.f32 1e-06, %v984_v4  ;;  %v994_v10 = vadd.f32 1e-06, %v985_v6 }
 0x230   : > { %v971_v7 = vpop.xlane.xlu0 %970  ;;  %v974_v11 = vpop.xlane.xlu1 %973 }
 0x231   : > { %v986_v8 = vmul.f32 0.03125, %v971_v7  ;;  %5966 = vrsqrt.f32 %v993_v5  ;;  %v987_v17 = vmul.f32 0.03125, %v974_v11 }
 0x233   : > { %v995_v9 = vadd.f32 1e-06, %v986_v8  ;;  %v996_v25 = vadd.f32 1e-06, %v987_v17 }
 0x234   : > { %v977_v12 = vpop.xlane.xlu0 %976  ;;  %v980_v26 = vpop.xlane.xlu1 %979 }
 0x235   : > { %5968 = vrsqrt.f32 %v995_v9  ;;  %v988_v16 = vmul.f32 0.03125, %v977_v12  ;;  %v989_v32 = vmul.f32 0.03125, %v980_v26 }
 0x236   : > { %v5961_v13 = vpop.eup %5960  ;;  %5970 = vrsqrt.f32 %v994_v10 }
 0x237   : > { %v1008_v18 = vmul.f32 %v5961_v13, %v6547_v15  ;;  %v997_v23 = vadd.f32 1e-06, %v988_v16  ;;  %v998_v40 = vadd.f32 1e-06, %v989_v32  ;;  %v4874_v16 = vld [vmem:[%s8135_s8] ss:$0 sm:$0xff] }
 0x239   : > { %v1023_v29 = vmul.f32 %v4872_v19, %v1008_v18  ;;  %5972 = vrsqrt.f32 %v997_v23 }
 0x23a   : > { %v5963_v24 = vpop.eup %5962  ;;  %5974 = vrsqrt.f32 %v996_v25 }
 0x23b   : > { %v1009_v27 = vmul.f32 %v5963_v24, %v6553_v22  ;;  %v5965_v30 = vpop.eup %5964  ;;  %v1038_v34 = vadd.f32 %v4873_v31, %v1023_v29  ;;  %5976 = vrsqrt.f32 %v998_v40 }
 0x23c   : > { %v1010_v36 = vmul.f32 %v5965_v30, %v6545_v14 }
 0x23d   : > { %v1024_v33 = vmul.f32 %v4872_v19, %v1009_v27 }
 0x23e   : > { %v5967_v15 = vpop.eup %5966  ;;  %v1025_v43 = vmul.f32 %v4872_v19, %v1010_v36 }
 0x23f   : > { %v1039_v35 = vadd.f32 %v4873_v31, %v1024_v33  ;;  %v1011_v39 = vmul.f32 %v5967_v15, %v6551_v20 }
 0x240   : > { %v1040_v49 = vadd.f32 %v4873_v31, %v1025_v43 }
 0x241   : > { %v1047_v41 = vpack.c.bf16 %v1039_v35, %v1038_v34  ;;  %v1026_v22 = vmul.f32 %v4872_v19, %v1011_v39 }
 0x242   : > { %v5969_v42 = vpop.eup %5968 }
 0x243   : > { %5357 = vmatmul.mubr.msk.bf16.vlgmr.msra.gmra.mxu1 %vm871_vm1, %v1047_v41  ;;  %v5971_v44 = vpop.eup %5970  ;;  %v1041_v45 = vadd.f32 %v4873_v31, %v1026_v22  ;;  %v1013_v46 = vmul.f32 %v5969_v42, %v6568_v37 }
 0x244   : > { %5360 = vmatprep.mubr.msk.bf16.mxu1 %vm6286_vm3, %v6285_v21  ;;  %v1012_v14 = vmul.f32 %v5971_v44, %v6560_v28 }
 0x245   : > { %v1048_v50 = vpack.c.bf16 %v1041_v45, %v1040_v49  ;;  %v1028_v20 = vmul.f32 %v4872_v19, %v1013_v46 }
 0x246   : > { %v5973_v51 = vpop.eup %5972  ;;  %v1027_v53 = vmul.f32 %v4872_v19, %v1012_v14 }
 0x247   : > { %v5975_v52 = vpop.eup %5974  ;;  %v1043_v54 = vadd.f32 %v4873_v31, %v1028_v20  ;;  %v1015_v55 = vmul.f32 %v5973_v51, %v6578_v47  ;;  %v894_v51 = vlaneseq }
 0x248   : > { %v1042_v56 = vadd.f32 %v4873_v31, %v1027_v53  ;;  %v1014_v57 = vmul.f32 %v5975_v52, %v6570_v38  ;;  %v5977_v59 = vpop.eup %5976 }
 0x249   : > { %v1030_v58 = vmul.f32 %v4872_v19, %v1015_v55  ;;  %v1016_v61 = vmul.f32 %v5977_v59, %v6580_v48  ;;  %v6686_v52 = vand.u32 127, %v894_v51 }
 0x24a   : > { %v1049_v37 = vpack.c.bf16 %v1043_v54, %v1042_v56  ;;  %v1029_v28 = vmul.f32 %v4872_v19, %v1014_v57 }
 0x24b   : > { %5361 = vmatmul.mubr.msk.bf16.gmra.mxu1 %vm871_vm1, %v1048_v50  ;;  %v1045_v60 = vadd.f32 %v4873_v31, %v1030_v58  ;;  %v1031_v0 = vmul.f32 %v4872_v19, %v1016_v61  ;;  %vm896_vm5 = vcmp.lt.s32.totalorder %v6686_v52, 65 }
 0x24c   : > { %5364 = vmatprep.mubr.msk.bf16.mxu1 %vm6286_vm3, %v6285_v21  ;;  %v1044_v62 = vadd.f32 %v4873_v31, %v1029_v28 }
 0x24d   : > { %v1046_v38 = vadd.f32 %v4873_v31, %v1031_v0 }
 0x24e   : > { %v1050_v63 = vpack.c.bf16 %v1045_v60, %v1044_v62 }
 0x24f   : > { %v1051_v47 = vpack.c.bf16 %v1046_v38, %v1046_v38 }
 0x253   : > { %5365 = vmatmul.mubr.msk.bf16.gmra.mxu1 %vm871_vm1, %v1049_v37 }
 0x254   : > { %5368 = vmatprep.mubr.msk.bf16.mxu1 %vm6286_vm3, %v6285_v21 }
 0x25b   : > { %5369 = vmatmul.mubr.msk.bf16.gmra.mxu1 %vm871_vm1, %v1050_v63 }
 0x25c   : > { %5372 = vmatprep.mubr.msk.bf16.mxu1 %vm6286_vm3, %v6285_v21 }
 0x263   : > { %5373 = vmatmul.mubr.msk.bf16.gmra.mxu1 %vm871_vm1, %v1051_v47 }
 0x264   : > { %5386 = vmatprep.mubr.msk.bf16.mxu1 %vm6286_vm3, %v6285_v21 }
 0x303   : > { %v1124_v1 = vpop.f32.mrf.mxu1 }
 0x304   : > { %v1125_v35 = vadd.f32 %v4874_v16, %v1124_v1 }
 0x305   : > { %v5358_v2 = vpop.f32.mrf.mxu1 }
 0x307   : > { %v1127_v3 = vpop.f32.mrf.mxu1 }
 0x308   : > { %v1128_v31 = vadd.f32 %v4874_v16, %v1127_v3 }
 0x309   : > { %v5359_v4 = vpop.f32.mrf.mxu1 }
 0x30a   : > { %v6647_v40 = vpack.c.bf16 %v1128_v31, %v1125_v35 }
 0x30b   : > { %v1132_v48 = vpop.f32.mrf.mxu1 }
 0x30c   : > { %v1133_v36 = vadd.f32 %v4874_v16, %v1132_v48 }
 0x30d   : > { %v5362_v5 = vpop.f32.mrf.mxu1 }
 0x30f   : > { %v1135_v6 = vpop.f32.mrf.mxu1 }
 0x310   : > { %v1136_v32 = vadd.f32 %v4874_v16, %v1135_v6 }
 0x311   : > { %v5363_v7 = vpop.f32.mrf.mxu1 }
 0x312   : > { %v6649_v41 = vpack.c.bf16 %v1136_v32, %v1133_v36 }
 0x313   : > { %v1140_v8 = vpop.f32.mrf.mxu1 }
 0x314   : > { %v1141_v27 = vadd.f32 %v4874_v16, %v1140_v8 }
 0x315   : > { %v5366_v9 = vpop.f32.mrf.mxu1 }
 0x317   : > { %v1143_v10 = vpop.f32.mrf.mxu1 }
 0x318   : > { %v1144_v24 = vadd.f32 %v4874_v16, %v1143_v10 }
 0x319   : > { %v5367_v11 = vpop.f32.mrf.mxu1 }
 0x31a   : > { %v6639_v33 = vpack.c.bf16 %v1144_v24, %v1141_v27 }
 0x31b   : > { %v1148_v12 = vpop.f32.mrf.mxu1 }
 0x31c   : > { %v1149_v18 = vadd.f32 %v4874_v16, %v1148_v12 }
 0x31d   : > { %v5370_v13 = vpop.f32.mrf.mxu1 }
 0x31f   : > { %v1151_v17 = vpop.f32.mrf.mxu1 }
 0x320   : > { %v1152_v19 = vadd.f32 %v4874_v16, %v1151_v17 }
 0x321   : > { %v5371_v23 = vpop.f32.mrf.mxu1 }
 0x322   : > { %v6635_v25 = vpack.c.bf16 %v1152_v19, %v1149_v18 }
 0x323   : > { %v1156_v26 = vpop.f32.mrf.mxu1 }
 0x324   : > { %v1157_v29 = vadd.f32 %v4874_v16, %v1156_v26  ;;  %1178 = vrot.lane.b32.xlu1 %v6635_v25, %s8105_s4 }
 0x325   : > { %v5374_v30 = vpop.f32.mrf.mxu1 }
 0x326   : > { %v6641_v15 = vpack.c.bf16 %v1157_v29, %v1157_v29 }
 0x327   : > { %v1159_v34 = vpop.f32.mrf.mxu1 }
 0x328   : > { %1176 = vrot.lane.b32.xlu1 %v6639_v33, %s8105_s4  ;;  %1180 = vrot.lane.b32.xlu0 %v6641_v15, %s8105_s4 }
 0x329   : > { %v5375_v39 = vpop.f32.mrf.mxu1 }
 0x32c   : > { %1174 = vrot.lane.b32.xlu1 %v6649_v41, %s8105_s4  ;;  %1172 = vrot.lane.b32.xlu0 %v6647_v40, %s8105_s4  ;;  %s8140_s4 = smov 48  }
 0x396   : > { %v1179_v43 = vpop.permute.xlu1 %1178 }
 0x397   : > { %v1208_v44 = vsel %vm1182_vm4, %v1179_v43, 0 }
 0x39a   : > { %v1181_v22 = vpop.permute.xlu0 %1180  ;;  %v1177_v45 = vpop.permute.xlu1 %1176 }
 0x39b   : > { %v1211_v42 = vsel %vm1182_vm4, %v1181_v22, 0  ;;  %v1205_v46 = vsel %vm1182_vm4, %v1177_v45, 0 }
 0x39c   : > { %5377 = vmatpush3.bf16.xpose.msra.mxu1 %v1211_v42 }
 0x39d   : > { %5378 = vmatprep.subr.bf16.mxu1 %v6285_v21 }
 0x39e   : > { %v1175_v49 = vpop.permute.xlu1 %1174  ;;  %v1173_v50 = vpop.permute.xlu0 %1172 }
 0x39f   : > { %v1202_v14 = vsel %vm1182_vm4, %v1175_v49, 0  ;;  %v1199_v20 = vsel %vm1182_vm4, %v1173_v50, 0 }
 0x3a4   : > { %5379 = vmatpush3.bf16.xpose.msra.mxu1 %v1208_v44 }
 0x3a5   : > { %5380 = vmatprep.subr.bf16.mxu1 %v6285_v21 }
 0x3ac   : > { %5381 = vmatpush3.bf16.xpose.msra.mxu1 %v1205_v46 }
 0x3ad   : > { %5382 = vmatprep.subr.bf16.mxu1 %v6285_v21 }
 0x3b4   : > { %5383 = vmatpush3.bf16.xpose.msra.mxu1 %v1202_v14 }
 0x3b5   : > { %5384 = vmatprep.subr.bf16.mxu1 %v6285_v21 }
 0x3bc   : > { %5385 = vmatpush3.bf16.xpose.msra.mxu1 %v1199_v20 }
 0x3bd   : > { %5466 = vmatprep.subr.bf16.mxu1 %v6285_v21 }
 0x3c3   : > { %5387 = vmatmul.mubr.msk.bf16.vlgmr.msra.gmra.mxu1 %vm1182_vm4, %v6647_v40 }
 0x3c4   : > { %5390 = vmatprep.mubr.msk.bf16.mxu1 %vm6286_vm3, %v6285_v21 }
 0x3cb   : > { %5391 = vmatmul.mubr.msk.bf16.gmra.mxu1 %vm1182_vm4, %v6649_v41 }
 0x3cc   : > { %5394 = vmatprep.mubr.msk.bf16.mxu1 %vm6286_vm3, %v6285_v21 }
 0x3d3   : > { %5395 = vmatmul.mubr.msk.bf16.gmra.mxu1 %vm1182_vm4, %v6639_v33 }
 0x3d4   : > { %5398 = vmatprep.mubr.msk.bf16.mxu1 %vm6286_vm3, %v6285_v21 }
 0x3db   : > { %5399 = vmatmul.mubr.msk.bf16.gmra.mxu1 %vm1182_vm4, %v6635_v25 }
 0x3dc   : > { %5402 = vmatprep.mubr.msk.bf16.mxu1 %vm6286_vm3, %v6285_v21 }
 0x3e3   : > { %5403 = vmatmul.mubr.msk.bf16.gmra.mxu1 %vm1182_vm4, %v6641_v15 }
 0x3e4   : > { %5476 = vmatprep.mubr.msk.bf16.mxu1 %vm6286_vm3, %v6285_v21 }
 0x483   : > { %v1247_v53 = vpop.f32.mrf.mxu1 }
 0x484   : > { %v1285_v54 = vmul.f32 0.25, %v1247_v53 }
 0x485   : > { %v5388_v55 = vpop.f32.mrf.mxu1 }
 0x486   : > { %v1296_v56 = vsel %vm896_vm5, %v1285_v54, -1e+30 }
 0x487   : > { %v1250_v57 = vpop.f32.mrf.mxu1  ;;  %v1306_v37 = vsel %vm1305_vm6, %v1296_v56, -inf }
 0x488   : > { %v1286_v58 = vmul.f32 0.25, %v1250_v57  ;;  %1307 = vmax.xlane.f32.xlu1 %v1306_v37 }
 0x489   : > { %v5389_v59 = vpop.f32.mrf.mxu1 }
 0x48a   : > { %v1297_v28 = vsel %vm896_vm5, %v1286_v58, -1e+30 }
 0x48b   : > { %v1255_v60 = vpop.f32.mrf.mxu1  ;;  %v1309_v61 = vsel %vm1305_vm6, %v1297_v28, -inf }
 0x48c   : > { %v1287_v62 = vmul.f32 0.25, %v1255_v60  ;;  %1310 = vmax.xlane.f32.xlu0 %v1309_v61 }
 0x48d   : > { %v5392_v63 = vpop.f32.mrf.mxu1 }
 0x48e   : > { %v1298_v0 = vsel %vm896_vm5, %v1287_v62, -1e+30 }
 0x48f   : > { %v1258_v38 = vpop.f32.mrf.mxu1  ;;  %v1312_v47 = vsel %vm1305_vm6, %v1298_v0, -inf }
 0x490   : > { %v1288_v1 = vmul.f32 0.25, %v1258_v38  ;;  %1313 = vmax.xlane.f32.xlu0 %v1312_v47 }
 0x491   : > { %v5393_v2 = vpop.f32.mrf.mxu1 }
 0x492   : > { %v1299_v3 = vsel %vm896_vm5, %v1288_v1, -1e+30 }
 0x493   : > { %v1263_v4 = vpop.f32.mrf.mxu1  ;;  %v1315_v48 = vsel %vm1305_vm6, %v1299_v3, -inf }
 0x494   : > { %v1289_v5 = vmul.f32 0.25, %v1263_v4  ;;  %1316 = vmax.xlane.f32.xlu0 %v1315_v48 }
 0x495   : > { %v5396_v6 = vpop.f32.mrf.mxu1 }
 0x496   : > { %v1300_v7 = vsel %vm896_vm5, %v1289_v5, -1e+30 }
 0x497   : > { %v1266_v8 = vpop.f32.mrf.mxu1  ;;  %v1318_v9 = vsel %vm1305_vm6, %v1300_v7, -inf }
 0x498   : > { %v1290_v10 = vmul.f32 0.25, %v1266_v8  ;;  %1319 = vmax.xlane.f32.xlu1 %v1318_v9 }
 0x499   : > { %v5397_v11 = vpop.f32.mrf.mxu1 }
 0x49a   : > { %v1301_v12 = vsel %vm896_vm5, %v1290_v10, -1e+30 }
 0x49b   : > { %v1271_v13 = vpop.f32.mrf.mxu1  ;;  %v1321_v16 = vsel %vm1305_vm6, %v1301_v12, -inf }
 0x49c   : > { %v1291_v17 = vmul.f32 0.25, %v1271_v13  ;;  %1322 = vmax.xlane.f32.xlu0 %v1321_v16 }
 0x49d   : > { %v5400_v18 = vpop.f32.mrf.mxu1 }
 0x49e   : > { %v1302_v19 = vsel %vm896_vm5, %v1291_v17, -1e+30 }
 0x49f   : > { %v1274_v23 = vpop.f32.mrf.mxu1  ;;  %v1324_v24 = vsel %vm1305_vm6, %v1302_v19, -inf }
 0x4a0   : > { %v1292_v26 = vmul.f32 0.25, %v1274_v23  ;;  %1325 = vmax.xlane.f32.xlu1 %v1324_v24 }
 0x4a1   : > { %v5401_v27 = vpop.f32.mrf.mxu1 }
 0x4a2   : > { %v1303_v29 = vsel %vm896_vm5, %v1292_v26, -1e+30 }
 0x4a3   : > { %v1279_v30 = vpop.f32.mrf.mxu1  ;;  %v1327_v31 = vsel %vm1305_vm6, %v1303_v29, -inf }
 0x4a4   : > { %1328 = vmax.xlane.f32.xlu0 %v1327_v31  ;;  %v1293_v36 = vmul.f32 0.25, %v1279_v30 }
 0x4a5   : > { %v5404_v32 = vpop.f32.mrf.mxu1 }
 0x4a6   : > { %v6723_v39 = vsel %vm896_vm5, %v1293_v36, -1e+30 }
 0x4a7   : > { %v1282_v34 = vpop.f32.mrf.mxu1  ;;  %v1330_v22 = vsel %vm1305_vm6, %v6723_v39, -inf }
 0x4a9   : > { %v5405_v35 = vpop.f32.mrf.mxu1 }
 0x4b1   : > { %1416 = vrot.lane.b32.xlu1 %v6635_v25, %s8097_s26 }
 0x4ba   : > { %1418 = vrot.lane.b32.xlu0 %v6641_v15, %s8097_s26 }
 0x4be   : > { %1414 = vrot.lane.b32.xlu0 %v6639_v33, %s8097_s26 }
 0x4c2   : > { %1410 = vrot.lane.b32.xlu0 %v6647_v40, %s8097_s26 }
 0x4d5   : > { %1331 = vmax.xlane.f32.xlu1 %v1330_v22 }
 0x4e6   : > { %1412 = vrot.lane.b32.xlu1 %v6649_v41, %s8097_s26  ;;  %s8136_s26 = smov 96  }
 0x511   : > { %v1308_v42 = vpop.xlane.xlu1 %1307 }
 0x512   : > { %v1333_v43 = vsub.f32 %v1296_v56, %v1308_v42 }
 0x514   : > { %v1342_v44 = vmul.f32 1.442695, %v1333_v43 }
 0x515   : > { %v1311_v45 = vpop.xlane.xlu0 %1310 }
 0x516   : > { %5978 = vpow2.f32 %v1342_v44  ;;  %v1334_v46 = vsub.f32 %v1297_v28, %v1311_v45 }
 0x518   : > { %v1344_v49 = vmul.f32 1.442695, %v1334_v46 }
 0x519   : > { %v1314_v14 = vpop.xlane.xlu0 %1313 }
 0x51a   : > { %5980 = vpow2.f32 %v1344_v49  ;;  %v1335_v50 = vsub.f32 %v1298_v0, %v1314_v14 }
 0x51c   : > { %v1346_v20 = vmul.f32 1.442695, %v1335_v50 }
 0x51d   : > { %v1317_v53 = vpop.xlane.xlu0 %1316 }
 0x51e   : > { %5982 = vpow2.f32 %v1346_v20  ;;  %v1336_v54 = vsub.f32 %v1299_v3, %v1317_v53 }
 0x520   : > { %v1348_v55 = vmul.f32 1.442695, %v1336_v54 }
 0x521   : > { %v1320_v57 = vpop.xlane.xlu1 %1319 }
 0x522   : > { %5984 = vpow2.f32 %v1348_v55  ;;  %v1337_v37 = vsub.f32 %v1300_v7, %v1320_v57 }
 0x523   : > { %v6729_v58 = vpop.eup %5978 }
 0x524   : > { %v1350_v59 = vmul.f32 1.442695, %v1337_v37  ;;  %v1360_v56 = vsel %vm1305_vm6, %v6729_v58, 0.0 }
 0x525   : > { %v1323_v60 = vpop.xlane.xlu0 %1322  ;;  %1361 = vadd.xlane.f32.xlu0 %v1360_v56 }
 0x526   : > { %5986 = vpow2.f32 %v1350_v59  ;;  %v1338_v28 = vsub.f32 %v1301_v12, %v1323_v60 }
 0x527   : > { %v6733_v61 = vpop.eup %5980 }
 0x528   : > { %v1352_v62 = vmul.f32 1.442695, %v1338_v28  ;;  %v1363_v63 = vsel %vm1305_vm6, %v6733_v61, 0.0 }
 0x529   : > { %v1326_v0 = vpop.xlane.xlu1 %1325  ;;  %1364 = vadd.xlane.f32.xlu1 %v1363_v63 }
 0x52a   : > { %5988 = vpow2.f32 %v1352_v62  ;;  %v1339_v38 = vsub.f32 %v1302_v19, %v1326_v0 }
 0x52b   : > { %v6737_v47 = vpop.eup %5982 }
 0x52c   : > { %v1354_v1 = vmul.f32 1.442695, %v1339_v38  ;;  %v1366_v2 = vsel %vm1305_vm6, %v6737_v47, 0.0 }
 0x52d   : > { %1367 = vadd.xlane.f32.xlu0 %v1366_v2  ;;  %v1329_v3 = vpop.xlane.xlu0 %1328  ;;  %v1417_v11 = vpop.permute.xlu1 %1416 }
 0x52e   : > { %5990 = vpow2.f32 %v1354_v1  ;;  %v1340_v4 = vsub.f32 %v1303_v29, %v1329_v3 }
 0x52f   : > { %v6741_v48 = vpop.eup %5984 }
 0x530   : > { %v1356_v5 = vmul.f32 1.442695, %v1340_v4  ;;  %v1369_v6 = vsel %vm1305_vm6, %v6741_v48, 0.0 }
 0x531   : > { %v1419_v7 = vpop.permute.xlu0 %1418  ;;  %1370 = vadd.xlane.f32.xlu1 %v1369_v6 }
 0x532   : > { %5992 = vpow2.f32 %v1356_v5  ;;  %v1441_v8 = vsel %vm1439_vm7, %v1419_v7, 0 }
 0x533   : > { %v6746_v9 = vpop.eup %5986  ;;  %5407 = vmatpush3.bf16.msra.mxu0 %v1441_v8 }
 0x534   : > { %v1372_v10 = vsel %vm1305_vm6, %v6746_v9, 0.0  ;;  %5408 = vmatprep.subr.bf16.mxu0 %v6285_v21 }
 0x535   : > { %1373 = vadd.xlane.f32.xlu1 %v1372_v10  ;;  %v1415_v16 = vpop.permute.xlu0 %1414 }
 0x537   : > { %v6751_v12 = vpop.eup %5988  ;;  %5409 = vmatpush3.bf16.msra.mxu0 %v1417_v11 }
 0x538   : > { %v1375_v13 = vsel %vm1305_vm6, %v6751_v12, 0.0  ;;  %5410 = vmatprep.subr.bf16.mxu0 %v6285_v21 }
 0x539   : > { %1376 = vadd.xlane.f32.xlu0 %v1375_v13  ;;  %v1411_v30 = vpop.permute.xlu0 %1410 }
 0x53b   : > { %v6756_v17 = vpop.eup %5990  ;;  %5411 = vmatpush3.bf16.msra.mxu0 %v1415_v16 }
 0x53c   : > { %v1378_v18 = vsel %vm1305_vm6, %v6756_v17, 0.0  ;;  %5412 = vmatprep.subr.bf16.mxu0 %v6285_v21 }
 0x53d   : > { %1379 = vadd.xlane.f32.xlu1 %v1378_v18 }
 0x53f   : > { %v6761_v19 = vpop.eup %5992 }
 0x540   : > { %v1381_v23 = vsel %vm1305_vm6, %v6761_v19, 0.0 }
 0x541   : > { %1382 = vadd.xlane.f32.xlu0 %v1381_v23 }
 0x54e   : > { %1580 = vrot.lane.b32.xlu1 %v6641_v15, %s8103_s25 }
 0x557   : > { %1578 = vrot.lane.b32.xlu0 %v6635_v25, %s8103_s25 }
 0x55b   : > { %1576 = vrot.lane.b32.xlu0 %v6639_v33, %s8103_s25 }
 0x55e   : > { %v1332_v24 = vpop.xlane.xlu1 %1331 }
 0x55f   : > { %v1341_v26 = vsub.f32 %v6723_v39, %v1332_v24  ;;  %1574 = vrot.lane.b32.xlu0 %v6649_v41, %s8103_s25 }
 0x561   : > { %v1358_v27 = vmul.f32 1.442695, %v1341_v26 }
 0x562   : > { %v1413_v29 = vpop.permute.xlu1 %1412 }
 0x563   : > { %5994 = vpow2.f32 %v1358_v27  ;;  %1572 = vrot.lane.b32.xlu0 %v6647_v40, %s8103_s25  ;;  %5413 = vmatpush3.bf16.msra.mxu0 %v1413_v29  ;;  %s8138_s25 = smov 112  }
 0x564   : > { %5414 = vmatprep.subr.bf16.mxu0 %v6285_v21 }
 0x567   : > { %1562 = vrot.lane.b32.xlu0 %v6647_v40, %s8099_s6  ;;  %5415 = vmatpush3.bf16.msra.mxu0 %v1411_v30 }
 0x568   : > { %5436 = vmatprep.subr.bf16.mxu0 %v6285_v21 }
 0x56b   : > { %1564 = vrot.lane.b32.xlu0 %v6649_v41, %s8099_s6 }
 0x56f   : > { %1566 = vrot.lane.b32.xlu0 %v6639_v33, %s8099_s6 }
 0x570   : > { %v6784_v31 = vpop.eup %5994 }
 0x571   : > { %v1384_v32 = vsel %vm1305_vm6, %v6784_v31, 0.0 }
 0x572   : > { %1385 = vadd.xlane.f32.xlu1 %v1384_v32 }
 0x573   : > { %1568 = vrot.lane.b32.xlu0 %v6635_v25, %s8099_s6 }
 0x577   : > { %1814 = vrot.lane.b32.xlu0 %v6641_v15, %s8095_s29 }
 0x583   : > { %1570 = vrot.lane.b32.xlu1 %v6641_v15, %s8099_s6  ;;  %s8101_s6 = smov 16  }
 0x5ae   : > { %v1362_v34 = vpop.xlane.xlu0 %1361 }
 0x5af   : > { %5996 = vrcp.f32 %v1362_v34 }
 0x5b2   : > { %v1365_v35 = vpop.xlane.xlu1 %1364 }
 0x5b3   : > { %5998 = vrcp.f32 %v1365_v35 }
 0x5b6   : > { %v1368_v36 = vpop.xlane.xlu0 %1367 }
 0x5b7   : > { %6000 = vrcp.f32 %v1368_v36 }
 0x5ba   : > { %v1371_v39 = vpop.xlane.xlu1 %1370 }
 0x5bb   : > { %6002 = vrcp.f32 %v1371_v39 }
 0x5bc   : > { %v5997_v22 = vpop.eup %5996 }
 0x5bd   : > { %v1388_v44 = vmul.f32 %v5997_v22, %v6729_v58 }
 0x5be   : > { %v1374_v42 = vpop.xlane.xlu1 %1373 }
 0x5bf   : > { %6004 = vrcp.f32 %v1374_v42 }
 0x5c0   : > { %v5999_v43 = vpop.eup %5998 }
 0x5c1   : > { %v1390_v45 = vmul.f32 %v5999_v43, %v6733_v61 }
 0x5c2   : > { %v1377_v46 = vpop.xlane.xlu0 %1376 }
 0x5c3   : > { %6006 = vrcp.f32 %v1377_v46  ;;  %v1405_v49 = vpack.c.bf16 %v1390_v45, %v1388_v44 }
 0x5c4   : > { %v6001_v15 = vpop.eup %6000 }
 0x5c5   : > { %5417 = vmatmul.mubr.msk.bf16.vlgmr.msra.gmra.mxu0 %vm1305_vm6, %v1405_v49  ;;  %v1392_v20 = vmul.f32 %v6001_v15, %v6737_v47 }
 0x5c6   : > { %v1380_v14 = vpop.xlane.xlu1 %1379  ;;  %5420 = vmatprep.mubr.msk.bf16.mxu0 %vm6286_vm3, %v6285_v21 }
 0x5c7   : > { %6008 = vrcp.f32 %v1380_v14 }
 0x5c8   : > { %v6003_v50 = vpop.eup %6002 }
 0x5c9   : > { %v1394_v53 = vmul.f32 %v6003_v50, %v6741_v48 }
 0x5ca   : > { %v1383_v54 = vpop.xlane.xlu0 %1382  ;;  %v1581_v55 = vpop.permute.xlu1 %1580 }
 0x5cb   : > { %6010 = vrcp.f32 %v1383_v54  ;;  %v1610_v57 = vsel %vm1182_vm4, %v1581_v55, 0  ;;  %v1406_v37 = vpack.c.bf16 %v1394_v53, %v1392_v20 }
 0x5cc   : > { %5437 = vmatpush3.bf16.xpose.msra.mxu0 %v1610_v57  ;;  %v6005_v58 = vpop.eup %6004 }
 0x5cd   : > { %5421 = vmatmul.mubr.msk.bf16.gmra.mxu0 %vm1305_vm6, %v1406_v37  ;;  %5438 = vmatprep.subr.bf16.mxu0 %v6285_v21  ;;  %v1396_v60 = vmul.f32 %v6005_v58, %v6746_v9 }
 0x5ce   : > { %v1579_v59 = vpop.permute.xlu0 %1578  ;;  %5424 = vmatprep.mubr.msk.bf16.mxu0 %vm6286_vm3, %v6285_v21 }
 0x5cf   : > { %v1607_v62 = vsel %vm1182_vm4, %v1579_v59, 0 }
 0x5d0   : > { %v6007_v56 = vpop.eup %6006 }
 0x5d1   : > { %v1398_v28 = vmul.f32 %v6007_v56, %v6751_v12 }
 0x5d2   : > { %v1577_v61 = vpop.permute.xlu0 %1576 }
 0x5d3   : > { %v1407_v63 = vpack.c.bf16 %v1398_v28, %v1396_v60  ;;  %v1604_v4 = vsel %vm1182_vm4, %v1577_v61, 0 }
 0x5d4   : > { %5439 = vmatpush3.bf16.xpose.msra.mxu0 %v1607_v62  ;;  %v6009_v0 = vpop.eup %6008 }
 0x5d5   : > { %5425 = vmatmul.mubr.msk.bf16.gmra.mxu0 %vm1305_vm6, %v1407_v63  ;;  %5440 = vmatprep.subr.bf16.mxu0 %v6285_v21  ;;  %v1400_v1 = vmul.f32 %v6009_v0, %v6756_v17 }
 0x5d6   : > { %v1575_v38 = vpop.permute.xlu0 %1574  ;;  %5428 = vmatprep.mubr.msk.bf16.mxu0 %vm6286_vm3, %v6285_v21 }
 0x5d7   : > { %v1601_v7 = vsel %vm1182_vm4, %v1575_v38, 0 }
 0x5d8   : > { %v6011_v47 = vpop.eup %6010 }
 0x5d9   : > { %v1402_v2 = vmul.f32 %v6011_v47, %v6761_v19 }
 0x5da   : > { %v1573_v3 = vpop.permute.xlu0 %1572 }
 0x5db   : > { %v1408_v48 = vpack.c.bf16 %v1402_v2, %v1400_v1  ;;  %v1598_v10 = vsel %vm1182_vm4, %v1573_v3, 0 }
 0x5dc   : > { %5441 = vmatpush3.bf16.xpose.msra.mxu0 %v1604_v4 }
 0x5dd   : > { %5429 = vmatmul.mubr.msk.bf16.gmra.mxu0 %vm1305_vm6, %v1408_v48  ;;  %5442 = vmatprep.subr.bf16.mxu0 %v6285_v21 }
 0x5de   : > { %v1563_v5 = vpop.permute.xlu0 %1562  ;;  %5432 = vmatprep.mubr.msk.bf16.mxu0 %vm6286_vm3, %v6285_v21 }
 0x5e2   : > { %v1565_v6 = vpop.permute.xlu0 %1564 }
 0x5e4   : > { %5443 = vmatpush3.bf16.xpose.msra.mxu0 %v1601_v7 }
 0x5e5   : > { %5444 = vmatprep.subr.bf16.mxu0 %v6285_v21 }
 0x5e6   : > { %v1567_v8 = vpop.permute.xlu0 %1566 }
 0x5ea   : > { %v1569_v9 = vpop.permute.xlu0 %1568 }
 0x5ec   : > { %5445 = vmatpush3.bf16.xpose.msra.mxu0 %v1598_v10 }
 0x5ed   : > { %5496 = vmatprep.subr.bf16.mxu0 %v6285_v21 }
 0x5ee   : > { %v1815_v11 = vpop.permute.xlu0 %1814 }
 0x5ef   : > { %v1836_v12 = vsel %vm1439_vm7, %v1815_v11, 0 }
 0x5f0   : > { %5467 = vmatpush3.bf16.msra.mxu1 %v1836_v12 }
 0x5f1   : > { %5468 = vmatprep.subr.bf16.mxu1 %v6285_v21 }
 0x5fb   : > { %v1386_v13 = vpop.xlane.xlu1 %1385 }
 0x5fc   : > { %6012 = vrcp.f32 %v1386_v13 }
 0x5ff   : > { %v1571_v19 = vpop.permute.xlu1 %1570 }
 0x609   : > { %v6013_v16 = vpop.eup %6012 }
 0x60a   : > { %v1404_v17 = vmul.f32 %v6013_v16, %v6784_v31 }
 0x60c   : > { %v1409_v18 = vpack.c.bf16 %v1404_v17, %v1404_v17 }
 0x60e   : > { %5433 = vmatmul.mubr.msk.bf16.gmra.mxu0 %vm1305_vm6, %v1409_v18 }
 0x60f   : > { %5446 = vmatprep.mubr.msk.bf16.mxu0 %vm6286_vm3, %v6285_v21 }
 0x616   : > { %5447 = vmatmul.mubr.msk.bf16.vlgmr.msra.gmra.mxu0 %vm1182_vm4, %v1563_v5 }
 0x617   : > { %5450 = vmatprep.mubr.msk.bf16.mxu0 %vm6286_vm3, %v6285_v21 }
 0x61e   : > { %5451 = vmatmul.mubr.msk.bf16.gmra.mxu0 %vm1182_vm4, %v1565_v6 }
 0x61f   : > { %5454 = vmatprep.mubr.msk.bf16.mxu0 %vm6286_vm3, %v6285_v21 }
 0x626   : > { %5455 = vmatmul.mubr.msk.bf16.gmra.mxu0 %vm1182_vm4, %v1567_v8 }
 0x627   : > { %5458 = vmatprep.mubr.msk.bf16.mxu0 %vm6286_vm3, %v6285_v21 }
 0x62e   : > { %5459 = vmatmul.mubr.msk.bf16.gmra.mxu0 %vm1182_vm4, %v1569_v9 }
 0x62f   : > { %5462 = vmatprep.mubr.msk.bf16.mxu0 %vm6286_vm3, %v6285_v21 }
 0x636   : > { %5463 = vmatmul.mubr.msk.bf16.gmra.mxu0 %vm1182_vm4, %v1571_v19 }
 0x637   : > { %5500 = vmatprep.mubr.msk.bf16.mxu0 %vm6286_vm3, %v6285_v21 }
 0x685   : > { %v1477_v23 = vpop.f32.mrf.mxu0 }
 0x686   : > { %v5104_v24 = vpack.c.bf16 %v1477_v23, %v1477_v23 }
 0x687   : > { %v5418_v26 = vpop.f32.mrf.mxu0 }
 0x688   : > { %1553 = vst.msk [vmem:[#allocation3] sm:$0xf] %vm1552_vm8, %v5104_v24 }
 0x689   : > { %v1480_v27 = vpop.f32.mrf.mxu0 }
 0x68a   : > { %v5105_v29 = vpack.c.bf16 %v1480_v27, %v1480_v27 }
 0x68b   : > { %v5419_v30 = vpop.f32.mrf.mxu0 }
 0x68c   : > { %1554 = vst.msk [vmem:[#allocation3 + $0x4] sm:$0xf] %vm1552_vm8, %v5105_v29 }
 0x68d   : > { %v1485_v31 = vpop.f32.mrf.mxu0 }
 0x68e   : > { %v5106_v32 = vpack.c.bf16 %v1485_v31, %v1485_v31 }
 0x68f   : > { %v5422_v34 = vpop.f32.mrf.mxu0 }
 0x690   : > { %1555 = vst.msk [vmem:[#allocation3 + $0x8] sm:$0xf] %vm1552_vm8, %v5106_v32 }
 0x691   : > { %v1488_v35 = vpop.f32.mrf.mxu0 }
 0x692   : > { %v5107_v36 = vpack.c.bf16 %v1488_v35, %v1488_v35 }
 0x693   : > { %v5423_v39 = vpop.f32.mrf.mxu0 }
 0x694   : > { %1556 = vst.msk [vmem:[#allocation3 + $0xc] sm:$0xf] %vm1552_vm8, %v5107_v36 }
 0x695   : > { %v1493_v22 = vpop.f32.mrf.mxu0 }
 0x696   : > { %v5108_v42 = vpack.c.bf16 %v1493_v22, %v1493_v22 }
 0x697   : > { %v5426_v43 = vpop.f32.mrf.mxu0 }
 0x698   : > { %1557 = vst.msk [vmem:[#allocation3 + $0x10] sm:$0xf] %vm1552_vm8, %v5108_v42 }
 0x699   : > { %v1496_v44 = vpop.f32.mrf.mxu0 }
 0x69a   : > { %v5109_v45 = vpack.c.bf16 %v1496_v44, %v1496_v44 }
 0x69b   : > { %v5427_v46 = vpop.f32.mrf.mxu0 }
 0x69c   : > { %1558 = vst.msk [vmem:[#allocation3 + $0x14] sm:$0xf] %vm1552_vm8, %v5109_v45 }
 0x69d   : > { %v1501_v49 = vpop.f32.mrf.mxu0 }
 0x69e   : > { %v5110_v15 = vpack.c.bf16 %v1501_v49, %v1501_v49 }
 0x69f   : > { %v5430_v14 = vpop.f32.mrf.mxu0 }
 0x6a0   : > { %1559 = vst.msk [vmem:[#allocation3 + $0x18] sm:$0xf] %vm1552_vm8, %v5110_v15 }
 0x6a1   : > { %v1504_v50 = vpop.f32.mrf.mxu0 }
 0x6a2   : > { %v5111_v20 = vpack.c.bf16 %v1504_v50, %v1504_v50 }
 0x6a3   : > { %v5431_v53 = vpop.f32.mrf.mxu0 }
 0x6a4   : > { %1560 = vst.msk [vmem:[#allocation3 + $0x1c] sm:$0xf] %vm1552_vm8, %v5111_v20 }
 0x6ce   : > { %v1509_v54 = vpop.f32.mrf.mxu0 }
 0x6cf   : > { %v5112_v55 = vpack.c.bf16 %v1509_v54, %v1509_v54 }
 0x6d0   : > { %v5434_v57 = vpop.f32.mrf.mxu0 }
 0x6d1   : > { %1561 = vst.msk [vmem:[#allocation3 + $0x20] sm:$0xf] %vm1552_vm8, %v5112_v55 }
 0x6d2   : > { %v1512_v37 = vpop.f32.mrf.mxu0 }
 0x6d4   : > { %v5435_v58 = vpop.f32.mrf.mxu0 }
 0x6d6   : > { %v1646_v59 = vpop.f32.mrf.mxu0 }
 0x6d7   : > { %v1684_v56 = vmul.f32 0.25, %v1646_v59 }
 0x6d8   : > { %v5448_v60 = vpop.f32.mrf.mxu0 }
 0x6d9   : > { %v1693_v28 = vsel %vm896_vm5, %v1684_v56, -1e+30 }
 0x6da   : > { %v1649_v61 = vpop.f32.mrf.mxu0  ;;  %v1702_v62 = vsel %vm1305_vm6, %v1693_v28, -inf }
 0x6db   : > { %v1685_v63 = vmul.f32 0.25, %v1649_v61  ;;  %1703 = vmax.xlane.f32.xlu0 %v1702_v62 }
 0x6dc   : > { %v5449_v0 = vpop.f32.mrf.mxu0 }
 0x6dd   : > { %v1694_v38 = vsel %vm896_vm5, %v1685_v63, -1e+30 }
 0x6de   : > { %v1654_v47 = vpop.f32.mrf.mxu0  ;;  %v1705_v1 = vsel %vm1305_vm6, %v1694_v38, -inf }
 0x6df   : > { %v1686_v2 = vmul.f32 0.25, %v1654_v47  ;;  %1706 = vmax.xlane.f32.xlu1 %v1705_v1 }
 0x6e0   : > { %v5452_v3 = vpop.f32.mrf.mxu0 }
 0x6e1   : > { %v1695_v4 = vsel %vm896_vm5, %v1686_v2, -1e+30 }
 0x6e2   : > { %v1657_v48 = vpop.f32.mrf.mxu0  ;;  %v1708_v5 = vsel %vm1305_vm6, %v1695_v4, -inf }
 0x6e3   : > { %v1687_v6 = vmul.f32 0.25, %v1657_v48  ;;  %1709 = vmax.xlane.f32.xlu0 %v1708_v5 }
 0x6e4   : > { %v5453_v7 = vpop.f32.mrf.mxu0 }
 0x6e5   : > { %v1696_v8 = vsel %vm896_vm5, %v1687_v6, -1e+30 }
 0x6e6   : > { %v1662_v9 = vpop.f32.mrf.mxu0  ;;  %v1711_v10 = vsel %vm1305_vm6, %v1696_v8, -inf }
 0x6e7   : > { %v1688_v11 = vmul.f32 0.25, %v1662_v9  ;;  %1712 = vmax.xlane.f32.xlu0 %v1711_v10 }
 0x6e8   : > { %v5456_v12 = vpop.f32.mrf.mxu0 }
 0x6e9   : > { %v1697_v13 = vsel %vm896_vm5, %v1688_v11, -1e+30 }
 0x6ea   : > { %v1665_v16 = vpop.f32.mrf.mxu0  ;;  %v1714_v17 = vsel %vm1305_vm6, %v1697_v13, -inf }
 0x6eb   : > { %v1689_v18 = vmul.f32 0.25, %v1665_v16  ;;  %1715 = vmax.xlane.f32.xlu0 %v1714_v17 }
 0x6ec   : > { %v5457_v19 = vpop.f32.mrf.mxu0 }
 0x6ed   : > { %v1698_v23 = vsel %vm896_vm5, %v1689_v18, -1e+30 }
 0x6ee   : > { %v1670_v24 = vpop.f32.mrf.mxu0  ;;  %v1717_v26 = vsel %vm1305_vm6, %v1698_v23, -inf }
 0x6ef   : > { %v1690_v27 = vmul.f32 0.25, %v1670_v24  ;;  %1718 = vmax.xlane.f32.xlu0 %v1717_v26 }
 0x6f0   : > { %1812 = vrot.lane.b32.xlu1 %v6635_v25, %s8095_s29  ;;  %v5460_v29 = vpop.f32.mrf.mxu0 }
 0x6f1   : > { %v6876_v30 = vsel %vm896_vm5, %v1690_v27, -1e+30 }
 0x6f2   : > { %v1673_v31 = vpop.f32.mrf.mxu0  ;;  %v1720_v32 = vsel %vm1305_vm6, %v6876_v30, -inf }
 0x6f3   : > { %v1691_v34 = vmul.f32 0.25, %v1673_v31  ;;  %1721 = vmax.xlane.f32.xlu0 %v1720_v32 }
 0x6f4   : > { %v5461_v35 = vpop.f32.mrf.mxu0 }
 0x6f5   : > { %v1700_v36 = vsel %vm896_vm5, %v1691_v34, -1e+30 }
 0x6f6   : > { %v1678_v39 = vpop.f32.mrf.mxu0  ;;  %v1723_v22 = vsel %vm1305_vm6, %v1700_v36, -inf }
 0x6f7   : > { %1724 = vmax.xlane.f32.xlu0 %v1723_v22  ;;  %v1692_v44 = vmul.f32 0.25, %v1678_v39 }
 0x6f8   : > { %v5464_v25 = vpop.f32.mrf.mxu0 }
 0x6f9   : > { %v6887_v45 = vsel %vm896_vm5, %v1692_v44, -1e+30 }
 0x6fa   : > { %v1681_v42 = vpop.f32.mrf.mxu0  ;;  %v1726_v46 = vsel %vm1305_vm6, %v6887_v45, -inf }
 0x6fc   : > { %v5465_v43 = vpop.f32.mrf.mxu0 }
 0x70d   : > { %1810 = vrot.lane.b32.xlu0 %v6639_v33, %s8095_s29 }
 0x714   : > { %1727 = vmax.xlane.f32.xlu1 %v1726_v46 }
 0x764   : > { %v1704_v49 = vpop.xlane.xlu0 %1703 }
 0x765   : > { %v1729_v15 = vsub.f32 %v1693_v28, %v1704_v49 }
 0x767   : > { %v1738_v14 = vmul.f32 1.442695, %v1729_v15 }
 0x768   : > { %v1707_v50 = vpop.xlane.xlu1 %1706 }
 0x769   : > { %6014 = vpow2.f32 %v1738_v14  ;;  %v1730_v20 = vsub.f32 %v1694_v38, %v1707_v50 }
 0x76b   : > { %v1740_v53 = vmul.f32 1.442695, %v1730_v20 }
 0x76c   : > { %v1710_v54 = vpop.xlane.xlu0 %1709  ;;  %v1813_v55 = vpop.permute.xlu1 %1812 }
 0x76d   : > { %6016 = vpow2.f32 %v1740_v53  ;;  %v1731_v57 = vsub.f32 %v1695_v4, %v1710_v54  ;;  %5469 = vmatpush3.bf16.msra.mxu1 %v1813_v55 }
 0x76e   : > { %5470 = vmatprep.subr.bf16.mxu1 %v6285_v21 }
 0x76f   : > { %v1742_v33 = vmul.f32 1.442695, %v1731_v57 }
 0x770   : > { %v1713_v37 = vpop.xlane.xlu0 %1712 }
 0x771   : > { %6018 = vpow2.f32 %v1742_v33  ;;  %v1732_v58 = vsub.f32 %v1696_v8, %v1713_v37 }
 0x773   : > { %v1744_v59 = vmul.f32 1.442695, %v1732_v58 }
 0x774   : > { %v1716_v56 = vpop.xlane.xlu0 %1715 }
 0x775   : > { %6020 = vpow2.f32 %v1744_v59  ;;  %v1733_v60 = vsub.f32 %v1697_v13, %v1716_v56 }
 0x776   : > { %v6892_v28 = vpop.eup %6014 }
 0x777   : > { %v1746_v61 = vmul.f32 1.442695, %v1733_v60  ;;  %v1756_v62 = vsel %vm1305_vm6, %v6892_v28, 0.0 }
 0x778   : > { %v1719_v63 = vpop.xlane.xlu0 %1718  ;;  %1757 = vadd.xlane.f32.xlu0 %v1756_v62 }
 0x779   : > { %6022 = vpow2.f32 %v1746_v61  ;;  %v1734_v0 = vsub.f32 %v1698_v23, %v1719_v63 }
 0x77a   : > { %v6017_v38 = vpop.eup %6016 }
 0x77b   : > { %v1748_v47 = vmul.f32 1.442695, %v1734_v0  ;;  %v1759_v1 = vsel %vm1305_vm6, %v6017_v38, 0.0 }
 0x77c   : > { %v1722_v2 = vpop.xlane.xlu0 %1721  ;;  %1760 = vadd.xlane.f32.xlu1 %v1759_v1 }
 0x77d   : > { %6024 = vpow2.f32 %v1748_v47  ;;  %v1735_v18 = vsub.f32 %v6876_v30, %v1722_v2  ;;  %v5893_v47 = vld [vmem:[%s8069_s9] sm:$0xff]  }
 0x77e   : > { %v6897_v3 = vpop.eup %6018 }
 0x77f   : > { %v1762_v4 = vsel %vm1305_vm6, %v6897_v3, 0.0  ;;  %v1750_v23 = vmul.f32 1.442695, %v1735_v18 }
 0x780   : > { %1763 = vadd.xlane.f32.xlu0 %v1762_v4  ;;  %v1725_v48 = vpop.xlane.xlu0 %1724 }
 0x781   : > { %v1736_v5 = vsub.f32 %v1700_v36, %v1725_v48 }
 0x782   : > { %v6021_v6 = vpop.eup %6020 }
 0x783   : > { %v1752_v7 = vmul.f32 1.442695, %v1736_v5  ;;  %v1765_v8 = vsel %vm1305_vm6, %v6021_v6, 0.0 }
 0x784   : > { %v1811_v9 = vpop.permute.xlu0 %1810  ;;  %1766 = vadd.xlane.f32.xlu1 %v1765_v8 }
 0x785   : > { %6026 = vpow2.f32 %v1752_v7  ;;  %5471 = vmatpush3.bf16.msra.mxu1 %v1811_v9 }
 0x786   : > { %v6023_v10 = vpop.eup %6022  ;;  %5472 = vmatprep.subr.bf16.mxu1 %v6285_v21  ;;  %6028 = vpow2.f32 %v1750_v23 }
 0x787   : > { %v1768_v11 = vsel %vm1305_vm6, %v6023_v10, 0.0 }
 0x788   : > { %1769 = vadd.xlane.f32.xlu1 %v1768_v11 }
 0x78a   : > { %v6025_v12 = vpop.eup %6024 }
 0x78b   : > { %v1771_v13 = vsel %vm1305_vm6, %v6025_v12, 0.0 }
 0x78c   : > { %1772 = vadd.xlane.f32.xlu0 %v1771_v13 }
 0x792   : > { %v6905_v16 = vpop.eup %6026 }
 0x793   : > { %v1777_v17 = vsel %vm1305_vm6, %v6905_v16, 0.0  ;;  %v6029_v27 = vpop.eup %6028 }
 0x794   : > { %1778 = vadd.xlane.f32.xlu0 %v1777_v17  ;;  %v1774_v29 = vsel %vm1305_vm6, %v6029_v27, 0.0 }
 0x799   : > { %1808 = vrot.lane.b32.xlu1 %v6649_v41, %s8095_s29 }
 0x79d   : > { %v1728_v19 = vpop.xlane.xlu1 %1727 }
 0x79e   : > { %v1737_v24 = vsub.f32 %v6887_v45, %v1728_v19 }
 0x7a0   : > { %v1754_v26 = vmul.f32 1.442695, %v1737_v24 }
 0x7a2   : > { %6030 = vpow2.f32 %v1754_v26 }
 0x7aa   : > { %1806 = vrot.lane.b32.xlu0 %v6647_v40, %s8095_s29  ;;  %s8137_s29 = smov 80  }
 0x7af   : > { %v6031_v31 = vpop.eup %6030 }
 0x7b0   : > { %v1780_v32 = vsel %vm1305_vm6, %v6031_v31, 0.0 }
 0x7bd   : > { %1775 = vadd.xlane.f32.xlu1 %v1774_v29 }
 0x7c1   : > { %1781 = vadd.xlane.f32.xlu1 %v1780_v32 }
 0x801   : > { %v1758_v34 = vpop.xlane.xlu0 %1757 }
 0x805   : > { %v1761_v41 = vpop.xlane.xlu1 %1760 }
 0x806   : > { %6032 = vrcp.f32 %v1761_v41 }
 0x807   : > { %6034 = vrcp.f32 %v1758_v34 }
 0x809   : > { %v1764_v36 = vpop.xlane.xlu0 %1763 }
 0x80d   : > { %v1767_v30 = vpop.xlane.xlu1 %1766 }
 0x80e   : > { %6036 = vrcp.f32 %v1767_v30 }
 0x80f   : > { %6038 = vrcp.f32 %v1764_v36 }
 0x811   : > { %v1770_v35 = vpop.xlane.xlu1 %1769 }
 0x813   : > { %v6033_v22 = vpop.eup %6032 }
 0x814   : > { %v6035_v42 = vpop.eup %6034  ;;  %v1786_v43 = vmul.f32 %v6033_v22, %v6017_v38  ;;  %v5892_v38 = vld [vmem:[%s8069_s9 + $0x8] sm:$0xff]  }
 0x815   : > { %v1809_v39 = vpop.permute.xlu1 %1808  ;;  %v1773_v40 = vpop.xlane.xlu0 %1772  ;;  %v1784_v44 = vmul.f32 %v6035_v42, %v6892_v28  ;;  %5497 = vmatpush3.bf16.msra.mxu0 %v5892_v38  ;;  %v6216_v38 = vld [vmem:[#allocation2 + $0x10] sm:$0xff] }
 0x816   : > { %5473 = vmatpush3.bf16.msra.mxu1 %v1809_v39  ;;  %6040 = vrcp.f32 %v1773_v40  ;;  %5498 = vmatprep.subr.bf16.mxu0 %v6285_v21 }
 0x817   : > { %5474 = vmatprep.subr.bf16.mxu1 %v6285_v21  ;;  %6042 = vrcp.f32 %v1770_v35  ;;  %v1801_v46 = vpack.c.bf16 %v1786_v43, %v1784_v44 }
 0x819   : > { %5499 = vmatpush3.bf16.msra.mxu0 %v5893_v47 }
 0x81a   : > { %5544 = vmatprep.subr.bf16.mxu0 %v6285_v21 }
 0x81b   : > { %v6037_v49 = vpop.eup %6036 }
 0x81c   : > { %v6039_v15 = vpop.eup %6038  ;;  %v1790_v14 = vmul.f32 %v6037_v49, %v6021_v6 }
 0x81d   : > { %v1779_v25 = vpop.xlane.xlu0 %1778  ;;  %v1788_v50 = vmul.f32 %v6039_v15, %v6897_v3 }
 0x81e   : > { %6044 = vrcp.f32 %v1779_v25 }
 0x81f   : > { %v1802_v20 = vpack.c.bf16 %v1790_v14, %v1788_v50 }
 0x821   : > { %v1807_v45 = vpop.permute.xlu0 %1806 }
 0x822   : > { %5475 = vmatpush3.bf16.msra.mxu1 %v1807_v45 }
 0x823   : > { %5520 = vmatprep.subr.bf16.mxu1 %v6285_v21  ;;  %v6041_v53 = vpop.eup %6040 }
 0x824   : > { %v6043_v54 = vpop.eup %6042  ;;  %v1794_v55 = vmul.f32 %v6041_v53, %v6025_v12 }
 0x825   : > { %5477 = vmatmul.mubr.msk.bf16.vlgmr.msra.gmra.mxu1 %vm1305_vm6, %v1801_v46  ;;  %v1792_v57 = vmul.f32 %v6043_v54, %v6023_v10 }
 0x826   : > { %5480 = vmatprep.mubr.msk.bf16.mxu1 %vm6286_vm3, %v6285_v21 }
 0x827   : > { %v1803_v33 = vpack.c.bf16 %v1794_v55, %v1792_v57  ;;  %v6214_v57 = vld [vmem:[#allocation2] sm:$0xff] }
 0x82b   : > { %v6045_v59 = vpop.eup %6044 }
 0x82c   : > { %v1798_v28 = vmul.f32 %v6045_v59, %v6905_v16 }
 0x82d   : > { %5481 = vmatmul.mubr.msk.bf16.gmra.mxu1 %vm1305_vm6, %v1802_v20  ;;  %v4920_v20 = vld [vmem:[%s8070_s10] ss:$0 sm:$0xff] }
 0x82e   : > { %5484 = vmatprep.mubr.msk.bf16.mxu1 %vm6286_vm3, %v6285_v21 }
 0x835   : > { %5485 = vmatmul.mubr.msk.bf16.gmra.mxu1 %vm1305_vm6, %v1803_v33 }
 0x836   : > { %5488 = vmatprep.mubr.msk.bf16.mxu1 %vm6286_vm3, %v6285_v21 }
 0x846   : > { %v1776_v37 = vpop.xlane.xlu1 %1775 }
 0x847   : > { %6046 = vrcp.f32 %v1776_v37 }
 0x84a   : > { %v1782_v58 = vpop.xlane.xlu1 %1781 }
 0x84b   : > { %6048 = vrcp.f32 %v1782_v58 }
 0x854   : > { %v6047_v56 = vpop.eup %6046 }
 0x855   : > { %v1796_v60 = vmul.f32 %v6047_v56, %v6029_v27 }
 0x857   : > { %v1804_v61 = vpack.c.bf16 %v1798_v28, %v1796_v60  ;;  %v6215_v60 = vld [vmem:[#allocation2 + $0x8] sm:$0xff] }
 0x858   : > { %v6049_v62 = vpop.eup %6048 }
 0x859   : > { %5489 = vmatmul.mubr.msk.bf16.gmra.mxu1 %vm1305_vm6, %v1804_v61  ;;  %v1800_v63 = vmul.f32 %v6049_v62, %v6031_v31 }
 0x85a   : > { %5492 = vmatprep.mubr.msk.bf16.mxu1 %vm6286_vm3, %v6285_v21 }
 0x85b   : > { %v1805_v0 = vpack.c.bf16 %v1800_v63, %v1800_v63 }
 0x861   : > { %5493 = vmatmul.mubr.msk.bf16.gmra.mxu1 %vm1305_vm6, %v1805_v0 }
 0x862   : > { %5524 = vmatprep.mubr.msk.bf16.mxu1 %vm6286_vm3, %v6285_v21 }
 0x8e5   : > { %v1872_v1 = vpop.f32.mrf.mxu1 }
 0x8e6   : > { %v5113_v2 = vpack.c.bf16 %v1872_v1, %v1872_v1 }
 0x8e7   : > { %v5478_v3 = vpop.f32.mrf.mxu1 }
 0x8e8   : > { %1938 = vrot.lane.b32.xlu1 %v5113_v2, %s8101_s6 }
 0x8e9   : > { %v1875_v4 = vpop.f32.mrf.mxu1 }
 0x8ea   : > { %v5114_v48 = vpack.c.bf16 %v1875_v4, %v1875_v4 }
 0x8eb   : > { %v5479_v5 = vpop.f32.mrf.mxu1 }
 0x8ec   : > { %1940 = vrot.lane.b32.xlu0 %v5114_v48, %s8101_s6  ;;  %v6217_v48 = vld [vmem:[#allocation2 + $0x18] sm:$0xff] }
 0x8ed   : > { %v1880_v6 = vpop.f32.mrf.mxu1 }
 0x8ee   : > { %v5115_v7 = vpack.c.bf16 %v1880_v6, %v1880_v6 }
 0x8ef   : > { %v5482_v8 = vpop.f32.mrf.mxu1 }
 0x8f0   : > { %1942 = vrot.lane.b32.xlu1 %v5115_v7, %s8101_s6 }
 0x8f1   : > { %v1883_v9 = vpop.f32.mrf.mxu1 }
 0x8f2   : > { %v5116_v10 = vpack.c.bf16 %v1883_v9, %v1883_v9 }
 0x8f3   : > { %v5483_v11 = vpop.f32.mrf.mxu1 }
 0x8f4   : > { %1944 = vrot.lane.b32.xlu0 %v5116_v10, %s8101_s6  ;;  %v6218_v10 = vld [vmem:[#allocation2 + $0x20] sm:$0xff] }
 0x8f5   : > { %v1888_v12 = vpop.f32.mrf.mxu1 }
 0x8f6   : > { %v5117_v13 = vpack.c.bf16 %v1888_v12, %v1888_v12 }
 0x8f7   : > { %v5486_v16 = vpop.f32.mrf.mxu1 }
 0x8f8   : > { %1946 = vrot.lane.b32.xlu1 %v5117_v13, %s8101_s6 }
 0x8f9   : > { %v1891_v17 = vpop.f32.mrf.mxu1 }
 0x8fa   : > { %v5118_v18 = vpack.c.bf16 %v1891_v17, %v1891_v17 }
 0x8fb   : > { %v5487_v19 = vpop.f32.mrf.mxu1 }
 0x8fc   : > { %1948 = vrot.lane.b32.xlu0 %v5118_v18, %s8101_s6  ;;  %v6219_v18 = vld [vmem:[#allocation2 + $0x28] sm:$0xff] }
 0x919   : > { %v1896_v23 = vpop.f32.mrf.mxu1 }
 0x91a   : > { %v5119_v24 = vpack.c.bf16 %v1896_v23, %v1896_v23 }
 0x91b   : > { %v5490_v26 = vpop.f32.mrf.mxu1 }
 0x91c   : > { %1950 = vrot.lane.b32.xlu1 %v5119_v24, %s8101_s6 }
 0x91d   : > { %v1899_v27 = vpop.f32.mrf.mxu1 }
 0x91e   : > { %v5120_v29 = vpack.c.bf16 %v1899_v27, %v1899_v27 }
 0x91f   : > { %v5491_v31 = vpop.f32.mrf.mxu1 }
 0x920   : > { %1952 = vrot.lane.b32.xlu0 %v5120_v29, %s8101_s6  ;;  %v6220_v29 = vld [vmem:[#allocation2 + $0x30] sm:$0xff] }
 0x921   : > { %v1904_v32 = vpop.f32.mrf.mxu1 }
 0x922   : > { %v5121_v41 = vpack.c.bf16 %v1904_v32, %v1904_v32 }
 0x923   : > { %v5494_v30 = vpop.f32.mrf.mxu1 }
 0x924   : > { %1954 = vrot.lane.b32.xlu1 %v5121_v41, %s8101_s6  ;;  %s8139_s6 = smov 64  }
 0x925   : > { %v1907_v34 = vpop.f32.mrf.mxu1 }
 0x927   : > { %v5495_v35 = vpop.f32.mrf.mxu1 }
 0x928   : > { %v6221_v35 = vld [vmem:[#allocation2 + $0x38] sm:$0xff] }
 0x95a   : > { %v1939_v36 = vpop.permute.xlu1 %1938 }
 0x95b   : > { %1966 = vst.msk [vmem:[#allocation3] sm:$0xf] %vm1965_vm9, %v1939_v36 }
 0x95e   : > { %v1941_v39 = vpop.permute.xlu0 %1940 }
 0x95f   : > { %1967 = vst.msk [vmem:[#allocation3 + $0x4] sm:$0xf] %vm1965_vm9, %v1941_v39 }
 0x962   : > { %v1943_v40 = vpop.permute.xlu1 %1942 }
 0x963   : > { %1968 = vst.msk [vmem:[#allocation3 + $0x8] sm:$0xf] %vm1965_vm9, %v1943_v40 }
 0x966   : > { %v1945_v22 = vpop.permute.xlu0 %1944  ;;  %v5894_v25 = vld [vmem:[#allocation3] sm:$0xff]  }
 0x967   : > { %1969 = vst.msk [vmem:[#allocation3 + $0xc] sm:$0xf] %vm1965_vm9, %v1945_v22  ;;  %5501 = vmatmul.mubr.msk.bf16.vlgmr.msra.gmra.mxu0 %vm871_vm1, %v5894_v25 }
 0x968   : > { %5504 = vmatprep.mubr.msk.bf16.mxu0 %vm6286_vm3, %v6285_v21 }
 0x96a   : > { %v1947_v42 = vpop.permute.xlu1 %1946 }
 0x96b   : > { %1970 = vst.msk [vmem:[#allocation3 + $0x10] sm:$0xf] %vm1965_vm9, %v1947_v42  ;;  %v6222_v42 = vld [vmem:[#allocation2 + $0x40] sm:$0xff] }
 0x96e   : > { %v1949_v43 = vpop.permute.xlu0 %1948  ;;  %v5895_v44 = vld [vmem:[#allocation3 + $0x8] sm:$0xff]  }
 0x96f   : > { %1971 = vst.msk [vmem:[#allocation3 + $0x14] sm:$0xf] %vm1965_vm9, %v1949_v43  ;;  %5505 = vmatmul.mubr.msk.bf16.gmra.mxu0 %vm871_vm1, %v5895_v44 }
 0x970   : > { %5508 = vmatprep.mubr.msk.bf16.mxu0 %vm6286_vm3, %v6285_v21 }
 0x976   : > { %v5896_v45 = vld [vmem:[#allocation3 + $0x10] sm:$0xff]  }
 0x977   : > { %5509 = vmatmul.mubr.msk.bf16.gmra.mxu0 %vm871_vm1, %v5896_v45 }
 0x978   : > { %5512 = vmatprep.mubr.msk.bf16.mxu0 %vm6286_vm3, %v6285_v21 }
 0x98e   : > { %v1951_v46 = vpop.permute.xlu1 %1950 }
 0x98f   : > { %1972 = vst.msk [vmem:[#allocation3 + $0x18] sm:$0xf] %vm1965_vm9, %v1951_v46 }
 0x992   : > { %v1953_v49 = vpop.permute.xlu0 %1952 }
 0x993   : > { %1973 = vst.msk [vmem:[#allocation3 + $0x1c] sm:$0xf] %vm1965_vm9, %v1953_v49 }
 0x996   : > { %v1955_v15 = vpop.permute.xlu1 %1954 }
 0x997   : > { %1974 = vst.msk [vmem:[#allocation3 + $0x20] sm:$0xf] %vm1965_vm9, %v1955_v15 }
 0x99a   : > { %v5897_v14 = vld [vmem:[#allocation3 + $0x18] sm:$0xff]  }
 0x99b   : > { %5513 = vmatmul.mubr.msk.bf16.gmra.mxu0 %vm871_vm1, %v5897_v14 }
 0x99c   : > { %5516 = vmatprep.mubr.msk.bf16.mxu0 %vm6286_vm3, %v6285_v21 }
 0x99e   : > { %v5898_v50 = vld [vmem:[#allocation3 + $0x20] ss:$0 sps:$4 sm:$0xff]  }
 0x9a3   : > { %5517 = vmatmul.mubr.msk.bf16.gmra.mxu0 %vm871_vm1, %v5898_v50 }
 0x9a4   : > { %5560 = vmatprep.mubr.msk.bf16.mxu0 %vm6286_vm3, %v6285_v21 }
 0xa27   : > { %v2079_v53 = vpop.f32.mrf.mxu0 }
 0xa28   : > { %v2080_v54 = vadd.f32 %v4920_v20, %v2079_v53 }
 0xa29   : > { %v5502_v55 = vpop.f32.mrf.mxu0 }
 0xa2a   : > { %v6981_v33 = vadd.f32 %v6214_v57, %v2080_v54 }
 0xa2b   : > { %v2082_v37 = vpop.f32.mrf.mxu0 }
 0xa2c   : > { %v2083_v58 = vadd.f32 %v4920_v20, %v2082_v37  ;;  %v2128_v59 = vsel %vm871_vm1, %v6981_v33, 0.0 }
 0xa2d   : > { %v5503_v56 = vpop.f32.mrf.mxu0  ;;  %2129 = vadd.xlane.f32.xlu0 %v2128_v59 }
 0xa2e   : > { %v6985_v28 = vadd.f32 %v6215_v60, %v2083_v58 }
 0xa2f   : > { %v2087_v61 = vpop.f32.mrf.mxu0 }
 0xa30   : > { %v2088_v62 = vadd.f32 %v4920_v20, %v2087_v61  ;;  %v2131_v63 = vsel %vm871_vm1, %v6985_v28, 0.0 }
 0xa31   : > { %v5506_v0 = vpop.f32.mrf.mxu0  ;;  %2132 = vadd.xlane.f32.xlu1 %v2131_v63 }
 0xa32   : > { %v6989_v47 = vadd.f32 %v6216_v38, %v2088_v62 }
 0xa33   : > { %v2090_v1 = vpop.f32.mrf.mxu0 }
 0xa34   : > { %v2091_v2 = vadd.f32 %v4920_v20, %v2090_v1  ;;  %v2134_v3 = vsel %vm871_vm1, %v6989_v47, 0.0 }
 0xa35   : > { %v5507_v4 = vpop.f32.mrf.mxu0  ;;  %2135 = vadd.xlane.f32.xlu0 %v2134_v3 }
 0xa36   : > { %v6993_v5 = vadd.f32 %v6217_v48, %v2091_v2 }
 0xa37   : > { %v2095_v6 = vpop.f32.mrf.mxu0 }
 0xa38   : > { %v2096_v7 = vadd.f32 %v4920_v20, %v2095_v6  ;;  %v2137_v8 = vsel %vm871_vm1, %v6993_v5, 0.0 }
 0xa39   : > { %v5510_v9 = vpop.f32.mrf.mxu0  ;;  %2138 = vadd.xlane.f32.xlu0 %v2137_v8 }
 0xa3a   : > { %v6997_v11 = vadd.f32 %v6218_v10, %v2096_v7 }
 0xa3b   : > { %v2098_v12 = vpop.f32.mrf.mxu0 }
 0xa3c   : > { %v2099_v13 = vadd.f32 %v4920_v20, %v2098_v12  ;;  %v2140_v16 = vsel %vm871_vm1, %v6997_v11, 0.0 }
 0xa3d   : > { %v5511_v17 = vpop.f32.mrf.mxu0  ;;  %2141 = vadd.xlane.f32.xlu1 %v2140_v16  ;;  %v5900_v16 = vld [vmem:[%s8073_s13] sm:$0xff]  }
 0xa3e   : > { %v7001_v19 = vadd.f32 %v6219_v18, %v2099_v13  ;;  %v5899_v13 = vld [vmem:[%s8073_s13 + $0x8] sm:$0xff]  }
 0xa3f   : > { %5521 = vmatpush3.bf16.msra.mxu1 %v5899_v13 }
 0xa40   : > { %v2143_v23 = vsel %vm871_vm1, %v7001_v19, 0.0  ;;  %5522 = vmatprep.subr.bf16.mxu1 %v6285_v21 }
 0xa41   : > { %2144 = vadd.xlane.f32.xlu0 %v2143_v23 }
 0xa43   : > { %5523 = vmatpush3.bf16.msra.mxu1 %v5900_v16 }
 0xa44   : > { %5580 = vmatprep.subr.bf16.mxu1 %v6285_v21 }
 0xa5b   : > { %v2103_v24 = vpop.f32.mrf.mxu0 }
 0xa5c   : > { %v2104_v26 = vadd.f32 %v4920_v20, %v2103_v24 }
 0xa5d   : > { %v5514_v27 = vpop.f32.mrf.mxu0 }
 0xa5e   : > { %v7005_v31 = vadd.f32 %v6220_v29, %v2104_v26 }
 0xa5f   : > { %v2106_v32 = vpop.f32.mrf.mxu0 }
 0xa60   : > { %v2107_v41 = vadd.f32 %v4920_v20, %v2106_v32  ;;  %v2146_v30 = vsel %vm871_vm1, %v7005_v31, 0.0 }
 0xa61   : > { %v5515_v34 = vpop.f32.mrf.mxu0  ;;  %2147 = vadd.xlane.f32.xlu1 %v2146_v30 }
 0xa62   : > { %v7009_v36 = vadd.f32 %v6221_v35, %v2107_v41 }
 0xa63   : > { %v2111_v39 = vpop.f32.mrf.mxu0 }
 0xa64   : > { %v2112_v40 = vadd.f32 %v4920_v20, %v2111_v39  ;;  %v2149_v22 = vsel %vm871_vm1, %v7009_v36, 0.0 }
 0xa65   : > { %2150 = vadd.xlane.f32.xlu0 %v2149_v22  ;;  %v5518_v25 = vpop.f32.mrf.mxu0 }
 0xa66   : > { %v7013_v43 = vadd.f32 %v6222_v42, %v2112_v40 }
 0xa67   : > { %v2114_v44 = vpop.f32.mrf.mxu0 }
 0xa68   : > { %v2152_v45 = vsel %vm871_vm1, %v7013_v43, 0.0 }
 0xa69   : > { %2153 = vadd.xlane.f32.xlu1 %v2152_v45  ;;  %v5519_v46 = vpop.f32.mrf.mxu0 }
 0xab6   : > { %v2130_v49 = vpop.xlane.xlu0 %2129 }
 0xab7   : > { %v2155_v15 = vmul.f32 0.03125, %v2130_v49 }
 0xab9   : > { %v7018_v14 = vsub.f32 %v6981_v33, %v2155_v15 }
 0xaba   : > { %v2133_v50 = vpop.xlane.xlu1 %2132 }
 0xabb   : > { %v2156_v20 = vmul.f32 0.03125, %v2133_v50  ;;  %v2173_v53 = vmul.f32 %v7018_v14, %v7018_v14 }
 0xabd   : > { %v7023_v54 = vsub.f32 %v6985_v28, %v2156_v20  ;;  %v2182_v55 = vsel %vm871_vm1, %v2173_v53, 0.0 }
 0xabe   : > { %2183 = vadd.xlane.f32.xlu0 %v2182_v55  ;;  %v2136_v57 = vpop.xlane.xlu0 %2135 }
 0xabf   : > { %v2157_v37 = vmul.f32 0.03125, %v2136_v57  ;;  %v2174_v58 = vmul.f32 %v7023_v54, %v7023_v54 }
 0xac1   : > { %v7029_v59 = vsub.f32 %v6989_v47, %v2157_v37  ;;  %v2185_v56 = vsel %vm871_vm1, %v2174_v58, 0.0 }
 0xac2   : > { %v2139_v60 = vpop.xlane.xlu0 %2138  ;;  %2186 = vadd.xlane.f32.xlu1 %v2185_v56 }
 0xac3   : > { %v2158_v61 = vmul.f32 0.03125, %v2139_v60  ;;  %v2175_v62 = vmul.f32 %v7029_v59, %v7029_v59 }
 0xac5   : > { %v7035_v63 = vsub.f32 %v6993_v5, %v2158_v61  ;;  %v2188_v0 = vsel %vm871_vm1, %v2175_v62, 0.0  ;;  %v4933_v62 = vld [vmem:[%s8071_s11] ss:$0 sm:$0xff] }
 0xac6   : > { %2189 = vadd.xlane.f32.xlu0 %v2188_v0  ;;  %v2142_v38 = vpop.xlane.xlu1 %2141 }
 0xac7   : > { %v2159_v1 = vmul.f32 0.03125, %v2142_v38  ;;  %v2176_v2 = vmul.f32 %v7035_v63, %v7035_v63 }
 0xac9   : > { %v7041_v3 = vsub.f32 %v6997_v11, %v2159_v1  ;;  %v2191_v4 = vsel %vm871_vm1, %v2176_v2, 0.0 }
 0xaca   : > { %v2145_v48 = vpop.xlane.xlu0 %2144  ;;  %2192 = vadd.xlane.f32.xlu1 %v2191_v4 }
 0xacb   : > { %v2160_v6 = vmul.f32 0.03125, %v2145_v48  ;;  %v2177_v7 = vmul.f32 %v7041_v3, %v7041_v3 }
 0xacd   : > { %v7047_v8 = vsub.f32 %v7001_v19, %v2160_v6  ;;  %v2194_v9 = vsel %vm871_vm1, %v2177_v7, 0.0  ;;  %v4934_v6 = vld [vmem:[%s8072_s12] ss:$0 sm:$0xff] }
 0xace   : > { %2195 = vadd.xlane.f32.xlu0 %v2194_v9 }
 0xacf   : > { %v2178_v10 = vmul.f32 %v7047_v8, %v7047_v8 }
 0xad1   : > { %v2197_v12 = vsel %vm871_vm1, %v2178_v10, 0.0 }
 0xad2   : > { %2198 = vadd.xlane.f32.xlu1 %v2197_v12 }
 0xaea   : > { %v2148_v17 = vpop.xlane.xlu1 %2147 }
 0xaeb   : > { %v2161_v18 = vmul.f32 0.03125, %v2148_v17 }
 0xaed   : > { %v7062_v23 = vsub.f32 %v7005_v31, %v2161_v18 }
 0xaee   : > { %v2151_v24 = vpop.xlane.xlu0 %2150 }
 0xaef   : > { %v2162_v26 = vmul.f32 0.03125, %v2151_v24  ;;  %v2179_v27 = vmul.f32 %v7062_v23, %v7062_v23 }
 0xaf1   : > { %v7067_v29 = vsub.f32 %v7009_v36, %v2162_v26  ;;  %v2200_v32 = vsel %vm871_vm1, %v2179_v27, 0.0 }
 0xaf2   : > { %2201 = vadd.xlane.f32.xlu0 %v2200_v32  ;;  %v2154_v41 = vpop.xlane.xlu1 %2153 }
 0xaf3   : > { %v2163_v30 = vmul.f32 0.03125, %v2154_v41  ;;  %v2180_v34 = vmul.f32 %v7067_v29, %v7067_v29 }
 0xaf5   : > { %v7073_v35 = vsub.f32 %v7013_v43, %v2163_v30  ;;  %v2203_v39 = vsel %vm871_vm1, %v2180_v34, 0.0 }
 0xaf6   : > { %2204 = vadd.xlane.f32.xlu1 %v2203_v39 }
 0xaf7   : > { %v2181_v40 = vmul.f32 %v7073_v35, %v7073_v35 }
 0xaf9   : > { %v2206_v22 = vsel %vm871_vm1, %v2181_v40, 0.0 }
 0xafa   : > { %2207 = vadd.xlane.f32.xlu0 %v2206_v22 }
 0xb47   : > { %v2184_v25 = vpop.xlane.xlu0 %2183 }
 0xb48   : > { %v2209_v42 = vmul.f32 0.03125, %v2184_v25 }
 0xb4a   : > { %v2218_v44 = vadd.f32 1e-06, %v2209_v42 }
 0xb4b   : > { %v2187_v45 = vpop.xlane.xlu1 %2186 }
 0xb4c   : > { %6050 = vrsqrt.f32 %v2218_v44  ;;  %v2210_v46 = vmul.f32 0.03125, %v2187_v45 }
 0xb4e   : > { %v2219_v49 = vadd.f32 1e-06, %v2210_v46 }
 0xb4f   : > { %v2190_v15 = vpop.xlane.xlu0 %2189 }
 0xb50   : > { %6052 = vrsqrt.f32 %v2219_v49  ;;  %v2211_v50 = vmul.f32 0.03125, %v2190_v15 }
 0xb52   : > { %v2220_v20 = vadd.f32 1e-06, %v2211_v50 }
 0xb53   : > { %v2193_v53 = vpop.xlane.xlu1 %2192 }
 0xb54   : > { %6054 = vrsqrt.f32 %v2220_v20  ;;  %v2212_v55 = vmul.f32 0.03125, %v2193_v53 }
 0xb56   : > { %v2221_v57 = vadd.f32 1e-06, %v2212_v55 }
 0xb57   : > { %v2196_v37 = vpop.xlane.xlu0 %2195 }
 0xb58   : > { %6056 = vrsqrt.f32 %v2221_v57  ;;  %v2213_v58 = vmul.f32 0.03125, %v2196_v37 }
 0xb59   : > { %v6051_v56 = vpop.eup %6050 }
 0xb5a   : > { %v2236_v60 = vmul.f32 %v6051_v56, %v7018_v14  ;;  %v2222_v61 = vadd.f32 1e-06, %v2213_v58 }
 0xb5b   : > { %v2199_v0 = vpop.xlane.xlu1 %2198 }
 0xb5c   : > { %6058 = vrsqrt.f32 %v2222_v61  ;;  %v2214_v38 = vmul.f32 0.03125, %v2199_v0  ;;  %v2251_v2 = vmul.f32 %v4933_v62, %v2236_v60 }
 0xb5d   : > { %v6053_v1 = vpop.eup %6052 }
 0xb5e   : > { %v2237_v4 = vmul.f32 %v6053_v1, %v7023_v54  ;;  %v2223_v48 = vadd.f32 1e-06, %v2214_v38  ;;  %v2266_v9 = vadd.f32 %v4934_v6, %v2251_v2 }
 0xb60   : > { %v2252_v7 = vmul.f32 %v4933_v62, %v2237_v4  ;;  %6060 = vrsqrt.f32 %v2223_v48  ;;  %v5905_v4 = vld [vmem:[%s8075_s15 + $0x18] sm:$0xff]   ;;  %v5906_v48 = vld [vmem:[%s8075_s15 + $0x10] sm:$0xff]  }
 0xb61   : > { %v6055_v14 = vpop.eup %6054 }
 0xb62   : > { %v2267_v10 = vadd.f32 %v4934_v6, %v2252_v7  ;;  %v2238_v12 = vmul.f32 %v6055_v14, %v7029_v59  ;;  %v5908_v7 = vld [vmem:[%s8075_s15] sm:$0xff]  }
 0xb63   : > { %v7144_v14 = vld [vmem:[%s8074_s14] ss:$0 sm:$0xff] }
 0xb64   : > { %v2275_v13 = vpack.c.bf16 %v2267_v10, %v2266_v9  ;;  %v2253_v18 = vmul.f32 %v4933_v62, %v2238_v12 }
 0xb65   : > { %v6057_v16 = vpop.eup %6056 }
 0xb66   : > { %5525 = vmatmul.mubr.msk.bf16.vlgmr.msra.gmra.mxu1 %vm871_vm1, %v2275_v13  ;;  %v2239_v17 = vmul.f32 %v6057_v16, %v7035_v63  ;;  %v2268_v26 = vadd.f32 %v4934_v6, %v2253_v18 }
 0xb67   : > { %5528 = vmatprep.mubr.msk.bf16.mxu1 %vm6286_vm3, %v6285_v21 }
 0xb68   : > { %v2254_v54 = vmul.f32 %v4933_v62, %v2239_v17 }
 0xb69   : > { %v6059_v24 = vpop.eup %6058 }
 0xb6a   : > { %v2269_v27 = vadd.f32 %v4934_v6, %v2254_v54  ;;  %v2240_v32 = vmul.f32 %v6059_v24, %v7041_v3 }
 0xb6c   : > { %v2276_v41 = vpack.c.bf16 %v2269_v27, %v2268_v26  ;;  %v2255_v34 = vmul.f32 %v4933_v62, %v2240_v32 }
 0xb6d   : > { %v6061_v30 = vpop.eup %6060 }
 0xb6e   : > { %5529 = vmatmul.mubr.msk.bf16.gmra.mxu1 %vm871_vm1, %v2276_v41  ;;  %v2241_v59 = vmul.f32 %v6061_v30, %v7047_v8  ;;  %v2270_v39 = vadd.f32 %v4934_v6, %v2255_v34 }
 0xb6f   : > { %5532 = vmatprep.mubr.msk.bf16.mxu1 %vm6286_vm3, %v6285_v21 }
 0xb70   : > { %v2256_v63 = vmul.f32 %v4933_v62, %v2241_v59 }
 0xb72   : > { %v2271_v40 = vadd.f32 %v4934_v6, %v2256_v63 }
 0xb74   : > { %v2277_v22 = vpack.c.bf16 %v2271_v40, %v2270_v39 }
 0xb76   : > { %5533 = vmatmul.mubr.msk.bf16.gmra.mxu1 %vm871_vm1, %v2277_v22 }
 0xb77   : > { %5536 = vmatprep.mubr.msk.bf16.mxu1 %vm6286_vm3, %v6285_v21 }
 0xb7b   : > { %v2202_v3 = vpop.xlane.xlu0 %2201 }
 0xb7c   : > { %v2215_v25 = vmul.f32 0.03125, %v2202_v3 }
 0xb7e   : > { %v2224_v42 = vadd.f32 1e-06, %v2215_v25 }
 0xb7f   : > { %v2205_v44 = vpop.xlane.xlu1 %2204 }
 0xb80   : > { %6062 = vrsqrt.f32 %v2224_v42  ;;  %v2216_v45 = vmul.f32 0.03125, %v2205_v44 }
 0xb82   : > { %v2225_v8 = vadd.f32 1e-06, %v2216_v45 }
 0xb83   : > { %v2208_v46 = vpop.xlane.xlu0 %2207 }
 0xb84   : > { %6064 = vrsqrt.f32 %v2225_v8  ;;  %v2217_v49 = vmul.f32 0.03125, %v2208_v46 }
 0xb86   : > { %v2226_v15 = vadd.f32 1e-06, %v2217_v49 }
 0xb88   : > { %6066 = vrsqrt.f32 %v2226_v15 }
 0xb8d   : > { %v6063_v50 = vpop.eup %6062 }
 0xb8e   : > { %v2242_v20 = vmul.f32 %v6063_v50, %v7062_v23  ;;  %v5901_v23 = vld [vmem:[%s8075_s15 + $0x38] sm:$0xff]  }
 0xb8f   : > { %5545 = vmatpush3.bf16.msra.mxu0 %v5901_v23 }
 0xb90   : > { %v2257_v57 = vmul.f32 %v4933_v62, %v2242_v20  ;;  %5546 = vmatprep.subr.bf16.mxu0 %v6285_v21 }
 0xb91   : > { %v6065_v53 = vpop.eup %6064 }
 0xb92   : > { %v2243_v55 = vmul.f32 %v6065_v53, %v7067_v29  ;;  %v2272_v56 = vadd.f32 %v4934_v6, %v2257_v57  ;;  %v5902_v29 = vld [vmem:[%s8075_s15 + $0x30] sm:$0xff]  }
 0xb93   : > { %5547 = vmatpush3.bf16.msra.mxu0 %v5902_v29 }
 0xb94   : > { %v2258_v37 = vmul.f32 %v4933_v62, %v2243_v55  ;;  %5548 = vmatprep.subr.bf16.mxu0 %v6285_v21 }
 0xb95   : > { %v6067_v58 = vpop.eup %6066 }
 0xb96   : > { %v2273_v60 = vadd.f32 %v4934_v6, %v2258_v37  ;;  %v2244_v61 = vmul.f32 %v6067_v58, %v7073_v35  ;;  %v5903_v35 = vld [vmem:[%s8075_s15 + $0x28] sm:$0xff]  }
 0xb97   : > { %5549 = vmatpush3.bf16.msra.mxu0 %v5903_v35 }
 0xb98   : > { %v2278_v0 = vpack.c.bf16 %v2273_v60, %v2272_v56  ;;  %v2259_v38 = vmul.f32 %v4933_v62, %v2244_v61  ;;  %5550 = vmatprep.subr.bf16.mxu0 %v6285_v21  ;;  %v5904_v62 = vld [vmem:[%s8075_s15 + $0x20] sm:$0xff]  }
 0xb9a   : > { %5537 = vmatmul.mubr.msk.bf16.gmra.mxu1 %vm871_vm1, %v2278_v0  ;;  %v2274_v1 = vadd.f32 %v4934_v6, %v2259_v38  ;;  %v5907_v6 = vld [vmem:[%s8075_s15 + $0x8] sm:$0xff]  }
 0xb9b   : > { %5540 = vmatprep.mubr.msk.bf16.mxu1 %vm6286_vm3, %v6285_v21  ;;  %5551 = vmatpush3.bf16.msra.mxu0 %v5904_v62 }
 0xb9c   : > { %v2279_v2 = vpack.c.bf16 %v2274_v1, %v2274_v1  ;;  %5552 = vmatprep.subr.bf16.mxu0 %v6285_v21 }
 0xb9f   : > { %5553 = vmatpush3.bf16.msra.mxu0 %v5905_v4 }
 0xba0   : > { %5554 = vmatprep.subr.bf16.mxu0 %v6285_v21 }
 0xba2   : > { %5541 = vmatmul.mubr.msk.bf16.gmra.mxu1 %vm871_vm1, %v2279_v2 }
 0xba3   : > { %5584 = vmatprep.mubr.msk.bf16.mxu1 %vm6286_vm3, %v6285_v21  ;;  %5555 = vmatpush3.bf16.msra.mxu0 %v5906_v48 }
 0xba4   : > { %5556 = vmatprep.subr.bf16.mxu0 %v6285_v21 }
 0xba7   : > { %5557 = vmatpush3.bf16.msra.mxu0 %v5907_v6 }
 0xba8   : > { %5558 = vmatprep.subr.bf16.mxu0 %v6285_v21 }
 0xbab   : > { %5559 = vmatpush3.bf16.msra.mxu0 %v5908_v7 }
 0xbac   : > { %5604 = vmatprep.subr.bf16.mxu0 %v6285_v21 }
 0xc26   : > { %v2352_v9 = vpop.f32.mrf.mxu1 }
 0xc27   : > { %v2353_v10 = vadd.f32 %v7144_v14, %v2352_v9 }
 0xc28   : > { %v5526_v12 = vpop.f32.mrf.mxu1 }
 0xc29   : > { %v2390_v13 = vmul.f32 %v2353_v10, %v2353_v10 }
 0xc2a   : > { %v2355_v16 = vpop.f32.mrf.mxu1 }
 0xc2b   : > { %v2399_v17 = vmul.f32 %v2390_v13, %v2353_v10  ;;  %v2356_v18 = vadd.f32 %v7144_v14, %v2355_v16 }
 0xc2c   : > { %v5527_v54 = vpop.f32.mrf.mxu1 }
 0xc2d   : > { %v2408_v24 = vmul.f32 0.044715, %v2399_v17  ;;  %v2391_v26 = vmul.f32 %v2356_v18, %v2356_v18 }
 0xc2e   : > { %v2360_v27 = vpop.f32.mrf.mxu1 }
 0xc2f   : > { %v2417_v32 = vadd.f32 %v2408_v24, %v2353_v10  ;;  %v2400_v41 = vmul.f32 %v2391_v26, %v2356_v18  ;;  %v2361_v30 = vadd.f32 %v7144_v14, %v2360_v27 }
 0xc30   : > { %v5530_v59 = vpop.f32.mrf.mxu1 }
 0xc31   : > { %v2426_v34 = vmul.f32 0.7978846, %v2417_v32  ;;  %v2409_v63 = vmul.f32 0.044715, %v2400_v41  ;;  %v2392_v39 = vmul.f32 %v2361_v30, %v2361_v30 }
 0xc32   : > { %v2363_v40 = vpop.f32.mrf.mxu1 }
 0xc33   : > { %6068 = vtanh.f32 %v2426_v34  ;;  %v2418_v22 = vadd.f32 %v2409_v63, %v2356_v18  ;;  %v2401_v3 = vmul.f32 %v2392_v39, %v2361_v30  ;;  %v2364_v25 = vadd.f32 %v7144_v14, %v2363_v40 }
 0xc34   : > { %v5531_v42 = vpop.f32.mrf.mxu1 }
 0xc35   : > { %v2427_v44 = vmul.f32 0.7978846, %v2418_v22  ;;  %v2410_v45 = vmul.f32 0.044715, %v2401_v3  ;;  %v2393_v8 = vmul.f32 %v2364_v25, %v2364_v25 }
 0xc36   : > { %v2368_v46 = vpop.f32.mrf.mxu1 }
 0xc37   : > { %6070 = vtanh.f32 %v2427_v44  ;;  %v2419_v49 = vadd.f32 %v2410_v45, %v2361_v30  ;;  %v2402_v15 = vmul.f32 %v2393_v8, %v2364_v25  ;;  %v2369_v50 = vadd.f32 %v7144_v14, %v2368_v46 }
 0xc38   : > { %v5534_v20 = vpop.f32.mrf.mxu1 }
 0xc39   : > { %v2428_v53 = vmul.f32 0.7978846, %v2419_v49  ;;  %v2411_v55 = vmul.f32 0.044715, %v2402_v15  ;;  %v2394_v57 = vmul.f32 %v2369_v50, %v2369_v50 }
 0xc3a   : > { %v2371_v37 = vpop.f32.mrf.mxu1 }
 0xc3b   : > { %6072 = vtanh.f32 %v2428_v53  ;;  %v2420_v58 = vadd.f32 %v2411_v55, %v2364_v25  ;;  %v2403_v56 = vmul.f32 %v2394_v57, %v2369_v50  ;;  %v2372_v60 = vadd.f32 %v7144_v14, %v2371_v37 }
 0xc3c   : > { %v5535_v61 = vpop.f32.mrf.mxu1 }
 0xc3d   : > { %v2429_v0 = vmul.f32 0.7978846, %v2420_v58  ;;  %v2412_v38 = vmul.f32 0.044715, %v2403_v56  ;;  %v2395_v1 = vmul.f32 %v2372_v60, %v2372_v60 }
 0xc3f   : > { %6074 = vtanh.f32 %v2429_v0  ;;  %v2421_v2 = vadd.f32 %v2412_v38, %v2369_v50  ;;  %v2404_v23 = vmul.f32 %v2395_v1, %v2372_v60 }
 0xc40   : > { %v6069_v29 = vpop.eup %6068 }
 0xc41   : > { %v2444_v35 = vadd.f32 1.0, %v6069_v29  ;;  %v2430_v62 = vmul.f32 0.7978846, %v2421_v2  ;;  %v2413_v4 = vmul.f32 0.044715, %v2404_v23 }
 0xc43   : > { %6076 = vtanh.f32 %v2430_v62  ;;  %v2422_v48 = vadd.f32 %v2413_v4, %v2372_v60  ;;  %v2453_v7 = vmul.f32 0.5, %v2444_v35 }
 0xc44   : > { %v6071_v6 = vpop.eup %6070 }
 0xc45   : > { %v2445_v9 = vadd.f32 1.0, %v6071_v6  ;;  %v2431_v12 = vmul.f32 0.7978846, %v2422_v48  ;;  %v2462_v17 = vmul.f32 %v2453_v7, %v2353_v10 }
 0xc47   : > { %v2454_v13 = vmul.f32 0.5, %v2445_v9  ;;  %6078 = vtanh.f32 %v2431_v12 }
 0xc48   : > { %v6073_v16 = vpop.eup %6072 }
 0xc49   : > { %v2463_v54 = vmul.f32 %v2454_v13, %v2356_v18  ;;  %v2446_v24 = vadd.f32 1.0, %v6073_v16 }
 0xc4b   : > { %v2471_v26 = vpack.c.bf16 %v2463_v54, %v2462_v17  ;;  %v2455_v41 = vmul.f32 0.5, %v2446_v24 }
 0xc4c   : > { %v6075_v27 = vpop.eup %6074 }
 0xc4d   : > { %5561 = vmatmul.mubr.bf16.vlgmr.msra.gmra.mxu0 %v2471_v26  ;;  %v2447_v32 = vadd.f32 1.0, %v6075_v27  ;;  %v2464_v63 = vmul.f32 %v2455_v41, %v2361_v30 }
 0xc4e   : > { %5564 = vmatprep.mubr.msk.bf16.mxu0 %vm6286_vm3, %v6285_v21 }
 0xc4f   : > { %v2456_v59 = vmul.f32 0.5, %v2447_v32 }
 0xc50   : > { %v6077_v34 = vpop.eup %6076 }
 0xc51   : > { %v2465_v39 = vmul.f32 %v2456_v59, %v2364_v25  ;;  %v2448_v40 = vadd.f32 1.0, %v6077_v34  ;;  %v4943_v34 = vld [vmem:[%s8076_s16] ss:$0 sm:$0xff] }
 0xc53   : > { %v2472_v22 = vpack.c.bf16 %v2465_v39, %v2464_v63  ;;  %v2457_v10 = vmul.f32 0.5, %v2448_v40 }
 0xc54   : > { %v6079_v3 = vpop.eup %6078 }
 0xc55   : > { %5565 = vmatmul.mubr.bf16.gmra.mxu0 %v2472_v22  ;;  %v2449_v42 = vadd.f32 1.0, %v6079_v3  ;;  %v2466_v44 = vmul.f32 %v2457_v10, %v2369_v50 }
 0xc56   : > { %5568 = vmatprep.mubr.msk.bf16.mxu0 %vm6286_vm3, %v6285_v21 }
 0xc57   : > { %v2458_v18 = vmul.f32 0.5, %v2449_v42 }
 0xc59   : > { %v2467_v45 = vmul.f32 %v2458_v18, %v2372_v60 }
 0xc5a   : > { %v2376_v8 = vpop.f32.mrf.mxu1 }
 0xc5b   : > { %v2377_v46 = vadd.f32 %v7144_v14, %v2376_v8  ;;  %v2473_v49 = vpack.c.bf16 %v2467_v45, %v2466_v44 }
 0xc5c   : > { %v5538_v15 = vpop.f32.mrf.mxu1 }
 0xc5d   : > { %v2396_v20 = vmul.f32 %v2377_v46, %v2377_v46  ;;  %5569 = vmatmul.mubr.bf16.gmra.mxu0 %v2473_v49 }
 0xc5e   : > { %v2379_v30 = vpop.f32.mrf.mxu1  ;;  %5572 = vmatprep.mubr.msk.bf16.mxu0 %vm6286_vm3, %v6285_v21 }
 0xc5f   : > { %v2405_v25 = vmul.f32 %v2396_v20, %v2377_v46  ;;  %v2380_v53 = vadd.f32 %v7144_v14, %v2379_v30 }
 0xc60   : > { %v5539_v55 = vpop.f32.mrf.mxu1 }
 0xc61   : > { %v2414_v57 = vmul.f32 0.044715, %v2405_v25  ;;  %v2397_v37 = vmul.f32 %v2380_v53, %v2380_v53 }
 0xc62   : > { %v2384_v58 = vpop.f32.mrf.mxu1 }
 0xc63   : > { %v2423_v50 = vadd.f32 %v2414_v57, %v2377_v46  ;;  %v2406_v56 = vmul.f32 %v2397_v37, %v2380_v53  ;;  %v2385_v60 = vadd.f32 %v7144_v14, %v2384_v58 }
 0xc64   : > { %v5542_v61 = vpop.f32.mrf.mxu1 }
 0xc65   : > { %v2432_v0 = vmul.f32 0.7978846, %v2423_v50  ;;  %v2415_v38 = vmul.f32 0.044715, %v2406_v56  ;;  %v2398_v1 = vmul.f32 %v2385_v60, %v2385_v60 }
 0xc66   : > { %v2387_v2 = vpop.f32.mrf.mxu1 }
 0xc67   : > { %6080 = vtanh.f32 %v2432_v0  ;;  %v2424_v23 = vadd.f32 %v2415_v38, %v2380_v53  ;;  %v2407_v29 = vmul.f32 %v2398_v1, %v2385_v60 }
 0xc68   : > { %v5543_v35 = vpop.f32.mrf.mxu1 }
 0xc69   : > { %v2433_v62 = vmul.f32 0.7978846, %v2424_v23  ;;  %v2416_v4 = vmul.f32 0.044715, %v2407_v29 }
 0xc6b   : > { %6082 = vtanh.f32 %v2433_v62  ;;  %v2425_v48 = vadd.f32 %v2416_v4, %v2385_v60 }
 0xc6d   : > { %v2434_v6 = vmul.f32 0.7978846, %v2425_v48 }
 0xc6f   : > { %6084 = vtanh.f32 %v2434_v6 }
 0xc74   : > { %v6081_v7 = vpop.eup %6080 }
 0xc75   : > { %v2450_v9 = vadd.f32 1.0, %v6081_v7 }
 0xc77   : > { %v2459_v14 = vmul.f32 0.5, %v2450_v9 }
 0xc78   : > { %v6083_v12 = vpop.eup %6082 }
 0xc79   : > { %v2451_v13 = vadd.f32 1.0, %v6083_v12  ;;  %v2468_v54 = vmul.f32 %v2459_v14, %v2377_v46 }
 0xc7b   : > { %v2460_v16 = vmul.f32 0.5, %v2451_v13 }
 0xc7c   : > { %v6085_v17 = vpop.eup %6084 }
 0xc7d   : > { %v2469_v24 = vmul.f32 %v2460_v16, %v2380_v53  ;;  %v2452_v26 = vadd.f32 1.0, %v6085_v17 }
 0xc7f   : > { %v2474_v27 = vpack.c.bf16 %v2469_v24, %v2468_v54  ;;  %v2461_v32 = vmul.f32 0.5, %v2452_v26 }
 0xc81   : > { %5573 = vmatmul.mubr.bf16.gmra.mxu0 %v2474_v27  ;;  %v2470_v41 = vmul.f32 %v2461_v32, %v2385_v60 }
 0xc82   : > { %5576 = vmatprep.mubr.msk.bf16.mxu0 %vm6286_vm3, %v6285_v21 }
 0xc83   : > { %v2475_v59 = vpack.c.bf16 %v2470_v41, %v2470_v41 }
 0xc89   : > { %5577 = vmatmul.mubr.bf16.gmra.mxu0 %v2475_v59 }
 0xc8a   : > { %5614 = vmatprep.mubr.msk.bf16.mxu0 %vm6286_vm3, %v6285_v21 }
 0xd0d   : > { %v2581_v63 = vpop.f32.mrf.mxu0 }
 0xd0e   : > { %v2582_v39 = vadd.f32 %v4943_v34, %v2581_v63 }
 0xd0f   : > { %v5562_v40 = vpop.f32.mrf.mxu0 }
 0xd10   : > { %v7169_v22 = vadd.f32 %v2582_v39, %v6981_v33 }
 0xd11   : > { %v2584_v3 = vpop.f32.mrf.mxu0 }
 0xd12   : > { %v2585_v42 = vadd.f32 %v4943_v34, %v2584_v3  ;;  %v2632_v10 = vsel %vm871_vm1, %v7169_v22, 0.0 }
 0xd13   : > { %2633 = vadd.xlane.f32.xlu1 %v2632_v10  ;;  %v5563_v18 = vpop.f32.mrf.mxu0 }
 0xd14   : > { %v7174_v44 = vadd.f32 %v2585_v42, %v6985_v28 }
 0xd15   : > { %v2589_v45 = vpop.f32.mrf.mxu0 }
 0xd16   : > { %v2590_v8 = vadd.f32 %v4943_v34, %v2589_v45  ;;  %v2635_v46 = vsel %vm871_vm1, %v7174_v44, 0.0 }
 0xd17   : > { %2636 = vadd.xlane.f32.xlu0 %v2635_v46  ;;  %v5566_v49 = vpop.f32.mrf.mxu0 }
 0xd18   : > { %v7179_v33 = vadd.f32 %v2590_v8, %v6989_v47 }
 0xd19   : > { %v2592_v15 = vpop.f32.mrf.mxu0 }
 0xd1a   : > { %v2593_v20 = vadd.f32 %v4943_v34, %v2592_v15  ;;  %v2638_v30 = vsel %vm871_vm1, %v7179_v33, 0.0 }
 0xd1b   : > { %2639 = vadd.xlane.f32.xlu1 %v2638_v30  ;;  %v5567_v25 = vpop.f32.mrf.mxu0 }
 0xd1c   : > { %v7184_v28 = vadd.f32 %v2593_v20, %v6993_v5 }
 0xd1d   : > { %v2597_v53 = vpop.f32.mrf.mxu0 }
 0xd1e   : > { %v2598_v55 = vadd.f32 %v4943_v34, %v2597_v53  ;;  %v2641_v57 = vsel %vm871_vm1, %v7184_v28, 0.0 }
 0xd1f   : > { %2642 = vadd.xlane.f32.xlu0 %v2641_v57  ;;  %v5570_v37 = vpop.f32.mrf.mxu0  ;;  %v5910_v57 = vld [vmem:[%s8132_s2 + $0x10] sm:$0xff]  }
 0xd20   : > { %v7189_v47 = vadd.f32 %v2598_v55, %v6997_v11  ;;  %v5909_v55 = vld [vmem:[%s8132_s2 + $0x18] sm:$0xff]   ;;  %s701_s2 = sand.u32 1, %s6275_s30  }
 0xd21   : > { %v2600_v58 = vpop.f32.mrf.mxu0  ;;  %5581 = vmatpush3.bf16.msra.mxu1 %v5909_v55  ;;  %s702_s3 = scalar_lea.vmem [#allocation4], %s701_s2 }
 0xd22   : > { %v2601_v50 = vadd.f32 %v4943_v34, %v2600_v58  ;;  %v2644_v56 = vsel %vm871_vm1, %v7189_v47, 0.0  ;;  %5582 = vmatprep.subr.bf16.mxu1 %v6285_v21  ;;  %s4800_s24 = sshll.u32 %s702_s3, 4  ;;  %s4801_s24 = int_to_ptr.vmem [resolvable:$true] %s4800_s24 }
 0xd23   : > { %2645 = vadd.xlane.f32.xlu1 %v2644_v56  ;;  %v5571_v60 = vpop.f32.mrf.mxu0 }
 0xd24   : > { %v7194_v5 = vadd.f32 %v2601_v50, %v7001_v19 }
 0xd25   : > { %5583 = vmatpush3.bf16.msra.mxu1 %v5910_v57 }
 0xd26   : > { %v2647_v61 = vsel %vm871_vm1, %v7194_v5, 0.0  ;;  %5634 = vmatprep.subr.bf16.mxu1 %v6285_v21 }
 0xd27   : > { %2648 = vadd.xlane.f32.xlu0 %v2647_v61 }
 0xd41   : > { %v2605_v0 = vpop.f32.mrf.mxu0 }
 0xd42   : > { %v2606_v38 = vadd.f32 %v4943_v34, %v2605_v0 }
 0xd43   : > { %v5574_v1 = vpop.f32.mrf.mxu0 }
 0xd44   : > { %v7199_v11 = vadd.f32 %v2606_v38, %v7005_v31 }
 0xd45   : > { %v2608_v2 = vpop.f32.mrf.mxu0 }
 0xd46   : > { %v2609_v23 = vadd.f32 %v4943_v34, %v2608_v2  ;;  %v2650_v29 = vsel %vm871_vm1, %v7199_v11, 0.0 }
 0xd47   : > { %2651 = vadd.xlane.f32.xlu1 %v2650_v29  ;;  %v5575_v35 = vpop.f32.mrf.mxu0 }
 0xd48   : > { %v7204_v19 = vadd.f32 %v2609_v23, %v7009_v36 }
 0xd49   : > { %v2613_v62 = vpop.f32.mrf.mxu0 }
 0xd4a   : > { %v2614_v4 = vadd.f32 %v4943_v34, %v2613_v62  ;;  %v2653_v48 = vsel %vm871_vm1, %v7204_v19, 0.0 }
 0xd4b   : > { %2654 = vadd.xlane.f32.xlu0 %v2653_v48  ;;  %v5578_v6 = vpop.f32.mrf.mxu0 }
 0xd4c   : > { %v7209_v31 = vadd.f32 %v2614_v4, %v7013_v43 }
 0xd4d   : > { %v2616_v7 = vpop.f32.mrf.mxu0 }
 0xd4e   : > { %v2656_v9 = vsel %vm871_vm1, %v7209_v31, 0.0 }
 0xd4f   : > { %2657 = vadd.xlane.f32.xlu1 %v2656_v9  ;;  %v5579_v12 = vpop.f32.mrf.mxu0 }
 0xd9c   : > { %v2634_v13 = vpop.xlane.xlu1 %2633 }
 0xd9d   : > { %v2659_v14 = vmul.f32 0.03125, %v2634_v13 }
 0xd9f   : > { %v7214_v36 = vsub.f32 %v7169_v22, %v2659_v14 }
 0xda0   : > { %v2637_v16 = vpop.xlane.xlu0 %2636 }
 0xda1   : > { %v2660_v17 = vmul.f32 0.03125, %v2637_v16  ;;  %v2677_v54 = vmul.f32 %v7214_v36, %v7214_v36 }
 0xda3   : > { %v7219_v24 = vsub.f32 %v7174_v44, %v2660_v17  ;;  %v2686_v43 = vsel %vm871_vm1, %v2677_v54, 0.0 }
 0xda4   : > { %v2640_v26 = vpop.xlane.xlu1 %2639  ;;  %2687 = vadd.xlane.f32.xlu0 %v2686_v43 }
 0xda5   : > { %v2661_v27 = vmul.f32 0.03125, %v2640_v26  ;;  %v2678_v32 = vmul.f32 %v7219_v24, %v7219_v24 }
 0xda7   : > { %v7225_v41 = vsub.f32 %v7179_v33, %v2661_v27  ;;  %v2689_v59 = vsel %vm871_vm1, %v2678_v32, 0.0 }
 0xda8   : > { %v2643_v34 = vpop.xlane.xlu0 %2642  ;;  %2690 = vadd.xlane.f32.xlu1 %v2689_v59 }
 0xda9   : > { %v2662_v63 = vmul.f32 0.03125, %v2643_v34  ;;  %v2679_v39 = vmul.f32 %v7225_v41, %v7225_v41 }
 0xdab   : > { %v7231_v40 = vsub.f32 %v7184_v28, %v2662_v63  ;;  %v2692_v3 = vsel %vm871_vm1, %v2679_v39, 0.0  ;;  %v4954_v39 = vld [vmem:[%s8133_s27 + $0x1] ss:$0 sm:$0xff] }
 0xdac   : > { %v2646_v42 = vpop.xlane.xlu1 %2645  ;;  %2693 = vadd.xlane.f32.xlu0 %v2692_v3 }
 0xdad   : > { %v2663_v10 = vmul.f32 0.03125, %v2646_v42  ;;  %v2680_v18 = vmul.f32 %v7231_v40, %v7231_v40 }
 0xdaf   : > { %v7237_v45 = vsub.f32 %v7189_v47, %v2663_v10  ;;  %v2695_v8 = vsel %vm871_vm1, %v2680_v18, 0.0 }
 0xdb0   : > { %v2649_v46 = vpop.xlane.xlu0 %2648  ;;  %2696 = vadd.xlane.f32.xlu1 %v2695_v8 }
 0xdb1   : > { %v2664_v49 = vmul.f32 0.03125, %v2649_v46  ;;  %v2681_v15 = vmul.f32 %v7237_v45, %v7237_v45 }
 0xdb3   : > { %v7243_v20 = vsub.f32 %v7194_v5, %v2664_v49  ;;  %v2698_v30 = vsel %vm871_vm1, %v2681_v15, 0.0  ;;  %v4955_v49 = vld [vmem:[%s8134_s1 + $0x1] ss:$0 sm:$0xff]  ;;  %s6223_s1 = scalar_lea.vmem %s4801_s24, 16 }
 0xdb4   : > { %2699 = vadd.xlane.f32.xlu0 %v2698_v30  ;;  %p6224_p11 = scmp.ne.s32.totalorder %s4801_s24, %s6223_s1 }
 0xdb5   : > { %v2682_v25 = vmul.f32 %v7243_v20, %v7243_v20 }
 0xdb6   : > { %p6225_p12 = pnand %p6224_p11, %p6453_p5 }
 0xdb7   : > { %v2701_v53 = vsel %vm871_vm1, %v2682_v25, 0.0 }
 0xdb8   : > { %2702 = vadd.xlane.f32.xlu1 %v2701_v53  ;;  %p6226_p13 = pneg %p6225_p12 }
 0xdd0   : > { %v2652_v37 = vpop.xlane.xlu1 %2651 }
 0xdd1   : > { %v2665_v58 = vmul.f32 0.03125, %v2652_v37 }
 0xdd3   : > { %v7258_v50 = vsub.f32 %v7199_v11, %v2665_v58 }
 0xdd4   : > { %v2655_v56 = vpop.xlane.xlu0 %2654 }
 0xdd5   : > { %v2666_v60 = vmul.f32 0.03125, %v2655_v56  ;;  %v2683_v61 = vmul.f32 %v7258_v50, %v7258_v50 }
 0xdd7   : > { %v7263_v0 = vsub.f32 %v7204_v19, %v2666_v60  ;;  %v2704_v38 = vsel %vm871_vm1, %v2683_v61, 0.0 }
 0xdd8   : > { %2705 = vadd.xlane.f32.xlu0 %v2704_v38  ;;  %v2658_v1 = vpop.xlane.xlu1 %2657 }
 0xdd9   : > { %v2667_v2 = vmul.f32 0.03125, %v2658_v1  ;;  %v2684_v23 = vmul.f32 %v7263_v0, %v7263_v0 }
 0xddb   : > { %v7269_v29 = vsub.f32 %v7209_v31, %v2667_v2  ;;  %v2707_v35 = vsel %vm871_vm1, %v2684_v23, 0.0 }
 0xddc   : > { %2708 = vadd.xlane.f32.xlu1 %v2707_v35 }
 0xddd   : > { %v2685_v62 = vmul.f32 %v7269_v29, %v7269_v29 }
 0xddf   : > { %v2710_v4 = vsel %vm871_vm1, %v2685_v62, 0.0 }
 0xde0   : > { %2711 = vadd.xlane.f32.xlu0 %v2710_v4 }
 0xe2d   : > { %v2688_v48 = vpop.xlane.xlu0 %2687 }
 0xe2e   : > { %v2713_v6 = vmul.f32 0.03125, %v2688_v48 }
 0xe30   : > { %v2722_v7 = vadd.f32 1e-06, %v2713_v6 }
 0xe31   : > { %v2691_v9 = vpop.xlane.xlu1 %2690 }
 0xe32   : > { %6086 = vrsqrt.f32 %v2722_v7  ;;  %v2714_v12 = vmul.f32 0.03125, %v2691_v9 }
 0xe34   : > { %v2723_v13 = vadd.f32 1e-06, %v2714_v12 }
 0xe35   : > { %v2694_v14 = vpop.xlane.xlu0 %2693 }
 0xe36   : > { %6088 = vrsqrt.f32 %v2723_v13  ;;  %v2715_v16 = vmul.f32 0.03125, %v2694_v14 }
 0xe38   : > { %v2724_v17 = vadd.f32 1e-06, %v2715_v16 }
 0xe39   : > { %v2697_v54 = vpop.xlane.xlu1 %2696 }
 0xe3a   : > { %6090 = vrsqrt.f32 %v2724_v17  ;;  %v2716_v43 = vmul.f32 0.03125, %v2697_v54 }
 0xe3c   : > { %v2725_v26 = vadd.f32 1e-06, %v2716_v43 }
 0xe3d   : > { %v2700_v27 = vpop.xlane.xlu0 %2699 }
 0xe3e   : > { %6092 = vrsqrt.f32 %v2725_v26  ;;  %v2717_v32 = vmul.f32 0.03125, %v2700_v27 }
 0xe3f   : > { %v6087_v59 = vpop.eup %6086 }
 0xe40   : > { %v2740_v34 = vmul.f32 %v6087_v59, %v7214_v36  ;;  %v2726_v63 = vadd.f32 1e-06, %v2717_v32 }
 0xe41   : > { %v2703_v3 = vpop.xlane.xlu1 %2702 }
 0xe42   : > { %6094 = vrsqrt.f32 %v2726_v63  ;;  %v2718_v42 = vmul.f32 0.03125, %v2703_v3  ;;  %v2755_v18 = vmul.f32 %v4954_v39, %v2740_v34 }
 0xe43   : > { %v6089_v10 = vpop.eup %6088 }
 0xe44   : > { %v2741_v8 = vmul.f32 %v6089_v10, %v7219_v24  ;;  %v2727_v46 = vadd.f32 1e-06, %v2718_v42  ;;  %v2770_v30 = vadd.f32 %v4955_v49, %v2755_v18 }
 0xe46   : > { %v2756_v15 = vmul.f32 %v4954_v39, %v2741_v8  ;;  %6096 = vrsqrt.f32 %v2727_v46 }
 0xe47   : > { %v6091_v36 = vpop.eup %6090 }
 0xe48   : > { %v2771_v25 = vadd.f32 %v4955_v49, %v2756_v15  ;;  %v2742_v53 = vmul.f32 %v6091_v36, %v7225_v41 }
 0xe4a   : > { %v2779_v55 = vpack.c.bf16 %v2771_v25, %v2770_v30  ;;  %v2757_v58 = vmul.f32 %v4954_v39, %v2742_v53 }
 0xe4b   : > { %v6093_v57 = vpop.eup %6092 }
 0xe4c   : > { %5585 = vmatmul.mubr.msk.bf16.vlgmr.msra.gmra.mxu1 %vm871_vm1, %v2779_v55  ;;  %v2743_v37 = vmul.f32 %v6093_v57, %v7231_v40  ;;  %v2772_v60 = vadd.f32 %v4955_v49, %v2757_v58 }
 0xe4d   : > { %5588 = vmatprep.mubr.msk.bf16.mxu1 %vm6286_vm3, %v6285_v21 }
 0xe4e   : > { %v2758_v24 = vmul.f32 %v4954_v39, %v2743_v37  ;;  %v4961_v37 = vld [vmem:[%s8135_s8 + $0x1] ss:$0 sm:$0xff] }
 0xe4f   : > { %v6095_v56 = vpop.eup %6094 }
 0xe50   : > { %v2773_v61 = vadd.f32 %v4955_v49, %v2758_v24  ;;  %v2744_v38 = vmul.f32 %v6095_v56, %v7237_v45 }
 0xe52   : > { %v2780_v1 = vpack.c.bf16 %v2773_v61, %v2772_v60  ;;  %v2759_v23 = vmul.f32 %v4954_v39, %v2744_v38 }
 0xe53   : > { %v6097_v2 = vpop.eup %6096 }
 0xe54   : > { %5589 = vmatmul.mubr.msk.bf16.gmra.mxu1 %vm871_vm1, %v2780_v1  ;;  %v2745_v41 = vmul.f32 %v6097_v2, %v7243_v20  ;;  %v2774_v35 = vadd.f32 %v4955_v49, %v2759_v23 }
 0xe55   : > { %5592 = vmatprep.mubr.msk.bf16.mxu1 %vm6286_vm3, %v6285_v21 }
 0xe56   : > { %v2760_v40 = vmul.f32 %v4954_v39, %v2745_v41 }
 0xe58   : > { %v2775_v62 = vadd.f32 %v4955_v49, %v2760_v40 }
 0xe5a   : > { %v2781_v4 = vpack.c.bf16 %v2775_v62, %v2774_v35 }
 0xe5c   : > { %5593 = vmatmul.mubr.msk.bf16.gmra.mxu1 %vm871_vm1, %v2781_v4 }
 0xe5d   : > { %5596 = vmatprep.mubr.msk.bf16.mxu1 %vm6286_vm3, %v6285_v21 }
 0xe61   : > { %v2706_v45 = vpop.xlane.xlu0 %2705 }
 0xe62   : > { %v2719_v48 = vmul.f32 0.03125, %v2706_v45 }
 0xe64   : > { %v2728_v6 = vadd.f32 1e-06, %v2719_v48 }
 0xe65   : > { %v2709_v7 = vpop.xlane.xlu1 %2708 }
 0xe66   : > { %6098 = vrsqrt.f32 %v2728_v6  ;;  %v2720_v9 = vmul.f32 0.03125, %v2709_v7 }
 0xe68   : > { %v2729_v20 = vadd.f32 1e-06, %v2720_v9 }
 0xe69   : > { %v2712_v12 = vpop.xlane.xlu0 %2711 }
 0xe6a   : > { %6100 = vrsqrt.f32 %v2729_v20  ;;  %v2721_v13 = vmul.f32 0.03125, %v2712_v12 }
 0xe6c   : > { %v2730_v14 = vadd.f32 1e-06, %v2721_v13 }
 0xe6e   : > { %6102 = vrsqrt.f32 %v2730_v14 }
 0xe73   : > { %v6099_v16 = vpop.eup %6098 }
 0xe74   : > { %v2746_v17 = vmul.f32 %v6099_v16, %v7258_v50 }
 0xe76   : > { %v2761_v26 = vmul.f32 %v4954_v39, %v2746_v17 }
 0xe77   : > { %v6101_v54 = vpop.eup %6100 }
 0xe78   : > { %v2747_v43 = vmul.f32 %v6101_v54, %v7263_v0  ;;  %v2776_v59 = vadd.f32 %v4955_v49, %v2761_v26 }
 0xe7a   : > { %v2762_v27 = vmul.f32 %v4954_v39, %v2747_v43 }
 0xe7b   : > { %v6103_v32 = vpop.eup %6102 }
 0xe7c   : > { %v2777_v34 = vadd.f32 %v4955_v49, %v2762_v27  ;;  %v2748_v63 = vmul.f32 %v6103_v32, %v7269_v29 }
 0xe7e   : > { %v2782_v3 = vpack.c.bf16 %v2777_v34, %v2776_v59  ;;  %v2763_v42 = vmul.f32 %v4954_v39, %v2748_v63 }
 0xe80   : > { %5597 = vmatmul.mubr.msk.bf16.gmra.mxu1 %vm871_vm1, %v2782_v3  ;;  %v2778_v10 = vadd.f32 %v4955_v49, %v2763_v42 }
 0xe81   : > { %5600 = vmatprep.mubr.msk.bf16.mxu1 %vm6286_vm3, %v6285_v21 }
 0xe82   : > { %v2783_v18 = vpack.c.bf16 %v2778_v10, %v2778_v10 }
 0xe88   : > { %5601 = vmatmul.mubr.msk.bf16.gmra.mxu1 %vm871_vm1, %v2783_v18 }
 0xe89   : > { %5644 = vmatprep.mubr.msk.bf16.mxu1 %vm6286_vm3, %v6285_v21 }
 0xf0c   : > { %v2858_v50 = vpop.f32.mrf.mxu1 }
 0xf0d   : > { %v2859_v2 = vadd.f32 %v4961_v37, %v2858_v50 }
 0xf0e   : > { %v5586_v0 = vpop.f32.mrf.mxu1 }
 0xf10   : > { %v2861_v8 = vpop.f32.mrf.mxu1 }
 0xf11   : > { %v2862_v61 = vadd.f32 %v4961_v37, %v2861_v8 }
 0xf12   : > { %v5587_v46 = vpop.f32.mrf.mxu1 }
 0xf13   : > { %v7312_v40 = vpack.c.bf16 %v2862_v61, %v2859_v2 }
 0xf14   : > { %v2866_v15 = vpop.f32.mrf.mxu1 }
 0xf15   : > { %v2867_v9 = vadd.f32 %v4961_v37, %v2866_v15 }
 0xf16   : > { %v5590_v29 = vpop.f32.mrf.mxu1 }
 0xf18   : > { %v2869_v36 = vpop.f32.mrf.mxu1 }
 0xf19   : > { %v2870_v6 = vadd.f32 %v4961_v37, %v2869_v36 }
 0xf1a   : > { %v5591_v39 = vpop.f32.mrf.mxu1 }
 0xf1b   : > { %v7326_v20 = vpack.c.bf16 %v2870_v6, %v2867_v9 }
 0xf1c   : > { %v2874_v30 = vpop.f32.mrf.mxu1 }
 0xf1d   : > { %v2875_v45 = vadd.f32 %v4961_v37, %v2874_v30 }
 0xf1e   : > { %v5594_v25 = vpop.f32.mrf.mxu1 }
 0xf20   : > { %v2877_v53 = vpop.f32.mrf.mxu1 }
 0xf21   : > { %v2878_v35 = vadd.f32 %v4961_v37, %v2877_v53 }
 0xf22   : > { %v5595_v55 = vpop.f32.mrf.mxu1 }
 0xf23   : > { %v7320_v7 = vpack.c.bf16 %v2878_v35, %v2875_v45 }
 0xf40   : > { %v2882_v57 = vpop.f32.mrf.mxu1 }
 0xf41   : > { %v2883_v24 = vadd.f32 %v4961_v37, %v2882_v57 }
 0xf42   : > { %v5598_v49 = vpop.f32.mrf.mxu1 }
 0xf44   : > { %v2885_v58 = vpop.f32.mrf.mxu1 }
 0xf45   : > { %v2886_v56 = vadd.f32 %v4961_v37, %v2885_v58 }
 0xf46   : > { %v5599_v60 = vpop.f32.mrf.mxu1 }
 0xf47   : > { %v7308_v38 = vpack.c.bf16 %v2886_v56, %v2883_v24 }
 0xf48   : > { %v2890_v1 = vpop.f32.mrf.mxu1 }
 0xf49   : > { %v2891_v41 = vadd.f32 %v4961_v37, %v2890_v1  ;;  %2912 = vrot.lane.b32.xlu0 %v7308_v38, %s8136_s26 }
 0xf4a   : > { %v5602_v23 = vpop.f32.mrf.mxu1 }
 0xf4b   : > { %v7314_v62 = vpack.c.bf16 %v2891_v41, %v2891_v41 }
 0xf4c   : > { %v2893_v4 = vpop.f32.mrf.mxu1 }
 0xf4d   : > { %2906 = vrot.lane.b32.xlu0 %v7312_v40, %s8136_s26  ;;  %2914 = vrot.lane.b32.xlu1 %v7314_v62, %s8136_s26 }
 0xf4e   : > { %v5603_v48 = vpop.f32.mrf.mxu1 }
 0xf51   : > { %3306 = vrot.lane.b32.xlu0 %v7308_v38, %s8137_s29  ;;  %2910 = vrot.lane.b32.xlu1 %v7320_v7, %s8136_s26 }
 0xf55   : > { %3302 = vrot.lane.b32.xlu0 %v7326_v20, %s8137_s29  ;;  %2908 = vrot.lane.b32.xlu1 %v7326_v20, %s8136_s26 }
 0xf59   : > { %3290 = vrot.lane.b32.xlu0 %v7312_v40, %s8138_s25  ;;  %3308 = vrot.lane.b32.xlu1 %v7314_v62, %s8137_s29 }
 0xf5d   : > { %3294 = vrot.lane.b32.xlu0 %v7320_v7, %s8138_s25  ;;  %3304 = vrot.lane.b32.xlu1 %v7320_v7, %s8137_s29 }
 0xf61   : > { %3298 = vrot.lane.b32.xlu0 %v7314_v62, %s8138_s25  ;;  %3300 = vrot.lane.b32.xlu1 %v7312_v40, %s8137_s29 }
 0xf65   : > { %3144 = vrot.lane.b32.xlu0 %v7320_v7, %s8139_s6  ;;  %3292 = vrot.lane.b32.xlu1 %v7326_v20, %s8138_s25 }
 0xf69   : > { %3140 = vrot.lane.b32.xlu0 %v7312_v40, %s8139_s6  ;;  %3296 = vrot.lane.b32.xlu1 %v7308_v38, %s8138_s25  ;;  %s8141_s25 = smov 16  }
 0xf6d   : > { %3148 = vrot.lane.b32.xlu0 %v7314_v62, %s8139_s6  ;;  %3146 = vrot.lane.b32.xlu1 %v7308_v38, %s8139_s6 }
 0xf71   : > { %3142 = vrot.lane.b32.xlu1 %v7326_v20, %s8139_s6 }
 0xfbb   : > { %v2913_v12 = vpop.permute.xlu0 %2912 }
 0xfbc   : > { %v2941_v27 = vsel %vm1182_vm4, %v2913_v12, 0 }
 0xfbf   : > { %v2907_v13 = vpop.permute.xlu0 %2906  ;;  %v2915_v14 = vpop.permute.xlu1 %2914 }
 0xfc0   : > { %v2944_v16 = vsel %vm1182_vm4, %v2915_v14, 0  ;;  %v2932_v29 = vsel %vm1182_vm4, %v2907_v13, 0 }
 0xfc1   : > { %5605 = vmatpush3.bf16.xpose.msra.mxu0 %v2944_v16 }
 0xfc2   : > { %5606 = vmatprep.subr.bf16.mxu0 %v6285_v21 }
 0xfc3   : > { %v3307_v17 = vpop.permute.xlu0 %3306  ;;  %v2911_v54 = vpop.permute.xlu1 %2910 }
 0xfc4   : > { %v2938_v3 = vsel %vm1182_vm4, %v2911_v54, 0  ;;  %v3335_v53 = vsel %vm1182_vm4, %v3307_v17, 0 }
 0xfc7   : > { %v3303_v43 = vpop.permute.xlu0 %3302  ;;  %v2909_v26 = vpop.permute.xlu1 %2908 }
 0xfc8   : > { %v2935_v50 = vsel %vm1182_vm4, %v2909_v26, 0  ;;  %v3329_v57 = vsel %vm1182_vm4, %v3303_v43, 0 }
 0xfc9   : > { %5607 = vmatpush3.bf16.xpose.msra.mxu0 %v2941_v27 }
 0xfca   : > { %5608 = vmatprep.subr.bf16.mxu0 %v6285_v21 }
 0xfcb   : > { %v3291_v32 = vpop.permute.xlu0 %3290  ;;  %v3309_v59 = vpop.permute.xlu1 %3308 }
 0xfcc   : > { %v3338_v30 = vsel %vm1182_vm4, %v3309_v59, 0 }
 0xfcf   : > { %v3295_v34 = vpop.permute.xlu0 %3294  ;;  %v3305_v63 = vpop.permute.xlu1 %3304 }
 0xfd0   : > { %v3332_v55 = vsel %vm1182_vm4, %v3305_v63, 0 }
 0xfd1   : > { %5609 = vmatpush3.bf16.xpose.msra.mxu0 %v2938_v3 }
 0xfd2   : > { %5610 = vmatprep.subr.bf16.mxu0 %v6285_v21 }
 0xfd3   : > { %v3299_v42 = vpop.permute.xlu0 %3298  ;;  %v3301_v10 = vpop.permute.xlu1 %3300 }
 0xfd4   : > { %v3326_v49 = vsel %vm1182_vm4, %v3301_v10, 0 }
 0xfd7   : > { %v3145_v18 = vpop.permute.xlu0 %3144  ;;  %v3293_v0 = vpop.permute.xlu1 %3292 }
 0xfd9   : > { %5611 = vmatpush3.bf16.xpose.msra.mxu0 %v2935_v50 }
 0xfda   : > { %5612 = vmatprep.subr.bf16.mxu0 %v6285_v21 }
 0xfdb   : > { %v3141_v8 = vpop.permute.xlu0 %3140  ;;  %v3297_v46 = vpop.permute.xlu1 %3296 }
 0xfdf   : > { %v3149_v15 = vpop.permute.xlu0 %3148  ;;  %v3147_v39 = vpop.permute.xlu1 %3146 }
 0xfe0   : > { %v3170_v36 = vsel %vm1439_vm7, %v3149_v15, 0 }
 0xfe1   : > { %5613 = vmatpush3.bf16.xpose.msra.mxu0 %v2932_v29  ;;  %5635 = vmatpush3.bf16.msra.mxu1 %v3170_v36 }
 0xfe2   : > { %5636 = vmatprep.subr.bf16.mxu1 %v6285_v21  ;;  %5664 = vmatprep.subr.bf16.mxu0 %v6285_v21 }
 0xfe3   : > { %v3143_v25 = vpop.permute.xlu1 %3142 }
 0xfe5   : > { %5637 = vmatpush3.bf16.msra.mxu1 %v3147_v39 }
 0xfe6   : > { %5638 = vmatprep.subr.bf16.mxu1 %v6285_v21 }
 0xfe8   : > { %5615 = vmatmul.mubr.msk.bf16.vlgmr.msra.gmra.mxu0 %vm1182_vm4, %v7312_v40 }
 0xfe9   : > { %5639 = vmatpush3.bf16.msra.mxu1 %v3145_v18  ;;  %5665 = vmatpush3.bf16.xpose.msra.mxu0 %v3338_v30 }
 0xfea   : > { %5640 = vmatprep.subr.bf16.mxu1 %v6285_v21  ;;  %5618 = vmatprep.mubr.msk.bf16.mxu0 %vm6286_vm3, %v6285_v21 }
 0xfeb   : > { %5666 = vmatprep.subr.bf16.mxu0 %v6285_v21 }
 0xfed   : > { %5641 = vmatpush3.bf16.msra.mxu1 %v3143_v25 }
 0xfee   : > { %5642 = vmatprep.subr.bf16.mxu1 %v6285_v21 }
 0xff0   : > { %5619 = vmatmul.mubr.msk.bf16.gmra.mxu0 %vm1182_vm4, %v7326_v20 }
 0xff1   : > { %5643 = vmatpush3.bf16.msra.mxu1 %v3141_v8  ;;  %5667 = vmatpush3.bf16.xpose.msra.mxu0 %v3335_v53 }
 0xff2   : > { %5622 = vmatprep.mubr.msk.bf16.mxu0 %vm6286_vm3, %v6285_v21  ;;  %5668 = vmatprep.subr.bf16.mxu0 %v6285_v21 }
 0xff3   : > { %5694 = vmatprep.subr.bf16.mxu1 %v6285_v21 }
 0xff8   : > { %5623 = vmatmul.mubr.msk.bf16.gmra.mxu0 %vm1182_vm4, %v7320_v7 }
 0xff9   : > { %5669 = vmatpush3.bf16.xpose.msra.mxu0 %v3332_v55  ;;  %5626 = vmatprep.mubr.msk.bf16.mxu0 %vm6286_vm3, %v6285_v21 }
 0xffa   : > { %5670 = vmatprep.subr.bf16.mxu0 %v6285_v21 }
0x1000   : > { %5627 = vmatmul.mubr.msk.bf16.gmra.mxu0 %vm1182_vm4, %v7308_v38 }
0x1001   : > { %5671 = vmatpush3.bf16.xpose.msra.mxu0 %v3329_v57  ;;  %5630 = vmatprep.mubr.msk.bf16.mxu0 %vm6286_vm3, %v6285_v21 }
0x1002   : > { %5672 = vmatprep.subr.bf16.mxu0 %v6285_v21 }
0x1008   : > { %5631 = vmatmul.mubr.msk.bf16.gmra.mxu0 %vm1182_vm4, %v7314_v62 }
0x1009   : > { %5673 = vmatpush3.bf16.xpose.msra.mxu0 %v3326_v49  ;;  %5674 = vmatprep.mubr.msk.bf16.mxu0 %vm6286_vm3, %v6285_v21 }
0x100a   : > { %5724 = vmatprep.subr.bf16.mxu0 %v6285_v21 }
0x1010   : > { %5675 = vmatmul.mubr.msk.bf16.vlgmr.msra.gmra.mxu0 %vm1182_vm4, %v3291_v32 }
0x1011   : > { %5678 = vmatprep.mubr.msk.bf16.mxu0 %vm6286_vm3, %v6285_v21 }
0x1018   : > { %5679 = vmatmul.mubr.msk.bf16.gmra.mxu0 %vm1182_vm4, %v3293_v0 }
0x1019   : > { %5682 = vmatprep.mubr.msk.bf16.mxu0 %vm6286_vm3, %v6285_v21 }
0x1020   : > { %5683 = vmatmul.mubr.msk.bf16.gmra.mxu0 %vm1182_vm4, %v3295_v34 }
0x1021   : > { %5686 = vmatprep.mubr.msk.bf16.mxu0 %vm6286_vm3, %v6285_v21 }
0x1028   : > { %5687 = vmatmul.mubr.msk.bf16.gmra.mxu0 %vm1182_vm4, %v3297_v46 }
0x1029   : > { %5690 = vmatprep.mubr.msk.bf16.mxu0 %vm6286_vm3, %v6285_v21 }
0x1030   : > { %5691 = vmatmul.mubr.msk.bf16.gmra.mxu0 %vm1182_vm4, %v3299_v42 }
0x1031   : > { %5728 = vmatprep.mubr.msk.bf16.mxu0 %vm6286_vm3, %v6285_v21 }
0x10a8   : > { %v2980_v37 = vpop.f32.mrf.mxu0 }
0x10a9   : > { %v3018_v58 = vmul.f32 0.25, %v2980_v37 }
0x10aa   : > { %v5616_v24 = vpop.f32.mrf.mxu0 }
0x10ab   : > { %v7421_v56 = vsel %vm896_vm5, %v3018_v58, -1e+30 }
0x10ac   : > { %v2983_v60 = vpop.f32.mrf.mxu0  ;;  %v3036_v61 = vsel %vm1305_vm6, %v7421_v56, -inf }
0x10ad   : > { %v3019_v1 = vmul.f32 0.25, %v2983_v60  ;;  %3037 = vmax.xlane.f32.xlu1 %v3036_v61 }
0x10ae   : > { %v5617_v2 = vpop.f32.mrf.mxu0 }
0x10af   : > { %v7427_v41 = vsel %vm896_vm5, %v3019_v1, -1e+30 }
0x10b0   : > { %v2988_v23 = vpop.f32.mrf.mxu0  ;;  %v3039_v35 = vsel %vm1305_vm6, %v7427_v41, -inf }
0x10b1   : > { %v3020_v4 = vmul.f32 0.25, %v2988_v23  ;;  %3040 = vmax.xlane.f32.xlu0 %v3039_v35 }
0x10b2   : > { %v5620_v45 = vpop.f32.mrf.mxu0 }
0x10b3   : > { %v7433_v48 = vsel %vm896_vm5, %v3020_v4, -1e+30 }
0x10b4   : > { %v2991_v6 = vpop.f32.mrf.mxu0  ;;  %v3042_v9 = vsel %vm1305_vm6, %v7433_v48, -inf }
0x10b5   : > { %v3021_v12 = vmul.f32 0.25, %v2991_v6  ;;  %3043 = vmax.xlane.f32.xlu0 %v3042_v9 }
0x10b6   : > { %v5621_v13 = vpop.f32.mrf.mxu0 }
0x10b7   : > { %v7439_v14 = vsel %vm896_vm5, %v3021_v12, -1e+30 }
0x10b8   : > { %v2996_v16 = vpop.f32.mrf.mxu0  ;;  %v3045_v17 = vsel %vm1305_vm6, %v7439_v14, -inf }
0x10b9   : > { %v3022_v54 = vmul.f32 0.25, %v2996_v16  ;;  %3046 = vmax.xlane.f32.xlu1 %v3045_v17 }
0x10ba   : > { %v5624_v43 = vpop.f32.mrf.mxu0 }
0x10bb   : > { %v7445_v26 = vsel %vm896_vm5, %v3022_v54, -1e+30 }
0x10bc   : > { %v2999_v27 = vpop.f32.mrf.mxu0  ;;  %v3048_v32 = vsel %vm1305_vm6, %v7445_v26, -inf }
0x10bd   : > { %v3023_v59 = vmul.f32 0.25, %v2999_v27  ;;  %3049 = vmax.xlane.f32.xlu0 %v3048_v32 }
0x10be   : > { %v5625_v34 = vpop.f32.mrf.mxu0 }
0x10bf   : > { %v7451_v63 = vsel %vm896_vm5, %v3023_v59, -1e+30 }
0x10c0   : > { %v3004_v3 = vpop.f32.mrf.mxu0  ;;  %v3051_v42 = vsel %vm1305_vm6, %v7451_v63, -inf }
0x10c1   : > { %v3024_v10 = vmul.f32 0.25, %v3004_v3  ;;  %3052 = vmax.xlane.f32.xlu1 %v3051_v42 }
0x10c2   : > { %v5628_v18 = vpop.f32.mrf.mxu0 }
0x10c3   : > { %v7457_v50 = vsel %vm896_vm5, %v3024_v10, -1e+30 }
0x10c4   : > { %v3007_v0 = vpop.f32.mrf.mxu0  ;;  %v3054_v8 = vsel %vm1305_vm6, %v7457_v50, -inf }
0x10c5   : > { %v3025_v46 = vmul.f32 0.25, %v3007_v0  ;;  %3055 = vmax.xlane.f32.xlu0 %v3054_v8 }
0x10c6   : > { %v5629_v15 = vpop.f32.mrf.mxu0 }
0x10c7   : > { %v7463_v29 = vsel %vm896_vm5, %v3025_v46, -1e+30 }
0x10c8   : > { %v3012_v36 = vpop.f32.mrf.mxu0  ;;  %v3057_v39 = vsel %vm1305_vm6, %v7463_v29, -inf }
0x10c9   : > { %v3026_v30 = vmul.f32 0.25, %v3012_v36  ;;  %3058 = vmax.xlane.f32.xlu1 %v3057_v39 }
0x10ca   : > { %v5632_v25 = vpop.f32.mrf.mxu0 }
0x10cb   : > { %v7469_v53 = vsel %vm896_vm5, %v3026_v30, -1e+30 }
0x10cc   : > { %v3015_v55 = vpop.f32.mrf.mxu0  ;;  %v3060_v57 = vsel %vm1305_vm6, %v7469_v53, -inf }
0x10cd   : > { %3061 = vmax.xlane.f32.xlu0 %v3060_v57 }
0x10ce   : > { %v5633_v49 = vpop.f32.mrf.mxu0 }
0x10d0   : > { %v3374_v37 = vpop.f32.mrf.mxu0 }
0x10d1   : > { %v3412_v58 = vmul.f32 0.25, %v3374_v37 }
0x10d2   : > { %v5676_v24 = vpop.f32.mrf.mxu0 }
0x10d3   : > { %v7475_v60 = vsel %vm896_vm5, %v3412_v58, -1e+30 }
0x10d4   : > { %v3377_v61 = vpop.f32.mrf.mxu0  ;;  %v3430_v1 = vsel %vm1305_vm6, %v7475_v60, -inf }
0x10d5   : > { %3431 = vmax.xlane.f32.xlu1 %v3430_v1  ;;  %v3413_v3 = vmul.f32 0.25, %v3377_v61 }
0x10d6   : > { %v5677_v2 = vpop.f32.mrf.mxu0 }
0x10d7   : > { %v7485_v42 = vsel %vm896_vm5, %v3413_v3, -1e+30 }
0x10d8   : > { %v3382_v23 = vpop.f32.mrf.mxu0 }
0x10d9   : > { %v3414_v18 = vmul.f32 0.25, %v3382_v23 }
0x10da   : > { %v5680_v35 = vpop.f32.mrf.mxu0 }
0x10db   : > { %v7497_v46 = vsel %vm896_vm5, %v3414_v18, -1e+30 }
0x10dc   : > { %v3385_v4 = vpop.f32.mrf.mxu0  ;;  %v3436_v30 = vsel %vm1305_vm6, %v7497_v46, -inf }
0x10dd   : > { %v3415_v10 = vmul.f32 0.25, %v3385_v4 }
0x10de   : > { %v5681_v45 = vpop.f32.mrf.mxu0 }
0x10e0   : > { %v3390_v6 = vpop.f32.mrf.mxu0 }
0x10e1   : > { %v3416_v15 = vmul.f32 0.25, %v3390_v6 }
0x10e2   : > { %v5684_v9 = vpop.f32.mrf.mxu0 }
0x10e3   : > { %3540 = vrot.lane.b32.xlu0 %v7308_v38, %s8140_s4  ;;  %v3433_v38 = vsel %vm1305_vm6, %v7485_v42, -inf  ;;  %v7509_v55 = vsel %vm896_vm5, %v3416_v15, -1e+30 }
0x10e4   : > { %v3393_v12 = vpop.f32.mrf.mxu0  ;;  %v3442_v37 = vsel %vm1305_vm6, %v7509_v55, -inf }
0x10e5   : > { %v3417_v0 = vmul.f32 0.25, %v3393_v12 }
0x10e6   : > { %3542 = vrot.lane.b32.xlu1 %v7314_v62, %s8140_s4  ;;  %v5685_v13 = vpop.f32.mrf.mxu0  ;;  %v7491_v62 = vsel %vm896_vm5, %v3415_v10, -1e+30 }
0x10e7   : > { %v3439_v8 = vsel %vm1305_vm6, %v7491_v62, -inf  ;;  %v7501_v36 = vsel %vm896_vm5, %v3417_v0, -1e+30 }
0x10e8   : > { %v3398_v16 = vpop.f32.mrf.mxu0  ;;  %v3445_v25 = vsel %vm1305_vm6, %v7501_v36, -inf }
0x10e9   : > { %v3418_v57 = vmul.f32 0.25, %v3398_v16 }
0x10ea   : > { %v5688_v17 = vpop.f32.mrf.mxu0 }
0x10eb   : > { %v7521_v24 = vsel %vm896_vm5, %v3418_v57, -1e+30 }
0x10ec   : > { %v3401_v54 = vpop.f32.mrf.mxu0  ;;  %v3448_v1 = vsel %vm1305_vm6, %v7521_v24, -inf }
0x10ed   : > { %v3419_v39 = vmul.f32 0.25, %v3401_v54 }
0x10ee   : > { %v5689_v43 = vpop.f32.mrf.mxu0 }
0x10ef   : > { %v7513_v49 = vsel %vm896_vm5, %v3419_v39, -1e+30 }
0x10f0   : > { %v3406_v27 = vpop.f32.mrf.mxu0  ;;  %v3451_v58 = vsel %vm1305_vm6, %v7513_v49, -inf }
0x10f1   : > { %v3420_v61 = vmul.f32 0.25, %v3406_v27 }
0x10f2   : > { %v5692_v32 = vpop.f32.mrf.mxu0 }
0x10f3   : > { %v7527_v2 = vsel %vm896_vm5, %v3420_v61, -1e+30 }
0x10f4   : > { %v3409_v59 = vpop.f32.mrf.mxu0  ;;  %v3454_v23 = vsel %vm1305_vm6, %v7527_v2, -inf }
0x10f6   : > { %v5693_v34 = vpop.f32.mrf.mxu0 }
0x1102   : > { %3434 = vmax.xlane.f32.xlu0 %v3433_v38 }
0x1106   : > { %3440 = vmax.xlane.f32.xlu0 %v3439_v8 }
0x110a   : > { %3437 = vmax.xlane.f32.xlu1 %v3436_v30  ;;  %3446 = vmax.xlane.f32.xlu0 %v3445_v25 }
0x110e   : > { %3443 = vmax.xlane.f32.xlu1 %v3442_v37  ;;  %3452 = vmax.xlane.f32.xlu0 %v3451_v58 }
0x1112   : > { %3449 = vmax.xlane.f32.xlu1 %v3448_v1 }
0x1116   : > { %3455 = vmax.xlane.f32.xlu1 %v3454_v23 }
0x1136   : > { %v3038_v35 = vpop.xlane.xlu1 %3037 }
0x1137   : > { %v3063_v4 = vsub.f32 %v7421_v56, %v3038_v35 }
0x1139   : > { %v3072_v45 = vmul.f32 1.442695, %v3063_v4 }
0x113a   : > { %v3041_v6 = vpop.xlane.xlu0 %3040 }
0x113b   : > { %6104 = vpow2.f32 %v3072_v45  ;;  %v3064_v9 = vsub.f32 %v7427_v41, %v3041_v6 }
0x113d   : > { %v3074_v12 = vmul.f32 1.442695, %v3064_v9 }
0x113e   : > { %v3044_v13 = vpop.xlane.xlu0 %3043 }
0x113f   : > { %6106 = vpow2.f32 %v3074_v12  ;;  %v3065_v52 = vsub.f32 %v7433_v48, %v3044_v13 }
0x1141   : > { %v3076_v16 = vmul.f32 1.442695, %v3065_v52 }
0x1142   : > { %v3047_v17 = vpop.xlane.xlu1 %3046 }
0x1143   : > { %6108 = vpow2.f32 %v3076_v16  ;;  %v3066_v54 = vsub.f32 %v7439_v14, %v3047_v17 }
0x1145   : > { %v3078_v43 = vmul.f32 1.442695, %v3066_v54 }
0x1146   : > { %v3050_v27 = vpop.xlane.xlu0 %3049 }
0x1147   : > { %6110 = vpow2.f32 %v3078_v43  ;;  %v3067_v56 = vsub.f32 %v7445_v26, %v3050_v27 }
0x1148   : > { %v7536_v32 = vpop.eup %6104 }
0x1149   : > { %v3080_v59 = vmul.f32 1.442695, %v3067_v56  ;;  %v3090_v41 = vsel %vm1305_vm6, %v7536_v32, 0.0 }
0x114a   : > { %3091 = vadd.xlane.f32.xlu0 %v3090_v41  ;;  %v3053_v34 = vpop.xlane.xlu1 %3052 }
0x114b   : > { %6112 = vpow2.f32 %v3080_v59  ;;  %v3068_v48 = vsub.f32 %v7451_v63, %v3053_v34 }
0x114c   : > { %v7541_v3 = vpop.eup %6106 }
0x114d   : > { %v3082_v10 = vmul.f32 1.442695, %v3068_v48  ;;  %v3093_v14 = vsel %vm1305_vm6, %v7541_v3, 0.0 }
0x114e   : > { %v3056_v38 = vpop.xlane.xlu0 %3055  ;;  %3094 = vadd.xlane.f32.xlu1 %v3093_v14 }
0x114f   : > { %6114 = vpow2.f32 %v3082_v10  ;;  %v3069_v26 = vsub.f32 %v7457_v50, %v3056_v38 }
0x1150   : > { %v7546_v18 = vpop.eup %6108 }
0x1151   : > { %v3084_v0 = vmul.f32 1.442695, %v3069_v26  ;;  %v3096_v8 = vsel %vm1305_vm6, %v7546_v18, 0.0 }
0x1152   : > { %3097 = vadd.xlane.f32.xlu0 %v3096_v8  ;;  %v3059_v15 = vpop.xlane.xlu1 %3058 }
0x1153   : > { %6116 = vpow2.f32 %v3084_v0  ;;  %v3070_v63 = vsub.f32 %v7463_v29, %v3059_v15 }
0x1154   : > { %v7551_v39 = vpop.eup %6110 }
0x1155   : > { %v3086_v30 = vmul.f32 1.442695, %v3070_v63  ;;  %v3099_v25 = vsel %vm1305_vm6, %v7551_v39, 0.0 }
0x1156   : > { %v3062_v57 = vpop.xlane.xlu0 %3061  ;;  %3100 = vadd.xlane.f32.xlu1 %v3099_v25 }
0x1157   : > { %6118 = vpow2.f32 %v3086_v30  ;;  %v3071_v50 = vsub.f32 %v7469_v53, %v3062_v57 }
0x1158   : > { %v7556_v37 = vpop.eup %6112 }
0x1159   : > { %v3088_v58 = vmul.f32 1.442695, %v3071_v50  ;;  %v3102_v61 = vsel %vm1305_vm6, %v7556_v37, 0.0 }
0x115a   : > { %3103 = vadd.xlane.f32.xlu1 %v3102_v61  ;;  %v7583_v16 = vpop.permute.xlu0 %3540 }
0x115b   : > { %6120 = vpow2.f32 %v3088_v58 }
0x115c   : > { %v7560_v29 = vpop.eup %6114 }
0x115d   : > { %v3105_v1 = vsel %vm1305_vm6, %v7560_v29, 0.0 }
0x115e   : > { %3106 = vadd.xlane.f32.xlu0 %v3105_v1  ;;  %v3432_v23 = vpop.xlane.xlu1 %3431 }
0x115f   : > { %v3457_v35 = vsub.f32 %v7475_v60, %v3432_v23 }
0x1160   : > { %v7565_v4 = vpop.eup %6116 }
0x1161   : > { %v3466_v53 = vmul.f32 1.442695, %v3457_v35  ;;  %v3108_v45 = vsel %vm1305_vm6, %v7565_v4, 0.0 }
0x1162   : > { %3109 = vadd.xlane.f32.xlu1 %v3108_v45  ;;  %v7586_v27 = vpop.permute.xlu1 %3542 }
0x1163   : > { %6122 = vpow2.f32 %v3466_v53 }
0x1164   : > { %v7569_v6 = vpop.eup %6118 }
0x1165   : > { %v3111_v9 = vsel %vm1305_vm6, %v7569_v6, 0.0 }
0x1166   : > { %3112 = vadd.xlane.f32.xlu0 %v3111_v9 }
0x1168   : > { %v7573_v12 = vpop.eup %6120 }
0x1169   : > { %v3114_v13 = vsel %vm1305_vm6, %v7573_v12, 0.0 }
0x116a   : > { %3115 = vadd.xlane.f32.xlu1 %v3114_v13 }
0x1170   : > { %v7577_v60 = vpop.eup %6122 }
0x1171   : > { %v3484_v52 = vsel %vm1305_vm6, %v7577_v60, 0.0 }
0x1172   : > { %3485 = vadd.xlane.f32.xlu1 %v3484_v52 }
0x117c   : > { %3538 = vrot.lane.b32.xlu0 %v7320_v7, %s8140_s4 }
0x118b   : > { %v3435_v17 = vpop.xlane.xlu0 %3434 }
0x118c   : > { %v3458_v54 = vsub.f32 %v7485_v42, %v3435_v17 }
0x118e   : > { %v3468_v43 = vmul.f32 1.442695, %v3458_v54 }
0x118f   : > { %v3441_v56 = vpop.xlane.xlu0 %3440 }
0x1190   : > { %6124 = vpow2.f32 %v3468_v43  ;;  %v3460_v59 = vsub.f32 %v7491_v62, %v3441_v56 }
0x1192   : > { %v3472_v14 = vmul.f32 1.442695, %v3460_v59 }
0x1193   : > { %v3438_v41 = vpop.xlane.xlu1 %3437  ;;  %v3447_v34 = vpop.xlane.xlu0 %3446 }
0x1194   : > { %v3459_v48 = vsub.f32 %v7497_v46, %v3438_v41  ;;  %v3462_v7 = vsub.f32 %v7501_v36, %v3447_v34 }
0x1196   : > { %v3470_v10 = vmul.f32 1.442695, %v3459_v48  ;;  %v3476_v0 = vmul.f32 1.442695, %v3462_v7  ;;  %v3564_v7 = vsel %vm1439_vm7, %v7586_v27, 0 }
0x1197   : > { %v3444_v38 = vpop.xlane.xlu1 %3443  ;;  %v3453_v23 = vpop.xlane.xlu0 %3452 }
0x1198   : > { %v3461_v26 = vsub.f32 %v7509_v55, %v3444_v38  ;;  %6126 = vpow2.f32 %v3470_v10  ;;  %v3464_v35 = vsub.f32 %v7513_v49, %v3453_v23 }
0x1199   : > { %6128 = vpow2.f32 %v3472_v14 }
0x119a   : > { %v3474_v42 = vmul.f32 1.442695, %v3461_v26  ;;  %v3480_v9 = vmul.f32 1.442695, %v3464_v35 }
0x119b   : > { %v3450_v8 = vpop.xlane.xlu1 %3449 }
0x119c   : > { %v3463_v15 = vsub.f32 %v7521_v24, %v3450_v8  ;;  %6130 = vpow2.f32 %v3474_v42 }
0x119d   : > { %v7593_v63 = vpop.eup %6124  ;;  %6132 = vpow2.f32 %v3476_v0 }
0x119e   : > { %v3478_v62 = vmul.f32 1.442695, %v3463_v15  ;;  %v3487_v46 = vsel %vm1305_vm6, %v7593_v63, 0.0 }
0x119f   : > { %3488 = vadd.xlane.f32.xlu1 %v3487_v46  ;;  %v3456_v53 = vpop.xlane.xlu1 %3455 }
0x11a0   : > { %6134 = vpow2.f32 %v3478_v62  ;;  %v3465_v45 = vsub.f32 %v7527_v2, %v3456_v53 }
0x11a1   : > { %6136 = vpow2.f32 %v3480_v9 }
0x11a2   : > { %v3482_v13 = vmul.f32 1.442695, %v3465_v45 }
0x11a5   : > { %v7597_v36 = vpop.eup %6126 }
0x11a6   : > { %v3490_v55 = vsel %vm1305_vm6, %v7597_v36, 0.0  ;;  %v7601_v30 = vpop.eup %6128 }
0x11a7   : > { %3491 = vadd.xlane.f32.xlu1 %v3490_v55  ;;  %v3493_v24 = vsel %vm1305_vm6, %v7601_v30, 0.0 }
0x11a9   : > { %v7603_v25 = vpop.eup %6130 }
0x11aa   : > { %v3496_v57 = vsel %vm1305_vm6, %v7603_v25, 0.0  ;;  %v7609_v50 = vpop.eup %6132 }
0x11ab   : > { %3494 = vadd.xlane.f32.xlu1 %v3493_v24  ;;  %3497 = vadd.xlane.f32.xlu0 %v3496_v57  ;;  %v3499_v1 = vsel %vm1305_vm6, %v7609_v50, 0.0 }
0x11ad   : > { %v7611_v58 = vpop.eup %6134 }
0x11ae   : > { %v3502_v61 = vsel %vm1305_vm6, %v7611_v58, 0.0  ;;  %v7623_v43 = vpop.eup %6136 }
0x11af   : > { %3500 = vadd.xlane.f32.xlu1 %v3499_v1  ;;  %3503 = vadd.xlane.f32.xlu0 %v3502_v61  ;;  %v3505_v2 = vsel %vm1305_vm6, %v7623_v43, 0.0 }
0x11c0   : > { %3536 = vrot.lane.b32.xlu1 %v7326_v20, %s8140_s4 }
0x11c5   : > { %3534 = vrot.lane.b32.xlu0 %v7312_v40, %s8140_s4  ;;  %s5100_s4 = sshll.u32 %s6436_s5, 4  ;;  %s6294_s5 = smov [#allocation4]  }
0x11c6   : > { %s8025_s0 = scalar_lea.hbm %s8083_s23, %s5100_s4  ;;  %s6227_s6 = sshll.u32 %s6294_s5, 4  ;;  %s6228_s6 = int_to_ptr.vmem [resolvable:$false] %s6227_s6 }
0x11c7   : > { %s6229_s8 = scalar_lea.vmem %s6228_s6, 32  ;;  %p6230_p0 = scmp.lt.s32.totalorder %s4801_s24, %s6228_s6 }
0x11c8   : > { %p6231_p1 = scmp.lt.s32.totalorder %s6229_s8, %s6223_s1 }
0x11ca   : > { %p6232_p2 = por %p6231_p1, %p6230_p0 }
0x11cc   : > { %p6233_p3 = pnand %p6232_p2, %p6226_p13 }
0x11d3   : > { %v3092_v52 = vpop.xlane.xlu0 %3091 }
0x11d4   : > { %6138 = vrcp.f32 %v3092_v52 }
0x11d5   : > { %6140 = vpow2.f32 %v3482_v13 }
0x11d7   : > { %v3095_v17 = vpop.xlane.xlu1 %3094 }
0x11d8   : > { %6142 = vrcp.f32 %v3095_v17 }
0x11db   : > { %v3098_v54 = vpop.xlane.xlu0 %3097 }
0x11dc   : > { %6144 = vrcp.f32 %v3098_v54 }
0x11df   : > { %v3101_v20 = vpop.xlane.xlu1 %3100 }
0x11e0   : > { %6146 = vrcp.f32 %v3101_v20 }
0x11e1   : > { %v6139_v40 = vpop.eup %6138 }
0x11e2   : > { %v7625_v49 = vpop.eup %6140  ;;  %v3118_v41 = vmul.f32 %v6139_v40, %v7536_v32 }
0x11e3   : > { %v3104_v56 = vpop.xlane.xlu1 %3103  ;;  %v3508_v14 = vsel %vm1305_vm6, %v7625_v49, 0.0 }
0x11e4   : > { %3506 = vadd.xlane.f32.xlu1 %v3505_v2  ;;  %6148 = vrcp.f32 %v3104_v56 }
0x11e5   : > { %v6143_v59 = vpop.eup %6142 }
0x11e6   : > { %v3120_v34 = vmul.f32 %v6143_v59, %v7541_v3 }
0x11e7   : > { %v3107_v48 = vpop.xlane.xlu0 %3106 }
0x11e8   : > { %v3135_v10 = vpack.c.bf16 %v3120_v34, %v3118_v41  ;;  %6150 = vrcp.f32 %v3107_v48  ;;  %3509 = vadd.xlane.f32.xlu1 %v3508_v14 }
0x11e9   : > { %v6145_v38 = vpop.eup %6144 }
0x11ea   : > { %5645 = vmatmul.mubr.msk.bf16.vlgmr.msra.gmra.mxu1 %vm1305_vm6, %v3135_v10  ;;  %v3122_v3 = vmul.f32 %v6145_v38, %v7546_v18 }
0x11eb   : > { %5695 = vmatpush3.bf16.msra.mxu1 %v3564_v7  ;;  %v3110_v26 = vpop.xlane.xlu1 %3109  ;;  %5648 = vmatprep.mubr.msk.bf16.mxu1 %vm6286_vm3, %v6285_v21 }
0x11ec   : > { %5696 = vmatprep.subr.bf16.mxu1 %v6285_v21  ;;  %6152 = vrcp.f32 %v3110_v26 }
0x11ed   : > { %v6147_v32 = vpop.eup %6146 }
0x11ee   : > { %v3124_v42 = vmul.f32 %v6147_v32, %v7551_v39 }
0x11ef   : > { %5697 = vmatpush3.bf16.msra.mxu1 %v7583_v16  ;;  %v3113_v0 = vpop.xlane.xlu0 %3112 }
0x11f0   : > { %6154 = vrcp.f32 %v3113_v0  ;;  %v3136_v27 = vpack.c.bf16 %v3124_v42, %v3122_v3  ;;  %5698 = vmatprep.subr.bf16.mxu1 %v6285_v21 }
0x11f1   : > { %v6149_v8 = vpop.eup %6148 }
0x11f2   : > { %5649 = vmatmul.mubr.msk.bf16.gmra.mxu1 %vm1305_vm6, %v3136_v27  ;;  %v3126_v39 = vmul.f32 %v6149_v8, %v7556_v37 }
0x11f3   : > { %v3539_v15 = vpop.permute.xlu0 %3538  ;;  %v3116_v62 = vpop.xlane.xlu1 %3115  ;;  %5652 = vmatprep.mubr.msk.bf16.mxu1 %vm6286_vm3, %v6285_v21 }
0x11f4   : > { %6156 = vrcp.f32 %v3116_v62  ;;  %5699 = vmatpush3.bf16.msra.mxu1 %v3539_v15 }
0x11f5   : > { %v6151_v18 = vpop.eup %6150  ;;  %5700 = vmatprep.subr.bf16.mxu1 %v6285_v21 }
0x11f6   : > { %v3128_v16 = vmul.f32 %v6151_v18, %v7560_v29 }
0x11f8   : > { %v3137_v46 = vpack.c.bf16 %v3128_v16, %v3126_v39 }
0x11f9   : > { %v6153_v55 = vpop.eup %6152 }
0x11fa   : > { %5653 = vmatmul.mubr.msk.bf16.gmra.mxu1 %vm1305_vm6, %v3137_v46  ;;  %v3130_v57 = vmul.f32 %v6153_v55, %v7565_v4 }
0x11fb   : > { %5656 = vmatprep.mubr.msk.bf16.mxu1 %vm6286_vm3, %v6285_v21  ;;  %v3486_v35 = vpop.xlane.xlu1 %3485 }
0x11fd   : > { %v6155_v24 = vpop.eup %6154 }
0x11fe   : > { %v3132_v61 = vmul.f32 %v6155_v24, %v7569_v6 }
0x1200   : > { %v3138_v1 = vpack.c.bf16 %v3132_v61, %v3130_v57 }
0x1201   : > { %v6157_v23 = vpop.eup %6156 }
0x1202   : > { %5657 = vmatmul.mubr.msk.bf16.gmra.mxu1 %vm1305_vm6, %v3138_v1  ;;  %v3134_v37 = vmul.f32 %v6157_v23, %v7573_v12 }
0x1203   : > { %5660 = vmatprep.mubr.msk.bf16.mxu1 %vm6286_vm3, %v6285_v21 }
0x1204   : > { %v3139_v29 = vpack.c.bf16 %v3134_v37, %v3134_v37 }
0x120a   : > { %5661 = vmatmul.mubr.msk.bf16.gmra.mxu1 %vm1305_vm6, %v3139_v29 }
0x120b   : > { %5704 = vmatprep.mubr.msk.bf16.mxu1 %vm6286_vm3, %v6285_v21 }
0x1228   : > { %v3489_v53 = vpop.xlane.xlu1 %3488 }
0x1229   : > { %6158 = vrcp.f32 %v3489_v53 }
0x122a   : > { %6160 = vrcp.f32 %v3486_v35 }
0x1230   : > { %v3492_v4 = vpop.xlane.xlu1 %3491 }
0x1234   : > { %v3498_v6 = vpop.xlane.xlu0 %3497  ;;  %v3495_v45 = vpop.xlane.xlu1 %3494 }
0x1235   : > { %6162 = vrcp.f32 %v3495_v45 }
0x1236   : > { %6164 = vrcp.f32 %v3492_v4  ;;  %v6159_v52 = vpop.eup %6158 }
0x1237   : > { %v6161_v12 = vpop.eup %6160  ;;  %v3514_v54 = vmul.f32 %v6159_v52, %v7593_v63 }
0x1238   : > { %v3501_v9 = vpop.xlane.xlu1 %3500  ;;  %v3504_v13 = vpop.xlane.xlu0 %3503  ;;  %v3512_v20 = vmul.f32 %v6161_v12, %v7577_v60 }
0x1239   : > { %6166 = vrcp.f32 %v3501_v9 }
0x123a   : > { %6168 = vrcp.f32 %v3498_v6  ;;  %v3529_v56 = vpack.c.bf16 %v3514_v54, %v3512_v20  ;;  %v5911_v54 = vld [vmem:[%s8069_s9 + $0x18] sm:$0xff]   ;;  %v5912_v20 = vld [vmem:[%s8069_s9 + $0x10] sm:$0xff]  }
0x123b   : > { %6170 = vrcp.f32 %v3504_v13  ;;  %5725 = vmatpush3.bf16.msra.mxu0 %v5911_v54 }
0x123c   : > { %v3537_v17 = vpop.permute.xlu1 %3536  ;;  %v3535_v40 = vpop.permute.xlu0 %3534  ;;  %5726 = vmatprep.subr.bf16.mxu0 %v6285_v21 }
0x123d   : > { %5701 = vmatpush3.bf16.msra.mxu1 %v3537_v17 }
0x123e   : > { %5702 = vmatprep.subr.bf16.mxu1 %v6285_v21 }
0x123f   : > { %5727 = vmatpush3.bf16.msra.mxu0 %v5912_v20 }
0x1240   : > { %5772 = vmatprep.subr.bf16.mxu0 %v6285_v21 }
0x1241   : > { %5703 = vmatpush3.bf16.msra.mxu1 %v3535_v40 }
0x1242   : > { %5748 = vmatprep.subr.bf16.mxu1 %v6285_v21  ;;  %v6163_v2 = vpop.eup %6162 }
0x1243   : > { %v6165_v59 = vpop.eup %6164  ;;  %v3518_v63 = vmul.f32 %v6163_v2, %v7601_v30 }
0x1244   : > { %5705 = vmatmul.mubr.msk.bf16.vlgmr.msra.gmra.mxu1 %vm1305_vm6, %v3529_v56  ;;  %v3516_v41 = vmul.f32 %v6165_v59, %v7597_v36 }
0x1245   : > { %5708 = vmatprep.mubr.msk.bf16.mxu1 %vm6286_vm3, %v6285_v21 }
0x1246   : > { %v3530_v34 = vpack.c.bf16 %v3518_v63, %v3516_v41  ;;  %v6167_v48 = vpop.eup %6166 }
0x1247   : > { %v6169_v60 = vpop.eup %6168  ;;  %v3522_v10 = vmul.f32 %v6167_v48, %v7609_v50 }
0x1248   : > { %v3520_v14 = vmul.f32 %v6169_v60, %v7603_v25  ;;  %v6171_v38 = vpop.eup %6170 }
0x1249   : > { %v3524_v32 = vmul.f32 %v6171_v38, %v7611_v58 }
0x124a   : > { %v3531_v7 = vpack.c.bf16 %v3522_v10, %v3520_v14 }
0x124c   : > { %5709 = vmatmul.mubr.msk.bf16.gmra.mxu1 %vm1305_vm6, %v3530_v34 }
0x124d   : > { %5712 = vmatprep.mubr.msk.bf16.mxu1 %vm6286_vm3, %v6285_v21 }
0x1254   : > { %5713 = vmatmul.mubr.msk.bf16.gmra.mxu1 %vm1305_vm6, %v3531_v7 }
0x1255   : > { %5716 = vmatprep.mubr.msk.bf16.mxu1 %vm6286_vm3, %v6285_v21 }
0x126d   : > { %v3507_v36 = vpop.xlane.xlu1 %3506 }
0x126e   : > { %6172 = vrcp.f32 %v3507_v36 }
0x1271   : > { %v3510_v30 = vpop.xlane.xlu1 %3509 }
0x1272   : > { %6174 = vrcp.f32 %v3510_v30 }
0x127b   : > { %v6173_v26 = vpop.eup %6172 }
0x127c   : > { %v3526_v3 = vmul.f32 %v6173_v26, %v7623_v43 }
0x127e   : > { %v3532_v50 = vpack.c.bf16 %v3526_v3, %v3524_v32 }
0x127f   : > { %v6175_v42 = vpop.eup %6174 }
0x1280   : > { %5717 = vmatmul.mubr.msk.bf16.gmra.mxu1 %vm1305_vm6, %v3532_v50  ;;  %v3528_v25 = vmul.f32 %v6175_v42, %v7625_v49 }
0x1281   : > { %5720 = vmatprep.mubr.msk.bf16.mxu1 %vm6286_vm3, %v6285_v21 }
0x1282   : > { %v3533_v0 = vpack.c.bf16 %v3528_v25, %v3528_v25 }
0x1288   : > { %5721 = vmatmul.mubr.msk.bf16.gmra.mxu1 %vm1305_vm6, %v3533_v0 }
0x1289   : > { %5752 = vmatprep.mubr.msk.bf16.mxu1 %vm6286_vm3, %v6285_v21 }
0x12aa   : > { %v3206_v27 = vpop.f32.mrf.mxu1 }
0x12ab   : > { %v5122_v8 = vpack.c.bf16 %v3206_v27, %v3206_v27 }
0x12ac   : > { %v5646_v58 = vpop.f32.mrf.mxu1 }
0x12ad   : > { %3281 = vst.msk [vmem:[#allocation3] sm:$0xf] %vm1552_vm8, %v5122_v8 }
0x12ae   : > { %v3209_v43 = vpop.f32.mrf.mxu1 }
0x12af   : > { %v5123_v15 = vpack.c.bf16 %v3209_v43, %v3209_v43 }
0x12b0   : > { %v5647_v62 = vpop.f32.mrf.mxu1 }
0x12b1   : > { %3282 = vst.msk [vmem:[#allocation3 + $0x4] sm:$0xf] %vm1552_vm8, %v5123_v15 }
0x12b2   : > { %v3214_v18 = vpop.f32.mrf.mxu1 }
0x12b3   : > { %v5124_v39 = vpack.c.bf16 %v3214_v18, %v3214_v18 }
0x12b4   : > { %v5650_v16 = vpop.f32.mrf.mxu1 }
0x12b5   : > { %3283 = vst.msk [vmem:[#allocation3 + $0x8] sm:$0xf] %vm1552_vm8, %v5124_v39 }
0x12b6   : > { %v3217_v49 = vpop.f32.mrf.mxu1 }
0x12b7   : > { %v5125_v46 = vpack.c.bf16 %v3217_v49, %v3217_v49 }
0x12b8   : > { %v5651_v55 = vpop.f32.mrf.mxu1 }
0x12b9   : > { %3284 = vst.msk [vmem:[#allocation3 + $0xc] sm:$0xf] %vm1552_vm8, %v5125_v46 }
0x12ba   : > { %v3222_v24 = vpop.f32.mrf.mxu1 }
0x12bb   : > { %v5126_v57 = vpack.c.bf16 %v3222_v24, %v3222_v24 }
0x12bc   : > { %v5654_v61 = vpop.f32.mrf.mxu1 }
0x12bd   : > { %3285 = vst.msk [vmem:[#allocation3 + $0x10] sm:$0xf] %vm1552_vm8, %v5126_v57 }
0x12be   : > { %v3225_v1 = vpop.f32.mrf.mxu1 }
0x12bf   : > { %v5127_v23 = vpack.c.bf16 %v3225_v1, %v3225_v1 }
0x12c0   : > { %v5655_v37 = vpop.f32.mrf.mxu1 }
0x12c1   : > { %3286 = vst.msk [vmem:[#allocation3 + $0x14] sm:$0xf] %vm1552_vm8, %v5127_v23 }
0x12c2   : > { %v3230_v29 = vpop.f32.mrf.mxu1 }
0x12c3   : > { %v5128_v35 = vpack.c.bf16 %v3230_v29, %v3230_v29 }
0x12c4   : > { %v5658_v53 = vpop.f32.mrf.mxu1 }
0x12c5   : > { %3287 = vst.msk [vmem:[#allocation3 + $0x18] sm:$0xf] %vm1552_vm8, %v5128_v35 }
0x12c6   : > { %v3233_v4 = vpop.f32.mrf.mxu1 }
0x12c7   : > { %v5129_v6 = vpack.c.bf16 %v3233_v4, %v3233_v4  ;;  %v5012_v4 = vld [vmem:[%s8070_s10 + $0x1] ss:$0 sm:$0xff] }
0x12c8   : > { %v5659_v45 = vpop.f32.mrf.mxu1 }
0x12c9   : > { %3288 = vst.msk [vmem:[#allocation3 + $0x1c] sm:$0xf] %vm1552_vm8, %v5129_v6 }
0x12ca   : > { %v3238_v9 = vpop.f32.mrf.mxu1 }
0x12cb   : > { %v5130_v13 = vpack.c.bf16 %v3238_v9, %v3238_v9 }
0x12cc   : > { %v5662_v52 = vpop.f32.mrf.mxu1 }
0x12cd   : > { %3289 = vst.msk [vmem:[#allocation3 + $0x20] sm:$0xf] %vm1552_vm8, %v5130_v13 }
0x12ce   : > { %v3241_v17 = vpop.f32.mrf.mxu1 }
0x12d0   : > { %v5663_v12 = vpop.f32.mrf.mxu1 }
0x1304   : > { %v3600_v40 = vpop.f32.mrf.mxu1 }
0x1305   : > { %v5131_v56 = vpack.c.bf16 %v3600_v40, %v3600_v40 }
0x1306   : > { %v5706_v2 = vpop.f32.mrf.mxu1 }
0x1307   : > { %3666 = vrot.lane.b32.xlu1 %v5131_v56, %s8141_s25 }
0x1308   : > { %v3603_v59 = vpop.f32.mrf.mxu1 }
0x1309   : > { %v5132_v63 = vpack.c.bf16 %v3603_v59, %v3603_v59 }
0x130a   : > { %v5707_v41 = vpop.f32.mrf.mxu1 }
0x130b   : > { %3668 = vrot.lane.b32.xlu0 %v5132_v63, %s8141_s25 }
0x130c   : > { %v3608_v34 = vpop.f32.mrf.mxu1 }
0x130d   : > { %v5133_v48 = vpack.c.bf16 %v3608_v34, %v3608_v34 }
0x130e   : > { %v5710_v60 = vpop.f32.mrf.mxu1 }
0x130f   : > { %3670 = vrot.lane.b32.xlu0 %v5133_v48, %s8141_s25 }
0x1310   : > { %v3611_v10 = vpop.f32.mrf.mxu1 }
0x1311   : > { %v5134_v14 = vpack.c.bf16 %v3611_v10, %v3611_v10 }
0x1312   : > { %v5711_v7 = vpop.f32.mrf.mxu1 }
0x1313   : > { %3672 = vrot.lane.b32.xlu0 %v5134_v14, %s8141_s25 }
0x1314   : > { %v3616_v36 = vpop.f32.mrf.mxu1 }
0x1315   : > { %v5135_v30 = vpack.c.bf16 %v3616_v36, %v3616_v36 }
0x1316   : > { %v5714_v38 = vpop.f32.mrf.mxu1 }
0x1317   : > { %3674 = vrot.lane.b32.xlu0 %v5135_v30, %s8141_s25 }
0x1318   : > { %v3619_v26 = vpop.f32.mrf.mxu1 }
0x1319   : > { %v5136_v32 = vpack.c.bf16 %v3619_v26, %v3619_v26 }
0x131a   : > { %v5715_v3 = vpop.f32.mrf.mxu1 }
0x131b   : > { %3676 = vrot.lane.b32.xlu0 %v5136_v32, %s8141_s25 }
0x1340   : > { %v3624_v50 = vpop.f32.mrf.mxu1 }
0x1341   : > { %v5137_v42 = vpack.c.bf16 %v3624_v50, %v3624_v50 }
0x1342   : > { %v5718_v25 = vpop.f32.mrf.mxu1 }
0x1343   : > { %3678 = vrot.lane.b32.xlu1 %v5137_v42, %s8141_s25 }
0x1344   : > { %v3627_v0 = vpop.f32.mrf.mxu1 }
0x1345   : > { %v5138_v27 = vpack.c.bf16 %v3627_v0, %v3627_v0 }
0x1346   : > { %v5719_v8 = vpop.f32.mrf.mxu1 }
0x1347   : > { %3680 = vrot.lane.b32.xlu0 %v5138_v27, %s8141_s25 }
0x1348   : > { %v3632_v58 = vpop.f32.mrf.mxu1 }
0x1349   : > { %v5139_v43 = vpack.c.bf16 %v3632_v58, %v3632_v58 }
0x134a   : > { %v5722_v15 = vpop.f32.mrf.mxu1 }
0x134b   : > { %3682 = vrot.lane.b32.xlu1 %v5139_v43, %s8141_s25  ;;  %s4788_s25 = scalar_lea.sflag [#allocation5], %s701_s2 }
0x134c   : > { %v3635_v62 = vpop.f32.mrf.mxu1 }
0x134e   : > { %v5723_v18 = vpop.f32.mrf.mxu1 }
0x1379   : > { %v3667_v39 = vpop.permute.xlu1 %3666 }
0x137a   : > { %3693 = vst.msk [vmem:[#allocation3] sm:$0xf] %vm1965_vm9, %v3667_v39 }
0x137d   : > { %v3669_v16 = vpop.permute.xlu0 %3668 }
0x137e   : > { %3694 = vst.msk [vmem:[#allocation3 + $0x4] sm:$0xf] %vm1965_vm9, %v3669_v16 }
0x1381   : > { %v3671_v49 = vpop.permute.xlu0 %3670 }
0x1382   : > { %3695 = vst.msk [vmem:[#allocation3 + $0x8] sm:$0xf] %vm1965_vm9, %v3671_v49 }
0x1385   : > { %v3673_v46 = vpop.permute.xlu0 %3672  ;;  %v5913_v55 = vld [vmem:[#allocation3] sm:$0xff]  }
0x1386   : > { %3696 = vst.msk [vmem:[#allocation3 + $0xc] sm:$0xf] %vm1965_vm9, %v3673_v46  ;;  %5729 = vmatmul.mubr.msk.bf16.vlgmr.msra.gmra.mxu0 %vm871_vm1, %v5913_v55 }
0x1387   : > { %5732 = vmatprep.mubr.msk.bf16.mxu0 %vm6286_vm3, %v6285_v21 }
0x1389   : > { %v3675_v24 = vpop.permute.xlu0 %3674 }
0x138a   : > { %3697 = vst.msk [vmem:[#allocation3 + $0x10] sm:$0xf] %vm1965_vm9, %v3675_v24 }
0x138d   : > { %v3677_v57 = vpop.permute.xlu0 %3676  ;;  %v5914_v61 = vld [vmem:[#allocation3 + $0x8] sm:$0xff]  }
0x138e   : > { %3698 = vst.msk [vmem:[#allocation3 + $0x14] sm:$0xf] %vm1965_vm9, %v3677_v57  ;;  %5733 = vmatmul.mubr.msk.bf16.gmra.mxu0 %vm871_vm1, %v5914_v61 }
0x138f   : > { %5736 = vmatprep.mubr.msk.bf16.mxu0 %vm6286_vm3, %v6285_v21 }
0x1395   : > { %v5915_v1 = vld [vmem:[#allocation3 + $0x10] sm:$0xff]  }
0x1396   : > { %5737 = vmatmul.mubr.msk.bf16.gmra.mxu0 %vm871_vm1, %v5915_v1 }
0x1397   : > { %5740 = vmatprep.mubr.msk.bf16.mxu0 %vm6286_vm3, %v6285_v21 }
0x13b5   : > { %v3679_v23 = vpop.permute.xlu1 %3678 }
0x13b6   : > { %3699 = vst.msk [vmem:[#allocation3 + $0x18] sm:$0xf] %vm1965_vm9, %v3679_v23 }
0x13b9   : > { %v3681_v37 = vpop.permute.xlu0 %3680 }
0x13ba   : > { %3700 = vst.msk [vmem:[#allocation3 + $0x1c] sm:$0xf] %vm1965_vm9, %v3681_v37 }
0x13bd   : > { %v3683_v29 = vpop.permute.xlu1 %3682 }
0x13be   : > { %3701 = vst.msk [vmem:[#allocation3 + $0x20] sm:$0xf] %vm1965_vm9, %v3683_v29 }
0x13c1   : > { %v5916_v35 = vld [vmem:[#allocation3 + $0x18] sm:$0xff]  }
0x13c2   : > { %5741 = vmatmul.mubr.msk.bf16.gmra.mxu0 %vm871_vm1, %v5916_v35 }
0x13c3   : > { %5744 = vmatprep.mubr.msk.bf16.mxu0 %vm6286_vm3, %v6285_v21 }
0x13c5   : > { %v5917_v53 = vld [vmem:[#allocation3 + $0x20] ss:$0 sps:$4 sm:$0xff]  }
0x13ca   : > { %5745 = vmatmul.mubr.msk.bf16.gmra.mxu0 %vm871_vm1, %v5917_v53 }
0x13cb   : > { %5788 = vmatprep.mubr.msk.bf16.mxu0 %vm6286_vm3, %v6285_v21 }
0x1446   : > { %v3808_v6 = vpop.f32.mrf.mxu0 }
0x1447   : > { %v3809_v45 = vadd.f32 %v5012_v4, %v3808_v6 }
0x1448   : > { %v5730_v9 = vpop.f32.mrf.mxu0 }
0x1449   : > { %v3846_v13 = vadd.f32 %v3809_v45, %v7169_v22 }
0x144a   : > { %v3811_v52 = vpop.f32.mrf.mxu0 }
0x144b   : > { %v3812_v17 = vadd.f32 %v5012_v4, %v3811_v52  ;;  %v3859_v12 = vsel %vm871_vm1, %v3846_v13, 0.0 }
0x144c   : > { %v5731_v54 = vpop.f32.mrf.mxu0  ;;  %3860 = vadd.xlane.f32.xlu0 %v3859_v12 }
0x144d   : > { %v3847_v20 = vadd.f32 %v3812_v17, %v7174_v44 }
0x144e   : > { %v3816_v40 = vpop.f32.mrf.mxu0 }
0x144f   : > { %v3817_v56 = vadd.f32 %v5012_v4, %v3816_v40  ;;  %v3862_v2 = vsel %vm871_vm1, %v3847_v20, 0.0 }
0x1450   : > { %v5734_v59 = vpop.f32.mrf.mxu0  ;;  %3863 = vadd.xlane.f32.xlu1 %v3862_v2 }
0x1451   : > { %v3848_v63 = vadd.f32 %v3817_v56, %v7179_v33 }
0x1452   : > { %v3819_v41 = vpop.f32.mrf.mxu0 }
0x1453   : > { %v3820_v34 = vadd.f32 %v5012_v4, %v3819_v41  ;;  %v3865_v22 = vsel %vm871_vm1, %v3848_v63, 0.0 }
0x1454   : > { %v5735_v48 = vpop.f32.mrf.mxu0  ;;  %3866 = vadd.xlane.f32.xlu0 %v3865_v22  ;;  %v5919_v22 = vld [vmem:[%s8073_s13 + $0x10] sm:$0xff]  }
0x1455   : > { %v3849_v60 = vadd.f32 %v3820_v34, %v7184_v28  ;;  %v5918_v34 = vld [vmem:[%s8073_s13 + $0x18] sm:$0xff]  }
0x1456   : > { %v3824_v10 = vpop.f32.mrf.mxu0  ;;  %5749 = vmatpush3.bf16.msra.mxu1 %v5918_v34 }
0x1457   : > { %v3825_v14 = vadd.f32 %v5012_v4, %v3824_v10  ;;  %v3868_v44 = vsel %vm871_vm1, %v3849_v60, 0.0  ;;  %5750 = vmatprep.subr.bf16.mxu1 %v6285_v21 }
0x1458   : > { %v5738_v7 = vpop.f32.mrf.mxu0  ;;  %3869 = vadd.xlane.f32.xlu0 %v3868_v44 }
0x1459   : > { %v3850_v36 = vadd.f32 %v3825_v14, %v7189_v47 }
0x145a   : > { %v3827_v30 = vpop.f32.mrf.mxu0  ;;  %5751 = vmatpush3.bf16.msra.mxu1 %v5919_v22 }
0x145b   : > { %v3828_v38 = vadd.f32 %v5012_v4, %v3827_v30  ;;  %v3871_v33 = vsel %vm871_vm1, %v3850_v36, 0.0 }
0x145c   : > { %v5739_v26 = vpop.f32.mrf.mxu0  ;;  %3872 = vadd.xlane.f32.xlu1 %v3871_v33 }
0x145d   : > { %v3851_v32 = vadd.f32 %v3828_v38, %v7194_v5 }
0x145f   : > { %v3874_v3 = vsel %vm871_vm1, %v3851_v32, 0.0 }
0x1460   : > { %3875 = vadd.xlane.f32.xlu0 %v3874_v3 }
0x1482   : > { %v3832_v28 = vpop.f32.mrf.mxu0 }
0x1483   : > { %v3833_v50 = vadd.f32 %v5012_v4, %v3832_v28 }
0x1484   : > { %v5742_v42 = vpop.f32.mrf.mxu0 }
0x1485   : > { %v3852_v25 = vadd.f32 %v3833_v50, %v7199_v11 }
0x1486   : > { %v3835_v0 = vpop.f32.mrf.mxu0 }
0x1487   : > { %v3836_v27 = vadd.f32 %v5012_v4, %v3835_v0  ;;  %v3877_v47 = vsel %vm871_vm1, %v3852_v25, 0.0 }
0x1488   : > { %v5743_v8 = vpop.f32.mrf.mxu0  ;;  %3878 = vadd.xlane.f32.xlu1 %v3877_v47 }
0x1489   : > { %v3853_v58 = vadd.f32 %v3836_v27, %v7204_v19 }
0x148a   : > { %v3840_v43 = vpop.f32.mrf.mxu0 }
0x148b   : > { %v3841_v15 = vadd.f32 %v5012_v4, %v3840_v43  ;;  %v3880_v5 = vsel %vm871_vm1, %v3853_v58, 0.0 }
0x148c   : > { %3881 = vadd.xlane.f32.xlu0 %v3880_v5  ;;  %v5746_v62 = vpop.f32.mrf.mxu0 }
0x148d   : > { %v7757_v18 = vadd.f32 %v3841_v15, %v7209_v31 }
0x148e   : > { %v3843_v39 = vpop.f32.mrf.mxu0 }
0x148f   : > { %v3883_v11 = vsel %vm871_vm1, %v7757_v18, 0.0 }
0x1490   : > { %3884 = vadd.xlane.f32.xlu1 %v3883_v11  ;;  %v5747_v16 = vpop.f32.mrf.mxu0 }
0x14d5   : > { %v3861_v49 = vpop.xlane.xlu0 %3860 }
0x14d6   : > { %v3886_v46 = vmul.f32 0.03125, %v3861_v49 }
0x14d8   : > { %v7761_v55 = vsub.f32 %v3846_v13, %v3886_v46 }
0x14d9   : > { %v3864_v19 = vpop.xlane.xlu1 %3863 }
0x14da   : > { %v3887_v24 = vmul.f32 0.03125, %v3864_v19  ;;  %v3904_v57 = vmul.f32 %v7761_v55, %v7761_v55 }
0x14dc   : > { %v7765_v61 = vsub.f32 %v3847_v20, %v3887_v24  ;;  %v3913_v31 = vsel %vm871_vm1, %v3904_v57, 0.0  ;;  %v5027_v24 = vld [vmem:[%s8071_s11 + $0x1] ss:$0 sm:$0xff] }
0x14dd   : > { %3914 = vadd.xlane.f32.xlu0 %v3913_v31  ;;  %v3867_v1 = vpop.xlane.xlu0 %3866 }
0x14de   : > { %v3888_v23 = vmul.f32 0.03125, %v3867_v1  ;;  %v3905_v37 = vmul.f32 %v7765_v61, %v7765_v61 }
0x14e0   : > { %v7770_v29 = vsub.f32 %v3848_v63, %v3888_v23  ;;  %v3916_v35 = vsel %vm871_vm1, %v3905_v37, 0.0 }
0x14e1   : > { %v3870_v53 = vpop.xlane.xlu0 %3869  ;;  %3917 = vadd.xlane.f32.xlu1 %v3916_v35 }
0x14e2   : > { %v3889_v4 = vmul.f32 0.03125, %v3870_v53  ;;  %v3906_v6 = vmul.f32 %v7770_v29, %v7770_v29  ;;  %v5028_v53 = vld [vmem:[%s8072_s12 + $0x1] ss:$0 sm:$0xff] }
0x14e4   : > { %v7775_v45 = vsub.f32 %v3849_v60, %v3889_v4  ;;  %v3919_v9 = vsel %vm871_vm1, %v3906_v6, 0.0 }
0x14e5   : > { %3920 = vadd.xlane.f32.xlu0 %v3919_v9  ;;  %v3873_v13 = vpop.xlane.xlu1 %3872 }
0x14e6   : > { %v3890_v52 = vmul.f32 0.03125, %v3873_v13  ;;  %v3907_v17 = vmul.f32 %v7775_v45, %v7775_v45 }
0x14e8   : > { %v7780_v12 = vsub.f32 %v3850_v36, %v3890_v52  ;;  %v3922_v54 = vsel %vm871_vm1, %v3907_v17, 0.0 }
0x14e9   : > { %v3876_v20 = vpop.xlane.xlu0 %3875  ;;  %3923 = vadd.xlane.f32.xlu1 %v3922_v54 }
0x14ea   : > { %v3891_v40 = vmul.f32 0.03125, %v3876_v20  ;;  %v3908_v56 = vmul.f32 %v7780_v12, %v7780_v12 }
0x14ec   : > { %v7785_v2 = vsub.f32 %v3851_v32, %v3891_v40  ;;  %v3925_v59 = vsel %vm871_vm1, %v3908_v56, 0.0 }
0x14ed   : > { %3926 = vadd.xlane.f32.xlu0 %v3925_v59 }
0x14ee   : > { %v3909_v63 = vmul.f32 %v7785_v2, %v7785_v2 }
0x14f0   : > { %v3928_v41 = vsel %vm871_vm1, %v3909_v63, 0.0 }
0x14f1   : > { %3929 = vadd.xlane.f32.xlu1 %v3928_v41 }
0x1511   : > { %v3879_v48 = vpop.xlane.xlu1 %3878 }
0x1512   : > { %v3892_v60 = vmul.f32 0.03125, %v3879_v48 }
0x1514   : > { %v7798_v10 = vsub.f32 %v3852_v25, %v3892_v60 }
0x1515   : > { %v3882_v14 = vpop.xlane.xlu0 %3881 }
0x1516   : > { %v3893_v44 = vmul.f32 0.03125, %v3882_v14  ;;  %v3910_v7 = vmul.f32 %v7798_v10, %v7798_v10 }
0x1518   : > { %v7802_v36 = vsub.f32 %v3853_v58, %v3893_v44  ;;  %v3931_v30 = vsel %vm871_vm1, %v3910_v7, 0.0 }
0x1519   : > { %3932 = vadd.xlane.f32.xlu0 %v3931_v30  ;;  %v3885_v38 = vpop.xlane.xlu1 %3884 }
0x151a   : > { %v3894_v33 = vmul.f32 0.03125, %v3885_v38  ;;  %v3911_v26 = vmul.f32 %v7802_v36, %v7802_v36 }
0x151c   : > { %v7808_v32 = vsub.f32 %v7757_v18, %v3894_v33  ;;  %v3934_v3 = vsel %vm871_vm1, %v3911_v26, 0.0 }
0x151d   : > { %3935 = vadd.xlane.f32.xlu1 %v3934_v3 }
0x151e   : > { %v3912_v28 = vmul.f32 %v7808_v32, %v7808_v32 }
0x1520   : > { %v3937_v50 = vsel %vm871_vm1, %v3912_v28, 0.0 }
0x1521   : > { %3938 = vadd.xlane.f32.xlu0 %v3937_v50 }
0x1566   : > { %v3915_v42 = vpop.xlane.xlu0 %3914 }
0x1567   : > { %v3940_v25 = vmul.f32 0.03125, %v3915_v42 }
0x1569   : > { %v3949_v0 = vadd.f32 1e-06, %v3940_v25 }
0x156a   : > { %v3918_v27 = vpop.xlane.xlu1 %3917 }
0x156b   : > { %6176 = vrsqrt.f32 %v3949_v0  ;;  %v3941_v47 = vmul.f32 0.03125, %v3918_v27 }
0x156d   : > { %v3950_v8 = vadd.f32 1e-06, %v3941_v47 }
0x156e   : > { %v3921_v58 = vpop.xlane.xlu0 %3920 }
0x156f   : > { %6178 = vrsqrt.f32 %v3950_v8  ;;  %v3942_v43 = vmul.f32 0.03125, %v3921_v58 }
0x1571   : > { %v3951_v15 = vadd.f32 1e-06, %v3942_v43 }
0x1572   : > { %v3924_v5 = vpop.xlane.xlu1 %3923 }
0x1573   : > { %6180 = vrsqrt.f32 %v3951_v15  ;;  %v3943_v62 = vmul.f32 0.03125, %v3924_v5 }
0x1575   : > { %v3952_v39 = vadd.f32 1e-06, %v3943_v62 }
0x1576   : > { %v3927_v11 = vpop.xlane.xlu0 %3926 }
0x1577   : > { %6182 = vrsqrt.f32 %v3952_v39  ;;  %v3944_v16 = vmul.f32 0.03125, %v3927_v11  ;;  %v5923_v11 = vld [vmem:[%s8075_s15 + $0x60] sm:$0xff]  }
0x1578   : > { %v6177_v49 = vpop.eup %6176 }
0x1579   : > { %v3967_v46 = vmul.f32 %v6177_v49, %v7761_v55  ;;  %v3953_v19 = vadd.f32 1e-06, %v3944_v16  ;;  %v5924_v16 = vld [vmem:[%s8075_s15 + $0x58] sm:$0xff]   ;;  %v5925_v49 = vld [vmem:[%s8075_s15 + $0x50] sm:$0xff]  }
0x157a   : > { %v3930_v57 = vpop.xlane.xlu1 %3929 }
0x157b   : > { %6184 = vrsqrt.f32 %v3953_v19  ;;  %v3945_v31 = vmul.f32 0.03125, %v3930_v57  ;;  %v3982_v23 = vmul.f32 %v5027_v24, %v3967_v46  ;;  %v5926_v46 = vld [vmem:[%s8075_s15 + $0x48] sm:$0xff]   ;;  %v5927_v19 = vld [vmem:[%s8075_s15 + $0x40] sm:$0xff]  }
0x157c   : > { %v6179_v1 = vpop.eup %6178 }
0x157d   : > { %v3968_v37 = vmul.f32 %v6179_v1, %v7765_v61  ;;  %v3954_v35 = vadd.f32 1e-06, %v3945_v31  ;;  %v3997_v6 = vadd.f32 %v5028_v53, %v3982_v23 }
0x157f   : > { %v3983_v4 = vmul.f32 %v5027_v24, %v3968_v37  ;;  %6186 = vrsqrt.f32 %v3954_v35 }
0x1580   : > { %v6181_v55 = vpop.eup %6180 }
0x1581   : > { %v3998_v9 = vadd.f32 %v5028_v53, %v3983_v4  ;;  %v3969_v13 = vmul.f32 %v6181_v55, %v7770_v29 }
0x1583   : > { %v4006_v52 = vpack.c.bf16 %v3998_v9, %v3997_v6  ;;  %v3984_v20 = vmul.f32 %v5027_v24, %v3969_v13 }
0x1584   : > { %v6183_v17 = vpop.eup %6182 }
0x1585   : > { %v3970_v54 = vmul.f32 %v6183_v17, %v7775_v45  ;;  %5753 = vmatmul.mubr.msk.bf16.vlgmr.msra.gmra.mxu1 %vm871_vm1, %v4006_v52  ;;  %v3999_v59 = vadd.f32 %v5028_v53, %v3984_v20 }
0x1586   : > { %5756 = vmatprep.mubr.msk.bf16.mxu1 %vm6286_vm3, %v6285_v21 }
0x1587   : > { %v3985_v61 = vmul.f32 %v5027_v24, %v3970_v54 }
0x1588   : > { %v6185_v40 = vpop.eup %6184 }
0x1589   : > { %v3971_v56 = vmul.f32 %v6185_v40, %v7780_v12  ;;  %v4000_v63 = vadd.f32 %v5028_v53, %v3985_v61 }
0x158b   : > { %v4007_v41 = vpack.c.bf16 %v4000_v63, %v3999_v59  ;;  %v3986_v22 = vmul.f32 %v5027_v24, %v3971_v56 }
0x158c   : > { %v6187_v34 = vpop.eup %6186 }
0x158d   : > { %v3972_v29 = vmul.f32 %v6187_v34, %v7785_v2  ;;  %5757 = vmatmul.mubr.msk.bf16.gmra.mxu1 %vm871_vm1, %v4007_v41  ;;  %v4001_v48 = vadd.f32 %v5028_v53, %v3986_v22 }
0x158e   : > { %5760 = vmatprep.mubr.msk.bf16.mxu1 %vm6286_vm3, %v6285_v21 }
0x158f   : > { %v3987_v45 = vmul.f32 %v5027_v24, %v3972_v29 }
0x1591   : > { %v4002_v60 = vadd.f32 %v5028_v53, %v3987_v45 }
0x1593   : > { %v4008_v14 = vpack.c.bf16 %v4002_v60, %v4001_v48 }
0x1595   : > { %5761 = vmatmul.mubr.msk.bf16.gmra.mxu1 %vm871_vm1, %v4008_v14 }
0x1596   : > { %5764 = vmatprep.mubr.msk.bf16.mxu1 %vm6286_vm3, %v6285_v21 }
0x15a2   : > { %v3933_v12 = vpop.xlane.xlu0 %3932 }
0x15a3   : > { %v3946_v44 = vmul.f32 0.03125, %v3933_v12 }
0x15a5   : > { %v3955_v7 = vadd.f32 1e-06, %v3946_v44 }
0x15a6   : > { %v3936_v30 = vpop.xlane.xlu1 %3935 }
0x15a7   : > { %6188 = vrsqrt.f32 %v3955_v7  ;;  %v3947_v2 = vmul.f32 0.03125, %v3936_v30 }
0x15a9   : > { %v3956_v38 = vadd.f32 1e-06, %v3947_v2 }
0x15aa   : > { %v3939_v33 = vpop.xlane.xlu0 %3938 }
0x15ab   : > { %6190 = vrsqrt.f32 %v3956_v38  ;;  %v3948_v26 = vmul.f32 0.03125, %v3939_v33 }
0x15ad   : > { %v3957_v3 = vadd.f32 1e-06, %v3948_v26 }
0x15af   : > { %6192 = vrsqrt.f32 %v3957_v3 }
0x15b4   : > { %v6189_v28 = vpop.eup %6188 }
0x15b5   : > { %v3973_v50 = vmul.f32 %v6189_v28, %v7798_v10  ;;  %v5920_v10 = vld [vmem:[%s8075_s15 + $0x78] sm:$0xff]  }
0x15b6   : > { %5773 = vmatpush3.bf16.msra.mxu0 %v5920_v10 }
0x15b7   : > { %v3988_v0 = vmul.f32 %v5027_v24, %v3973_v50  ;;  %5774 = vmatprep.subr.bf16.mxu0 %v6285_v21 }
0x15b8   : > { %v6191_v42 = vpop.eup %6190 }
0x15b9   : > { %v3974_v25 = vmul.f32 %v6191_v42, %v7802_v36  ;;  %v4003_v58 = vadd.f32 %v5028_v53, %v3988_v0  ;;  %v5921_v36 = vld [vmem:[%s8075_s15 + $0x70] sm:$0xff]  }
0x15ba   : > { %5775 = vmatpush3.bf16.msra.mxu0 %v5921_v36 }
0x15bb   : > { %v3989_v27 = vmul.f32 %v5027_v24, %v3974_v25  ;;  %5776 = vmatprep.subr.bf16.mxu0 %v6285_v21 }
0x15bc   : > { %v6193_v47 = vpop.eup %6192 }
0x15bd   : > { %v3975_v8 = vmul.f32 %v6193_v47, %v7808_v32  ;;  %v4004_v43 = vadd.f32 %v5028_v53, %v3989_v27  ;;  %v5922_v32 = vld [vmem:[%s8075_s15 + $0x68] sm:$0xff]  }
0x15be   : > { %5777 = vmatpush3.bf16.msra.mxu0 %v5922_v32 }
0x15bf   : > { %v4009_v15 = vpack.c.bf16 %v4004_v43, %v4003_v58  ;;  %v3990_v5 = vmul.f32 %v5027_v24, %v3975_v8  ;;  %5778 = vmatprep.subr.bf16.mxu0 %v6285_v21  ;;  %v7876_v24 = vld [vmem:[%s8074_s14 + $0x1] ss:$0 sm:$0xff] }
0x15c1   : > { %5765 = vmatmul.mubr.msk.bf16.gmra.mxu1 %vm871_vm1, %v4009_v15  ;;  %v4005_v62 = vadd.f32 %v5028_v53, %v3990_v5 }
0x15c2   : > { %5768 = vmatprep.mubr.msk.bf16.mxu1 %vm6286_vm3, %v6285_v21  ;;  %5779 = vmatpush3.bf16.msra.mxu0 %v5923_v11 }
0x15c3   : > { %v4010_v39 = vpack.c.bf16 %v4005_v62, %v4005_v62  ;;  %5780 = vmatprep.subr.bf16.mxu0 %v6285_v21 }
0x15c6   : > { %5781 = vmatpush3.bf16.msra.mxu0 %v5924_v16 }
0x15c7   : > { %5782 = vmatprep.subr.bf16.mxu0 %v6285_v21 }
0x15c9   : > { %5769 = vmatmul.mubr.msk.bf16.gmra.mxu1 %vm871_vm1, %v4010_v39 }
0x15ca   : > { %5783 = vmatpush3.bf16.msra.mxu0 %v5925_v49 }
0x15cb   : > { %5784 = vmatprep.subr.bf16.mxu0 %v6285_v21 }
0x15ce   : > { %5785 = vmatpush3.bf16.msra.mxu0 %v5926_v46 }
0x15cf   : > { %5786 = vmatprep.subr.bf16.mxu0 %v6285_v21 }
0x15d2   : > { %5787 = vmatpush3.bf16.msra.mxu0 %v5927_v19 }
0x1645   : > { %v4085_v57 = vpop.f32.mrf.mxu1 }
0x1646   : > { %v4086_v31 = vadd.f32 %v7876_v24, %v4085_v57 }
0x1647   : > { %v5754_v1 = vpop.f32.mrf.mxu1 }
0x1648   : > { %v4123_v23 = vmul.f32 %v4086_v31, %v4086_v31 }
0x1649   : > { %v4088_v37 = vpop.f32.mrf.mxu1 }
0x164a   : > { %v4132_v35 = vmul.f32 %v4123_v23, %v4086_v31  ;;  %v4089_v53 = vadd.f32 %v7876_v24, %v4088_v37 }
0x164b   : > { %v5755_v4 = vpop.f32.mrf.mxu1 }
0x164c   : > { %v4141_v55 = vmul.f32 0.044715, %v4132_v35  ;;  %v4124_v6 = vmul.f32 %v4089_v53, %v4089_v53 }
0x164d   : > { %v4093_v9 = vpop.f32.mrf.mxu1 }
0x164e   : > { %v4150_v13 = vadd.f32 %v4141_v55, %v4086_v31  ;;  %v4133_v52 = vmul.f32 %v4124_v6, %v4089_v53  ;;  %v4094_v17 = vadd.f32 %v7876_v24, %v4093_v9 }
0x164f   : > { %v5758_v54 = vpop.f32.mrf.mxu1 }
0x1650   : > { %v4159_v20 = vmul.f32 0.7978846, %v4150_v13  ;;  %v4142_v61 = vmul.f32 0.044715, %v4133_v52  ;;  %v4125_v40 = vmul.f32 %v4094_v17, %v4094_v17 }
0x1651   : > { %v4096_v56 = vpop.f32.mrf.mxu1 }
0x1652   : > { %6194 = vtanh.f32 %v4159_v20  ;;  %v4151_v59 = vadd.f32 %v4142_v61, %v4089_v53  ;;  %v4134_v63 = vmul.f32 %v4125_v40, %v4094_v17  ;;  %v4097_v41 = vadd.f32 %v7876_v24, %v4096_v56 }
0x1653   : > { %v5759_v34 = vpop.f32.mrf.mxu1 }
0x1654   : > { %v4160_v29 = vmul.f32 0.7978846, %v4151_v59  ;;  %v4143_v22 = vmul.f32 0.044715, %v4134_v63  ;;  %v4126_v45 = vmul.f32 %v4097_v41, %v4097_v41 }
0x1655   : > { %v4101_v48 = vpop.f32.mrf.mxu1 }
0x1656   : > { %6196 = vtanh.f32 %v4160_v29  ;;  %v4152_v60 = vadd.f32 %v4143_v22, %v4094_v17  ;;  %v4135_v14 = vmul.f32 %v4126_v45, %v4097_v41  ;;  %v4102_v12 = vadd.f32 %v7876_v24, %v4101_v48 }
0x1657   : > { %v5762_v44 = vpop.f32.mrf.mxu1 }
0x1658   : > { %v4161_v7 = vmul.f32 0.7978846, %v4152_v60  ;;  %v4144_v30 = vmul.f32 0.044715, %v4135_v14  ;;  %v4127_v2 = vmul.f32 %v4102_v12, %v4102_v12 }
0x1659   : > { %v4104_v38 = vpop.f32.mrf.mxu1 }
0x165a   : > { %6198 = vtanh.f32 %v4161_v7  ;;  %v4153_v33 = vadd.f32 %v4144_v30, %v4097_v41  ;;  %v4136_v26 = vmul.f32 %v4127_v2, %v4102_v12  ;;  %v4105_v3 = vadd.f32 %v7876_v24, %v4104_v38 }
0x165b   : > { %v5763_v28 = vpop.f32.mrf.mxu1 }
0x165c   : > { %v4162_v50 = vmul.f32 0.7978846, %v4153_v33  ;;  %v4145_v42 = vmul.f32 0.044715, %v4136_v26  ;;  %v4128_v25 = vmul.f32 %v4105_v3, %v4105_v3 }
0x165e   : > { %6200 = vtanh.f32 %v4162_v50  ;;  %v4154_v0 = vadd.f32 %v4145_v42, %v4102_v12  ;;  %v4137_v27 = vmul.f32 %v4128_v25, %v4105_v3 }
0x165f   : > { %v6195_v47 = vpop.eup %6194 }
0x1660   : > { %v4177_v8 = vadd.f32 1.0, %v6195_v47  ;;  %v4163_v58 = vmul.f32 0.7978846, %v4154_v0  ;;  %v4146_v43 = vmul.f32 0.044715, %v4137_v27 }
0x1662   : > { %6202 = vtanh.f32 %v4163_v58  ;;  %v4155_v15 = vadd.f32 %v4146_v43, %v4105_v3  ;;  %v4186_v62 = vmul.f32 0.5, %v4177_v8 }
0x1663   : > { %v6197_v5 = vpop.eup %6196 }
0x1664   : > { %v4178_v39 = vadd.f32 1.0, %v6197_v5  ;;  %v4164_v10 = vmul.f32 0.7978846, %v4155_v15  ;;  %v4195_v11 = vmul.f32 %v4186_v62, %v4086_v31 }
0x1666   : > { %v4187_v36 = vmul.f32 0.5, %v4178_v39  ;;  %6204 = vtanh.f32 %v4164_v10 }
0x1667   : > { %v6199_v32 = vpop.eup %6198 }
0x1668   : > { %v4196_v16 = vmul.f32 %v4187_v36, %v4089_v53  ;;  %v4179_v49 = vadd.f32 1.0, %v6199_v32 }
0x166a   : > { %v4204_v46 = vpack.c.bf16 %v4196_v16, %v4195_v11  ;;  %v4188_v57 = vmul.f32 0.5, %v4179_v49 }
0x166b   : > { %v6201_v19 = vpop.eup %6200 }
0x166c   : > { %v4180_v1 = vadd.f32 1.0, %v6201_v19  ;;  %5789 = vmatmul.mubr.bf16.vlgmr.msra.gmra.mxu0 %v4204_v46  ;;  %v4197_v35 = vmul.f32 %v4188_v57, %v4094_v17 }
0x166d   : > { %5792 = vmatprep.mubr.msk.bf16.mxu0 %vm6286_vm3, %v6285_v21 }
0x166e   : > { %v4189_v23 = vmul.f32 0.5, %v4180_v1 }
0x166f   : > { %v6203_v37 = vpop.eup %6202 }
0x1670   : > { %v4198_v4 = vmul.f32 %v4189_v23, %v4097_v41  ;;  %v4181_v55 = vadd.f32 1.0, %v6203_v37 }
0x1672   : > { %v4205_v6 = vpack.c.bf16 %v4198_v4, %v4197_v35  ;;  %v4190_v13 = vmul.f32 0.5, %v4181_v55 }
0x1673   : > { %v6205_v9 = vpop.eup %6204 }
0x1674   : > { %v4182_v52 = vadd.f32 1.0, %v6205_v9  ;;  %5793 = vmatmul.mubr.bf16.gmra.mxu0 %v4205_v6  ;;  %v4199_v53 = vmul.f32 %v4190_v13, %v4102_v12 }
0x1675   : > { %5796 = vmatprep.mubr.msk.bf16.mxu0 %vm6286_vm3, %v6285_v21 }
0x1676   : > { %v4191_v31 = vmul.f32 0.5, %v4182_v52  ;;  %v5059_v52 = vld [vmem:[%s8076_s16 + $0x1] ss:$0 sm:$0xff] }
0x1678   : > { %v4200_v54 = vmul.f32 %v4191_v31, %v4105_v3 }
0x167a   : > { %v4206_v20 = vpack.c.bf16 %v4200_v54, %v4199_v53 }
0x167c   : > { %5797 = vmatmul.mubr.bf16.gmra.mxu0 %v4206_v20 }
0x167d   : > { %5800 = vmatprep.mubr.msk.bf16.mxu0 %vm6286_vm3, %v6285_v21 }
0x1681   : > { %v4109_v61 = vpop.f32.mrf.mxu1 }
0x1682   : > { %v4110_v17 = vadd.f32 %v7876_v24, %v4109_v61 }
0x1683   : > { %v5766_v40 = vpop.f32.mrf.mxu1 }
0x1684   : > { %v4129_v56 = vmul.f32 %v4110_v17, %v4110_v17 }
0x1685   : > { %v4112_v59 = vpop.f32.mrf.mxu1 }
0x1686   : > { %v4138_v63 = vmul.f32 %v4129_v56, %v4110_v17  ;;  %v4113_v41 = vadd.f32 %v7876_v24, %v4112_v59  ;;  %v5928_v56 = vld [vmem:[%s8079_s19 + $0x18] ss:$12 sps:$4 sm:$0xff]   ;;  %v5930_v59 = vld [vmem:[%s8079_s19 + $0x1c] ss:$12 sps:$4 sm:$0xff]  }
0x1687   : > { %v5767_v34 = vpop.f32.mrf.mxu1  ;;  %4437 = vmatprep.subr.bf16.mxu1 %v5930_v59 }
0x1688   : > { %v4147_v29 = vmul.f32 0.044715, %v4138_v63  ;;  %v4130_v22 = vmul.f32 %v4113_v41, %v4113_v41  ;;  %4438 = vmatpush1.bf16.msra.mxu1 %v5928_v56 }
0x1689   : > { %v4117_v45 = vpop.f32.mrf.mxu1 }
0x168a   : > { %v4156_v48 = vadd.f32 %v4147_v29, %v4110_v17  ;;  %v4139_v60 = vmul.f32 %v4130_v22, %v4113_v41  ;;  %v4118_v14 = vadd.f32 %v7876_v24, %v4117_v45  ;;  %v5933_v22 = vld [vmem:[%s8079_s19 + $0x4] ss:$12 sps:$4 sm:$0xff]   ;;  %v5931_v45 = vld [vmem:[%s8079_s19] ss:$12 sps:$4 sm:$0xff]  }
0x168b   : > { %v5770_v12 = vpop.f32.mrf.mxu1  ;;  %4439 = vmatprep.subr.bf16.mxu1 %v5933_v22 }
0x168c   : > { %v4165_v44 = vmul.f32 0.7978846, %v4156_v48  ;;  %v4148_v7 = vmul.f32 0.044715, %v4139_v60  ;;  %v4131_v30 = vmul.f32 %v4118_v14, %v4118_v14  ;;  %4440 = vmatpush1.bf16.msra.mxu1 %v5931_v45  ;;  %v6293_v48 = vmov 0   ;;  %v5936_v60 = vld [vmem:[%s8081_s21 + $0x78] sm:$0xff]  }
0x168d   : > { %v4120_v2 = vpop.f32.mrf.mxu1  ;;  %4457 = vmatprep.mubr.bf16.mxu1 %v6293_v48  ;;  %5808 = vmatprep.subr.bf16.mxu1 %v6285_v21  ;;  %v5938_v12 = vld [vmem:[%s8081_s21 + $0x70] sm:$0xff]   ;;  %v4560_v48 = vld [vmem:[%s8082_s22] sm:$0x1] }
0x168e   : > { %6206 = vtanh.f32 %v4165_v44  ;;  %v4157_v38 = vadd.f32 %v4148_v7, %v4113_v41  ;;  %v4140_v33 = vmul.f32 %v4131_v30, %v4118_v14  ;;  %5301 = vmatprep.subr.bf16.mxu0 %v5936_v60  ;;  %v5939_v44 = vld [vmem:[%s8081_s21 + $0x30] sm:$0xff]   ;;  %v5940_v7 = vld [vmem:[%s8081_s21 + $0x68] sm:$0xff]   ;;  %v5943_v2 = vld [vmem:[%s8081_s21 + $0x60] sm:$0xff]  }
0x168f   : > { %v5771_v26 = vpop.f32.mrf.mxu1  ;;  %v5941_v30 = vld [vmem:[%s8081_s21 + $0x28] sm:$0xff]  }
0x1690   : > { %v4166_v3 = vmul.f32 0.7978846, %v4157_v38  ;;  %v4149_v28 = vmul.f32 0.044715, %v4140_v33  ;;  %v5944_v38 = vld [vmem:[%s8081_s21 + $0x20] sm:$0xff]   ;;  %v5946_v33 = vld [vmem:[%s8081_s21 + $0x58] sm:$0xff]  }
0x1691   : > { %v5947_v26 = vld [vmem:[%s8081_s21 + $0x18] sm:$0xff]  }
0x1692   : > { %6208 = vtanh.f32 %v4166_v3  ;;  %v4158_v50 = vadd.f32 %v4149_v28, %v4118_v14  ;;  %v5949_v3 = vld [vmem:[%s8081_s21 + $0x50] sm:$0xff]  }
0x1693   : > { %v5951_v28 = vld [vmem:[%s8081_s21 + $0x10] sm:$0xff]  }
0x1694   : > { %v4167_v42 = vmul.f32 0.7978846, %v4158_v50 }
0x1696   : > { %6210 = vtanh.f32 %v4167_v42 }
0x169b   : > { %v6207_v25 = vpop.eup %6206 }
0x169c   : > { %v4183_v0 = vadd.f32 1.0, %v6207_v25 }
0x169e   : > { %v4192_v47 = vmul.f32 0.5, %v4183_v0 }
0x169f   : > { %v6209_v27 = vpop.eup %6208 }
0x16a0   : > { %v4184_v24 = vadd.f32 1.0, %v6209_v27  ;;  %v4201_v43 = vmul.f32 %v4192_v47, %v4110_v17  ;;  %v4347_v27 = vld [vmem:[%s8077_s17] sm:$0x1] }
0x16a2   : > { %v4193_v8 = vmul.f32 0.5, %v4184_v24  ;;  %v4348_v24 = vld [vmem:[%s8078_s18] sm:$0x1] }
0x16a3   : > { %v6211_v58 = vpop.eup %6210 }
0x16a4   : > { %v4202_v15 = vmul.f32 %v4193_v8, %v4113_v41  ;;  %v4185_v5 = vadd.f32 1.0, %v6211_v58 }
0x16a6   : > { %v4207_v62 = vpack.c.bf16 %v4202_v15, %v4201_v43  ;;  %v4194_v39 = vmul.f32 0.5, %v4185_v5  ;;  %v5934_v43 = vld [vmem:[%s8079_s19 + $0x20] ss:$12 sps:$4 sm:$0xff]   ;;  %v5935_v5 = vld [vmem:[%s8079_s19 + $0x8] ss:$12 sps:$4 sm:$0xff]  }
0x16a8   : > { %5801 = vmatmul.mubr.bf16.gmra.mxu0 %v4207_v62  ;;  %v4203_v10 = vmul.f32 %v4194_v39, %v4118_v14  ;;  %v5937_v14 = vld [vmem:[%s8081_s21 + $0x38] sm:$0xff]   ;;  %v5945_v39 = vld [vmem:[%s8081_s21 + $0xb0] sm:$0xff]  }
0x16a9   : > { %5804 = vmatprep.mubr.msk.bf16.mxu0 %vm6286_vm3, %v6285_v21  ;;  %5302 = vmatpush3.bf16.msra.mxu0 %v5937_v14  ;;  %v5942_v62 = vld [vmem:[%s8081_s21 + $0xb8] sm:$0xff]  }
0x16aa   : > { %v4208_v36 = vpack.c.bf16 %v4203_v10, %v4203_v10  ;;  %5303 = vmatprep.subr.bf16.mxu0 %v5938_v12  ;;  %v5948_v10 = vld [vmem:[%s8081_s21 + $0xa8] sm:$0xff]  }
0x16ad   : > { %5304 = vmatpush3.bf16.msra.mxu0 %v5939_v44 }
0x16ae   : > { %5305 = vmatprep.subr.bf16.mxu0 %v5940_v7 }
0x16b0   : > { %5805 = vmatmul.mubr.bf16.gmra.mxu0 %v4208_v36  ;;  %v5950_v36 = vld [vmem:[%s8081_s21 + $0xa0] sm:$0xff]  }
0x16b1   : > { %5306 = vmatpush3.bf16.msra.mxu0 %v5941_v30 }
0x16b2   : > { %5307 = vmatprep.subr.bf16.mxu0 %v5943_v2 }
0x16b5   : > { %5308 = vmatpush3.bf16.msra.mxu0 %v5944_v38 }
0x16b6   : > { %5309 = vmatprep.subr.bf16.mxu0 %v5946_v33 }
0x16b9   : > { %5310 = vmatpush3.bf16.msra.mxu0 %v5947_v26 }
0x16ba   : > { %5311 = vmatprep.subr.bf16.mxu0 %v5949_v3 }
0x16bd   : > { %5312 = vmatpush3.bf16.msra.mxu0 %v5951_v28 }
0x172c   : > { %v4316_v32 = vpop.f32.mrf.mxu0 }
0x172d   : > { %v5952_v32 = vld [vmem:[%s8081_s21 + $0x98] sm:$0xff]  }
0x172e   : > { %v5790_v11 = vpop.f32.mrf.mxu0 }
0x172f   : > { %v5953_v11 = vld [vmem:[%s8081_s21 + $0x48] sm:$0xff]  }
0x1730   : > { %v4318_v16 = vpop.f32.mrf.mxu0  ;;  %5313 = vmatprep.subr.bf16.mxu0 %v5953_v11 }
0x1731   : > { %v5954_v16 = vld [vmem:[%s8081_s21 + $0x8] sm:$0xff]  }
0x1732   : > { %v5791_v49 = vpop.f32.mrf.mxu0  ;;  %5314 = vmatpush3.bf16.msra.mxu0 %v5954_v16 }
0x1733   : > { %v5955_v49 = vld [vmem:[%s8081_s21 + $0x90] sm:$0xff]  }
0x1734   : > { %v4322_v46 = vpop.f32.mrf.mxu0 }
0x1735   : > { %v5956_v46 = vld [vmem:[%s8081_s21 + $0x40] sm:$0xff]  }
0x1736   : > { %v5794_v19 = vpop.f32.mrf.mxu0  ;;  %5315 = vmatprep.subr.bf16.mxu0 %v5956_v46 }
0x1737   : > { %v5957_v19 = vld [vmem:[%s8081_s21] sm:$0xff]  }
0x1738   : > { %v4324_v57 = vpop.f32.mrf.mxu0  ;;  %5316 = vmatpush3.bf16.msra.mxu0 %v5957_v19 }
0x1739   : > { %v5958_v57 = vld [vmem:[%s8081_s21 + $0x88] sm:$0xff]  }
0x173a   : > { %v5795_v1 = vpop.f32.mrf.mxu0 }
0x173b   : > { %v5959_v1 = vld [vmem:[%s8081_s21 + $0x80] sm:$0xff]  }
0x173c   : > { %v4328_v23 = vpop.f32.mrf.mxu0 }
0x173d   : > { %v4408_v23 = vshrl.u32 %v894_v51, 7 }
0x173e   : > { %v5798_v37 = vpop.f32.mrf.mxu0 }
0x173f   : > { %v4409_v37 = vsub.s32 0, %v4408_v23 }
0x1740   : > { %v4330_v35 = vpop.f32.mrf.mxu0 }
0x1741   : > { %v4373_v35 = vld [vmem:[%s8080_s20] sm:$0x7] }
0x1742   : > { %v5799_v4 = vpop.f32.mrf.mxu0 }
0x1743   : > { %v4413_v4 = vsub.s32 1, %v4408_v23 }
0x1768   : > { %v4334_v55 = vpop.f32.mrf.mxu0 }
0x1769   : > { %v4410_v55 = vrot.slane %v4373_v35, %v4409_v37 }
0x176a   : > { %v5802_v6 = vpop.f32.mrf.mxu0 }
0x176b   : > { %v4414_v6 = vrot.slane %v4373_v35, %v4413_v4 }
0x176c   : > { %v4336_v9 = vpop.f32.mrf.mxu0 }
0x176e   : > { %v5803_v13 = vpop.f32.mrf.mxu0 }
0x1770   : > { %v4340_v31 = vpop.f32.mrf.mxu0 }
0x1771   : > { %v4341_v53 = vadd.f32 %v5059_v52, %v4340_v31  ;;  %v4417_v52 = vsub.s32 2, %v4408_v23 }
0x1772   : > { %v5806_v54 = vpop.f32.mrf.mxu0 }
0x1773   : > { %v4346_v20 = vadd.f32 %v4341_v53, %v7757_v18 }
0x1774   : > { %v4343_v61 = vpop.f32.mrf.mxu0 }
0x1775   : > { %v4349_v17 = vsel %vm883_vm2, %v4346_v20, 0.0  ;;  %v4418_v61 = vrot.slane %v4373_v35, %v4417_v52 }
0x1776   : > { %4350 = vadd.xlane.f32.xlu1 %v4349_v17  ;;  %v5807_v40 = vpop.f32.mrf.mxu0 }
0x17ff   : > { %v4351_v63 = vpop.xlane.xlu1 %4350 }
0x1800   : > { %v4352_v41 = vmul.f32 0.03125, %v4351_v63 }
0x1802   : > { %v4353_v34 = vsub.f32 %v4346_v20, %v4352_v41 }
0x1804   : > { %v4354_v29 = vmul.f32 %v4353_v34, %v4353_v34 }
0x1806   : > { %v4355_v18 = vsel %vm883_vm2, %v4354_v29, 0.0 }
0x1807   : > { %4356 = vadd.xlane.f32.xlu0 %v4355_v18 }
0x1890   : > { %v4357_v50 = vpop.xlane.xlu0 %4356 }
0x1891   : > { %v4358_v42 = vmul.f32 0.03125, %v4357_v50 }
0x1893   : > { %v4359_v25 = vadd.f32 1e-06, %v4358_v42 }
0x1895   : > { %6212 = vrsqrt.f32 %v4359_v25 }
0x18a2   : > { %v6213_v0 = vpop.eup %6212 }
0x18a3   : > { %v4361_v47 = vmul.f32 %v6213_v0, %v4353_v34 }
0x18a5   : > { %v4362_v8 = vmul.f32 %v4361_v47, %v4347_v27 }
0x18a7   : > { %v4363_v58 = vadd.f32 %v4362_v8, %v4348_v24 }
0x18a9   : > { %v4364_v15 = vpack.c.bf16 %v4363_v58, %v4363_v58 }
0x18ab   : > { %5074 = vmatmul.mubr.msk.bf16.vlgmr.msra.gmra.mxu1 %vm871_vm1, %v4364_v15 }
0x18ac   : > { %5809 = vmatpush3.bf16.msra.mxu1 %v5934_v43  ;;  %5812 = vmatprep.mubr.msk.bf16.mxu1 %vm6286_vm3, %v6285_v21 }
0x18ad   : > { %5810 = vmatprep.subr.bf16.mxu1 %v6285_v21 }
0x18b0   : > { %5811 = vmatpush3.bf16.msra.mxu1 %v5935_v5 }
0x18b1   : > { %5816 = vmatprep.subr.bf16.mxu1 %v6285_v21 }
0x18b3   : > { %5813 = vmatmul.mubr.msk.bf16.vlgmr.msra.gmra.mxu1 %vm871_vm1, %v4364_v15 }
0x18b4   : > { %5817 = vmatpush3.bf16.msra.mxu1 %v5942_v62  ;;  %5832 = vmatprep.mubr.msk.bf16.mxu1 %vm6286_vm3, %v6285_v21 }
0x18b5   : > { %5818 = vmatprep.subr.bf16.mxu1 %v6285_v21 }
0x18b8   : > { %5819 = vmatpush3.bf16.msra.mxu1 %v5945_v39 }
0x18b9   : > { %5820 = vmatprep.subr.bf16.mxu1 %v6285_v21 }
0x18bc   : > { %5821 = vmatpush3.bf16.msra.mxu1 %v5948_v10 }
0x18bd   : > { %5822 = vmatprep.subr.bf16.mxu1 %v6285_v21 }
0x18c0   : > { %5823 = vmatpush3.bf16.msra.mxu1 %v5950_v36 }
0x18c1   : > { %5824 = vmatprep.subr.bf16.mxu1 %v6285_v21 }
0x18c4   : > { %5825 = vmatpush3.bf16.msra.mxu1 %v5952_v32 }
0x18c5   : > { %5826 = vmatprep.subr.bf16.mxu1 %v6285_v21 }
0x18c8   : > { %5827 = vmatpush3.bf16.msra.mxu1 %v5955_v49 }
0x18c9   : > { %5828 = vmatprep.subr.bf16.mxu1 %v6285_v21 }
0x18cc   : > { %5829 = vmatpush3.bf16.msra.mxu1 %v5958_v57 }
0x18cd   : > { %5830 = vmatprep.subr.bf16.mxu1 %v6285_v21 }
0x18d0   : > { %5831 = vmatpush3.bf16.msra.mxu1 %v5959_v1 }
0x196b   : > { %v4459_v9 = vpop.f32.mrf.mxu1 }
0x196c   : > { %v4460_v13 = vadd.f32 %v4459_v9, %v4410_v55 }
0x196d   : > { %v4461_v31 = vpop.f32.mrf.mxu1 }
0x196e   : > { %v4462_v21 = vadd.f32 %v4461_v31, %v4414_v6  ;;  %v4506_v53 = vmax.f32 %v4460_v13, 0.0 }
0x196f   : > { %v4463_v54 = vpop.f32.mrf.mxu1 }
0x1970   : > { %v4507_v20 = vmax.f32 %v4462_v21, 0.0  ;;  %v4509_v40 = vpack.c.bf16 %v4506_v53, %v4506_v53 }
0x1971   : > { %v4464_v17 = vpop.f32.mrf.mxu1 }
0x1972   : > { %v4510_v51 = vpack.c.bf16 %v4507_v20, %v4507_v20 }
0x1973   : > { %v4500_v56 = vpop.f32.mrf.mxu1 }
0x1974   : > { %v4501_v59 = vadd.f32 %v4500_v56, %v4418_v61  ;;  %4737 = vmatprep.mubr.bf16.mxu0 %v4510_v51 }
0x1975   : > { %v5814_v63 = vpop.f32.mrf.mxu1  ;;  %4738 = vmatmul.mubr.bf16.vlgmr.msra.gmra.mxu0 %v4509_v40 }
0x1976   : > { %v4508_v41 = vmax.f32 %v4501_v59, 0.0 }
0x1977   : > { %v4503_v34 = vpop.f32.mrf.mxu1 }
0x1978   : > { %v4511_v29 = vpack.c.bf16 %v4508_v41, %v4508_v41 }
0x1979   : > { %v5815_v18 = vpop.f32.mrf.mxu1 }
0x197a   : > { %5833 = vmatmul.mubr.bf16.vlgmr.msra.gmra.mxu1 %v4511_v29 }
0x1a35   : > { %v5317_v22 = vpop.f32.mrf.mxu0 }
0x1a37   : > { %v5318_v45 = vpop.f32.mrf.mxu0 }
0x1a38   : > { %v5319_v60 = vadd.f32 %v5318_v45, %v5317_v22 }
0x1a39   : > { %v5320_v14 = vpop.f32.mrf.mxu0 }
0x1a3a   : > { %v4740_v12 = vadd.f32 %v5319_v60, %v4560_v48  ;;  %v4779_v44 = vpop.f32.mrf.mxu1 }
0x1a3b   : > { %v5321_v7 = vpop.f32.mrf.mxu0 }
0x1a3c   : > { %v4780_v30 = vadd.f32 %v4779_v44, %v4740_v12  ;;  %v5834_v2 = vpop.f32.mrf.mxu1 }
0x1a3e   : > { %v4782_v38 = vpop.f32.mrf.mxu1  ;;  %4786 = vst.msk [vmem:[%s702_s3] sm:$0x1] %vm4785_vm10, %v4780_v30 }
0x1a3f   : > { %6236 = shalt.err (!%p6233_p3)
}
0x1a40   : > { %s6237_s4 = scalar_lea.hbm %s8025_s0, 16  ;;  %s6241_s26 = scalar_lea.hbm %s8083_s23, 32 }
0x1a41   : > { %p6238_p4 = scmp.ne.s32.totalorder %s8025_s0, %s6237_s4  ;;  %p6242_p9 = scmp.lt.s32.totalorder %s8025_s0, %s8083_s23 }
0x1a42   : > { %p6243_p10 = scmp.lt.s32.totalorder %s6241_s26, %s6237_s4 }
0x1a43   : > { %p6239_p7 = pnand %p6238_p4, %p6453_p5 }
0x1a44   : > { %p6244_p11 = por %p6243_p10, %p6242_p9 }
0x1a45   : > { %p6240_p8 = pneg %p6239_p7 }
0x1a47   : > { %p6245_p12 = pnand %p6244_p11, %p6240_p8 }
0x1a49   : > { %6248 = shalt.err (!%p6245_p12)
}
0x1a4a   : > { %5836 = dma.vmem_to_hbm [thread:$0]  (%p6453_p5), %s4801_s24, 16, %s8025_s0, %s4788_s25   ;;  %v5835_v33 = vpop.f32.mrf.mxu1 }
0x1a4b PF: > { %s8142_s8 = sld [smem:[#allocation9_spill]] }
0x1a4c   : > { %s8143_s1 = sld [smem:[#allocation7_spill]] }
0x1a51   : > { %p5842_p13 = scmp.ge.s32.totalorder %s8142_s8, 2 }
0x1a52   : > { %s4812_s2 = sand.u32 1, %s8143_s1  }
0x1a53   : > { %p5839_p0 = pnand %p5842_p13, %p6457_p6  ;;  %s4813_s3 = scalar_lea.sflag [#allocation5], %s4812_s2 }
0x1a55   : > { %p5840_p1 = pneg %p5839_p0 }
0x1a57   : > { %6266 = dma.done.wait (%p5840_p1), %s4813_s3, 16  }
0x1a58   : > { %6268 = vsyncadd (%p5840_p1), %s4813_s3, 4294967280  ;;  %s8145_s25 = sld [smem:[#allocation10_spill]]  ;;  %s8148_s4 = smov %s6275_s30 }
0x1a59   : > { %s8146_s26 = sld [smem:[#allocation8_spill]] }
0x1a5a   : > { %s8147_s24 = sld [smem:[#allocation11_spill]] }
0x1a5e   : > { %p33_p2 = scmp.ge.s32.totalorder %s8145_s25, 4  }
0x1a5f   : > { %s8149_s30 = smov %s8146_s26 }
0x1a60   :  { %35 = sbr.rel (!%p33_p2) target bundleno = 13 (0xd), region = 159 }
0x1a65   :  { %4817 = vsyncpa [#allocation5], 1 }
0x1a66   :  { %4819 = vsyncpa [#allocation5 + $0x1], 1 }

</bundles_post_ra>
